<compile_context>
chip_gen: v5e
topology: v5e:2x2
jax: 0.10.0
libtpu: 0.0.40
codegen_flags: <defaults>
</compile_context>

<pallas_src>
import functools

import jax
import jax.numpy as jnp
from jax import lax
from jax.experimental import pallas as pl
from jax.experimental.pallas import tpu as pltpu


def _round_up(v, m):
    return (v + m - 1) // m * m


def _largest_divisor(n, ok):
    """Largest divisor d of n with ok(d); falls back to n (always legal block)."""
    for d in range(n, 0, -1):
        if n % d == 0 and ok(d):
            return d
    return n


# ---------------------------------------------------------------------------
# Kernel 1: TOH conv output rows per grid step + per-sample channel stats
# ---------------------------------------------------------------------------
def _conv_rows_kernel(x_ref, w_ref, b_ref, out_ref, sum_ref, ssq_ref, *,
                      KH, KW, stride, OW, TOH, Cin, Cout, fold_kw):
    # x_ref  : [1, Hp, Wp, Cin]            bf16 (whole padded image, resident per n)
    # w_ref  : [KH, KW*Cin, Cp] (fold_kw)  bf16, or [KH*KW, Cin, Cp]
    # b_ref  : [1, Cp]                     f32
    # out_ref: [1, TOH*OW, Cout]           bf16
    # sum_ref/ssq_ref: [1, 1, Cout]        f32 resident accumulators (per n)
    r = pl.program_id(1)
    Cp = b_ref.shape[-1]
    M = TOH * OW
    base = r * (TOH * stride)

    # bias folded into the f32 accumulator init (hoisted, single broadcast)
    acc = jnp.broadcast_to(b_ref[...], (M, Cp)).astype(jnp.float32)

    for kh in range(KH):
        if stride == 1:
            xh = x_ref[0, pl.ds(base + kh, TOH)]                  # [TOH, Wp, Cin]
        else:
            xh = x_ref[0, pl.ds(base + kh, TOH, stride=stride)]   # strided rows
        if fold_kw:
            # fold KW*Cin into the contraction: one dot per kh with K = KW*Cin
            slabs = []
            for kw in range(KW):
                if stride == 1:
                    xs = xh[:, kw:kw + OW, :]
                else:
                    xs = xh[:, kw:kw + stride * (OW - 1) + 1:stride, :]
                slabs.append(xs.reshape(M, Cin))
            patch = jnp.concatenate(slabs, axis=-1)               # [M, KW*Cin]
            acc = acc + jnp.dot(patch, w_ref[kh],
                                preferred_element_type=jnp.float32)
        else:
            # Cin already fills the contraction dim: per-tap dots
            for kw in range(KW):
                if stride == 1:
                    xs = xh[:, kw:kw + OW, :]
                else:
                    xs = xh[:, kw:kw + stride * (OW - 1) + 1:stride, :]
                acc = acc + jnp.dot(xs.reshape(M, Cin), w_ref[kh * KW + kw],
                                    preferred_element_type=jnp.float32)

    # drop MXU-only channel padding before the HBM round-trip; bf16 intermediate
    acc_c = acc[:, :Cout]
    out_ref[0] = acc_c.astype(out_ref.dtype)

    # per-(n, c) running sum / sum-of-squares over the spatial dims (f32 acc,
    # so InstanceNorm mean/var precision is independent of the bf16 store).
    @pl.when(r == 0)
    def _():
        sum_ref[...] = jnp.zeros_like(sum_ref)
        ssq_ref[...] = jnp.zeros_like(ssq_ref)

    sum_ref[...] += jnp.sum(acc_c, axis=0, keepdims=True).reshape(1, 1, Cout)
    ssq_ref[...] += jnp.sum(acc_c * acc_c, axis=0, keepdims=True).reshape(1, 1, Cout)


# ---------------------------------------------------------------------------
# Kernel 2: InstanceNorm2d (affine=False, eps=1e-5, biased var) + ReLU
# ---------------------------------------------------------------------------
def _norm_relu_kernel(x_ref, sum_ref, ssq_ref, o_ref, *, inv_s, eps,
                      use_norm, use_activation):
    y = x_ref[...].astype(jnp.float32)                 # (1, TQ, Cout)
    if use_norm:
        mean = sum_ref[...] * inv_s                    # (1, 1, Cout)
        var = jnp.maximum(ssq_ref[...] * inv_s - mean * mean, 0.0)
        inv = lax.rsqrt(var + eps)
        y = (y - mean) * inv
    if use_activation:
        y = jnp.maximum(y, 0.0)
    o_ref[...] = y.astype(o_ref.dtype)


# ---------------------------------------------------------------------------
# Wrapper: reflect pad (XLA), two pallas_calls, final NCHW layout
# ---------------------------------------------------------------------------
def conv_block_forward(x_nchw, weight_oihw, bias, *, stride=1, padding=0,
                       use_activation=True, use_norm=True):
    """ConvBlock forward (upsample=False path). x_nchw: [N, C_in, H, W] f32."""
    N, Cin, H, W = x_nchw.shape
    Cout, _, KH, KW = weight_oihw.shape

    if padding > 0:
        x_nchw = jnp.pad(
            x_nchw, ((0, 0), (0, 0), (padding, padding), (padding, padding)),
            mode="reflect")
    Hp, Wp = H + 2 * padding, W + 2 * padding
    OH = (Hp - KH) // stride + 1
    OW = (Wp - KW) // stride + 1
    Q = OH * OW

    # bf16 activations for the MXU (f32 accumulation in-kernel); one fused
    # XLA pad+transpose+cast pass.
    x_nhwc = jnp.transpose(x_nchw, (0, 2, 3, 1)).astype(jnp.bfloat16)

    # MXU N-dim padding (weights / bias / accumulator only — not stored to HBM)
    Cp = _round_up(Cout, 128)
    fold_kw = Cin < 128

    # weight [Cout,Cin,KH,KW] -> [KH,KW,Cin,Cp] bf16, folded or per-tap layout
    w = jnp.transpose(weight_oihw, (2, 3, 1, 0))                  # [KH,KW,Cin,Cout]
    w = jnp.pad(w, ((0, 0), (0, 0), (0, 0), (0, Cp - Cout)))
    if fold_kw:
        w = w.reshape(KH, KW * Cin, Cp).astype(jnp.bfloat16)
    else:
        w = w.reshape(KH * KW, Cin, Cp).astype(jnp.bfloat16)
    b = jnp.pad(bias, (0, Cp - Cout)).astype(jnp.float32).reshape(1, Cp)

    # ---- conv pass: choose TOH (divides OH, legal block, f32 acc in budget) ----
    acc_budget = 8 * 1024 * 1024
    TOH = _largest_divisor(
        OH, lambda d: d * OW * Cp * 4 <= acc_budget and ((d * OW) % 8 == 0 or d == OH))

    conv_flops = 2 * N * OH * OW * KH * KW * Cin * Cp
    conv_bytes = (N * Hp * Wp * Cin * 2 + w.size * 2 + b.size * 4
                  + N * Q * Cout * 2 + 2 * N * Cout * 4)

    conv_out, csum, cssq = pl.pallas_call(
        functools.partial(_conv_rows_kernel, KH=KH, KW=KW, stride=stride,
                          OW=OW, TOH=TOH, Cin=Cin, Cout=Cout, fold_kw=fold_kw),
        grid=(N, OH // TOH),
        in_specs=[
            # whole padded image per sample; index constant along the row-block
            # axis -> fetched once per n (no KH-fold read amplification)
            pl.BlockSpec((1, Hp, Wp, Cin), lambda n, r: (n, 0, 0, 0)),
            pl.BlockSpec(w.shape, lambda n, r: (0, 0, 0)),
            pl.BlockSpec((1, Cp), lambda n, r: (0, 0)),
        ],
        out_specs=(
            pl.BlockSpec((1, TOH * OW, Cout), lambda n, r: (n, r, 0)),
            pl.BlockSpec((1, 1, Cout), lambda n, r: (n, 0, 0)),
            pl.BlockSpec((1, 1, Cout), lambda n, r: (n, 0, 0)),
        ),
        out_shape=(
            jax.ShapeDtypeStruct((N, Q, Cout), jnp.bfloat16),
            jax.ShapeDtypeStruct((N, 1, Cout), jnp.float32),
            jax.ShapeDtypeStruct((N, 1, Cout), jnp.float32),
        ),
        compiler_params=pltpu.CompilerParams(
            dimension_semantics=("parallel", "arbitrary"),
            vmem_limit_bytes=48 * 1024 * 1024),
        cost_estimate=pl.CostEstimate(flops=conv_flops, transcendentals=0,
                                      bytes_accessed=conv_bytes),
    )(x_nhwc, w, b)

    # ---- norm+relu pass: large row tiles over the flattened spatial dim ----
    tile_budget = 12 * 1024 * 1024
    TQ = _largest_divisor(
        Q, lambda d: d * max(Cout, 128) * 6 <= tile_budget and (d % 8 == 0 or d == Q))

    inv_s = 1.0 / float(Q)
    norm_bytes = N * Q * Cout * (2 + 4) + 4 * N * Cout * 4

    y_flat = pl.pallas_call(
        functools.partial(_norm_relu_kernel, inv_s=inv_s, eps=1e-5,
                          use_norm=use_norm, use_activation=use_activation),
        grid=(N, Q // TQ),
        in_specs=[
            pl.BlockSpec((1, TQ, Cout), lambda n, q: (n, q, 0)),
            pl.BlockSpec((1, 1, Cout), lambda n, q: (n, 0, 0)),
            pl.BlockSpec((1, 1, Cout), lambda n, q: (n, 0, 0)),
        ],
        out_specs=pl.BlockSpec((1, TQ, Cout), lambda n, q: (n, q, 0)),
        out_shape=jax.ShapeDtypeStruct((N, Q, Cout), jnp.float32),
        compiler_params=pltpu.CompilerParams(
            dimension_semantics=("parallel", "parallel"),
            vmem_limit_bytes=48 * 1024 * 1024),
        cost_estimate=pl.CostEstimate(flops=6 * N * Q * Cout,
                                      transcendentals=N * Cout,
                                      bytes_accessed=norm_bytes),
    )(conv_out, csum, cssq)

    # PyTorch-style NCHW output
    return jnp.transpose(y_flat.reshape(N, OH, OW, Cout), (0, 3, 1, 2))


# ---------------------------------------------------------------------------
# Pure-JAX f32 reference (for correctness check)
# ---------------------------------------------------------------------------
def reference_forward(x, w, b, *, stride, padding):
    xp = jnp.pad(x, ((0, 0), (0, 0), (padding, padding), (padding, padding)),
                 mode="reflect") if padding > 0 else x
    y = lax.conv_general_dilated(
        xp, w, window_strides=(stride, stride), padding="VALID",
        dimension_numbers=("NCHW", "OIHW", "NCHW"))
    y = y + b[None, :, None, None]
    mean = jnp.mean(y, axis=(2, 3), keepdims=True)
    var = jnp.mean((y - mean) ** 2, axis=(2, 3), keepdims=True)
    y = (y - mean) * lax.rsqrt(var + 1e-5)
    return jnp.maximum(y, 0.0)


if __name__ == "__main__":
    # typical ConvBlock config at small shapes
    N, Cin, H, W = 2, 4, 16, 16
    Cout, KH, KW = 8, 3, 3
    stride, padding = 1, 1

    key = jax.random.PRNGKey(0)
    kx, kw, kb = jax.random.split(key, 3)

    x = jax.random.normal(kx, (N, Cin, H, W), dtype=jnp.float32)

    fan_in = Cin * KH * KW
    bound = 1.0 / (fan_in ** 0.5)
    weight = jax.random.uniform(kw, (Cout, Cin, KH, KW), dtype=jnp.float32,
                                minval=-bound, maxval=bound)
    bias = jax.random.uniform(kb, (Cout,), dtype=jnp.float32,
                              minval=-bound, maxval=bound)

    out = conv_block_forward(x, weight, bias, stride=stride, padding=padding,
                             use_activation=True, use_norm=True)
    out = jax.block_until_ready(out)

    ref = jax.block_until_ready(
        reference_forward(x, weight, bias, stride=stride, padding=padding))

    assert out.shape == (N, Cout, H, W), out.shape
    max_err = float(jnp.max(jnp.abs(out - ref)))
    # bf16 matmul operands / bf16 intermediate with f32 accumulation & stats
    assert jnp.allclose(out, ref, atol=5e-2, rtol=5e-2), max_err

    print("KERNEL_OK")
</pallas_src>

<mosaic_0001>
module attributes {stable_mosaic.version = 11 : i64} {
  func.func @_conv_rows_kernel(%arg0: i32, %arg1: i32, %arg2: memref<1x18x18x4xbf16, #tpu.memory_space<vmem>>, %arg3: memref<3x12x128xbf16, #tpu.memory_space<vmem>>, %arg4: memref<1x128xf32, #tpu.memory_space<vmem>>, %arg5: memref<1x256x8xbf16, #tpu.memory_space<vmem>>, %arg6: memref<1x1x8xf32, #tpu.memory_space<vmem>>, %arg7: memref<1x1x8xf32, #tpu.memory_space<vmem>>) attributes {dimension_semantics = [#tpu.dimension_semantics<parallel>, #tpu.dimension_semantics<arbitrary>], iteration_bounds = array<i64: 2, 1>, scalar_prefetch = 0 : i64, scratch_operands = 0 : i64, tpu.core_type = #tpu.core_type<tc>, window_params = [{transform_indices = @transform_0, window_bounds = array<i64: 1, 18, 18, 4>}, {pipeline_mode = #tpu.pipeline_mode<synchronous>, transform_indices = @transform_1, window_bounds = array<i64: 3, 12, 128>}, {pipeline_mode = #tpu.pipeline_mode<synchronous>, transform_indices = @transform_2, window_bounds = array<i64: 1, 128>}, {transform_indices = @transform_3, window_bounds = array<i64: 1, 256, 8>}, {transform_indices = @transform_4, window_bounds = array<i64: 1, 1, 8>}, {transform_indices = @transform_5, window_bounds = array<i64: 1, 1, 8>}]} {
    %c16_i32 = arith.constant 16 : i32
    %0 = arith.muli %arg1, %c16_i32 : i32
    %c0 = arith.constant 0 : index
    %c0_0 = arith.constant 0 : index
    %1 = vector.load %arg4[%c0, %c0_0] : memref<1x128xf32, #tpu.memory_space<vmem>>, vector<1x128xf32>
    %2 = vector.shape_cast %1 : vector<1x128xf32> to vector<1x128xf32>
    %3 = vector.broadcast %2 : vector<1x128xf32> to vector<256x128xf32>
    %c0_i32 = arith.constant 0 : i32
    %4 = arith.addi %0, %c0_i32 : i32
    %c0_1 = arith.constant 0 : index
    %5 = arith.index_cast %4 : i32 to index
    %c0_2 = arith.constant 0 : index
    %c0_3 = arith.constant 0 : index
    %6 = vector.load %arg2[%c0_1, %5, %c0_2, %c0_3] : memref<1x18x18x4xbf16, #tpu.memory_space<vmem>>, vector<1x16x18x4xbf16>
    %7 = vector.shape_cast %6 : vector<1x16x18x4xbf16> to vector<16x18x4xbf16>
    %8 = vector.extract_strided_slice %7 {offsets = [0, 0, 0], sizes = [16, 16, 4], strides = [1, 1, 1]} : vector<16x18x4xbf16> to vector<16x16x4xbf16>
    %9 = vector.shape_cast %8 : vector<16x16x4xbf16> to vector<256x4xbf16>
    %10 = vector.extract_strided_slice %7 {offsets = [0, 1, 0], sizes = [16, 16, 4], strides = [1, 1, 1]} : vector<16x18x4xbf16> to vector<16x16x4xbf16>
    %11 = vector.shape_cast %10 : vector<16x16x4xbf16> to vector<256x4xbf16>
    %12 = vector.extract_strided_slice %7 {offsets = [0, 2, 0], sizes = [16, 16, 4], strides = [1, 1, 1]} : vector<16x18x4xbf16> to vector<16x16x4xbf16>
    %13 = vector.shape_cast %12 : vector<16x16x4xbf16> to vector<256x4xbf16>
    %14 = tpu.concatenate %9, %11, %13 in 1 : vector<256x4xbf16>, vector<256x4xbf16>, vector<256x4xbf16> -> vector<256x12xbf16>
    %c0_4 = arith.constant 0 : index
    %c0_5 = arith.constant 0 : index
    %c0_6 = arith.constant 0 : index
    %15 = vector.load %arg3[%c0_4, %c0_5, %c0_6] : memref<3x12x128xbf16, #tpu.memory_space<vmem>>, vector<1x12x128xbf16>
    %16 = vector.shape_cast %15 : vector<1x12x128xbf16> to vector<12x128xbf16>
    %cst = arith.constant dense<0.000000e+00> : vector<256x128xf32>
    %17 = tpu.matmul %14, %16, %cst {dimension_numbers = #tpu.dot_dimension_numbers<[1], [0], [0], [1], [0, 0, 1, 1], [], []>} : vector<256x12xbf16>, vector<12x128xbf16>, vector<256x128xf32> -> vector<256x128xf32>
    %18 = arith.addf %3, %17 : vector<256x128xf32>
    %c1_i32 = arith.constant 1 : i32
    %19 = arith.addi %0, %c1_i32 : i32
    %c0_7 = arith.constant 0 : index
    %20 = arith.index_cast %19 : i32 to index
    %c0_8 = arith.constant 0 : index
    %c0_9 = arith.constant 0 : index
    %21 = vector.load %arg2[%c0_7, %20, %c0_8, %c0_9] : memref<1x18x18x4xbf16, #tpu.memory_space<vmem>>, vector<1x16x18x4xbf16>
    %22 = vector.shape_cast %21 : vector<1x16x18x4xbf16> to vector<16x18x4xbf16>
    %23 = vector.extract_strided_slice %22 {offsets = [0, 0, 0], sizes = [16, 16, 4], strides = [1, 1, 1]} : vector<16x18x4xbf16> to vector<16x16x4xbf16>
    %24 = vector.shape_cast %23 : vector<16x16x4xbf16> to vector<256x4xbf16>
    %25 = vector.extract_strided_slice %22 {offsets = [0, 1, 0], sizes = [16, 16, 4], strides = [1, 1, 1]} : vector<16x18x4xbf16> to vector<16x16x4xbf16>
    %26 = vector.shape_cast %25 : vector<16x16x4xbf16> to vector<256x4xbf16>
    %27 = vector.extract_strided_slice %22 {offsets = [0, 2, 0], sizes = [16, 16, 4], strides = [1, 1, 1]} : vector<16x18x4xbf16> to vector<16x16x4xbf16>
    %28 = vector.shape_cast %27 : vector<16x16x4xbf16> to vector<256x4xbf16>
    %29 = tpu.concatenate %24, %26, %28 in 1 : vector<256x4xbf16>, vector<256x4xbf16>, vector<256x4xbf16> -> vector<256x12xbf16>
    %c1 = arith.constant 1 : index
    %c0_10 = arith.constant 0 : index
    %c0_11 = arith.constant 0 : index
    %30 = vector.load %arg3[%c1, %c0_10, %c0_11] : memref<3x12x128xbf16, #tpu.memory_space<vmem>>, vector<1x12x128xbf16>
    %31 = vector.shape_cast %30 : vector<1x12x128xbf16> to vector<12x128xbf16>
    %cst_12 = arith.constant dense<0.000000e+00> : vector<256x128xf32>
    %32 = tpu.matmul %29, %31, %cst_12 {dimension_numbers = #tpu.dot_dimension_numbers<[1], [0], [0], [1], [0, 0, 1, 1], [], []>} : vector<256x12xbf16>, vector<12x128xbf16>, vector<256x128xf32> -> vector<256x128xf32>
    %33 = arith.addf %18, %32 : vector<256x128xf32>
    %c2_i32 = arith.constant 2 : i32
    %34 = arith.addi %0, %c2_i32 : i32
    %c0_13 = arith.constant 0 : index
    %35 = arith.index_cast %34 : i32 to index
    %c0_14 = arith.constant 0 : index
    %c0_15 = arith.constant 0 : index
    %36 = vector.load %arg2[%c0_13, %35, %c0_14, %c0_15] : memref<1x18x18x4xbf16, #tpu.memory_space<vmem>>, vector<1x16x18x4xbf16>
    %37 = vector.shape_cast %36 : vector<1x16x18x4xbf16> to vector<16x18x4xbf16>
    %38 = vector.extract_strided_slice %37 {offsets = [0, 0, 0], sizes = [16, 16, 4], strides = [1, 1, 1]} : vector<16x18x4xbf16> to vector<16x16x4xbf16>
    %39 = vector.shape_cast %38 : vector<16x16x4xbf16> to vector<256x4xbf16>
    %40 = vector.extract_strided_slice %37 {offsets = [0, 1, 0], sizes = [16, 16, 4], strides = [1, 1, 1]} : vector<16x18x4xbf16> to vector<16x16x4xbf16>
    %41 = vector.shape_cast %40 : vector<16x16x4xbf16> to vector<256x4xbf16>
    %42 = vector.extract_strided_slice %37 {offsets = [0, 2, 0], sizes = [16, 16, 4], strides = [1, 1, 1]} : vector<16x18x4xbf16> to vector<16x16x4xbf16>
    %43 = vector.shape_cast %42 : vector<16x16x4xbf16> to vector<256x4xbf16>
    %44 = tpu.concatenate %39, %41, %43 in 1 : vector<256x4xbf16>, vector<256x4xbf16>, vector<256x4xbf16> -> vector<256x12xbf16>
    %c2 = arith.constant 2 : index
    %c0_16 = arith.constant 0 : index
    %c0_17 = arith.constant 0 : index
    %45 = vector.load %arg3[%c2, %c0_16, %c0_17] : memref<3x12x128xbf16, #tpu.memory_space<vmem>>, vector<1x12x128xbf16>
    %46 = vector.shape_cast %45 : vector<1x12x128xbf16> to vector<12x128xbf16>
    %cst_18 = arith.constant dense<0.000000e+00> : vector<256x128xf32>
    %47 = tpu.matmul %44, %46, %cst_18 {dimension_numbers = #tpu.dot_dimension_numbers<[1], [0], [0], [1], [0, 0, 1, 1], [], []>} : vector<256x12xbf16>, vector<12x128xbf16>, vector<256x128xf32> -> vector<256x128xf32>
    %48 = arith.addf %33, %47 : vector<256x128xf32>
    %49 = vector.extract_strided_slice %48 {offsets = [0, 0], sizes = [256, 8], strides = [1, 1]} : vector<256x128xf32> to vector<256x8xf32>
    %50 = arith.truncf %49 : vector<256x8xf32> to vector<256x8xbf16>
    %c0_19 = arith.constant 0 : index
    %c0_20 = arith.constant 0 : index
    %c0_21 = arith.constant 0 : index
    %51 = vector.load %arg5[%c0_19, %c0_20, %c0_21] : memref<1x256x8xbf16, #tpu.memory_space<vmem>>, vector<1x256x8xbf16>
    %52 = vector.shape_cast %51 : vector<1x256x8xbf16> to vector<256x8xbf16>
    %53 = vector.shape_cast %50 : vector<256x8xbf16> to vector<1x256x8xbf16>
    tpu.vector_store %arg5[%c0_19, %c0_20, %c0_21], %53 {strides = array<i32>} : memref<1x256x8xbf16, #tpu.memory_space<vmem>>, vector<1x256x8xbf16>,
    %c0_i32_22 = arith.constant 0 : i32
    %54 = arith.cmpi eq, %arg1, %c0_i32_22 : i32
    %55 = arith.extui %54 : i1 to i32
    %c0_i32_23 = arith.constant 0 : i32
    %56 = arith.cmpi ne, %55, %c0_i32_23 : i32
    scf.if %56 {
      %cst_38 = arith.constant 0.000000e+00 : f32
      %70 = vector.broadcast %cst_38 : f32 to vector<1x1x8xf32>
      %c0_39 = arith.constant 0 : index
      %c0_40 = arith.constant 0 : index
      %c0_41 = arith.constant 0 : index
      %71 = vector.load %arg6[%c0_39, %c0_40, %c0_41] : memref<1x1x8xf32, #tpu.memory_space<vmem>>, vector<1x1x8xf32>
      tpu.vector_store %arg6[%c0_39, %c0_40, %c0_41], %70 {strides = array<i32>} : memref<1x1x8xf32, #tpu.memory_space<vmem>>, vector<1x1x8xf32>,
      %cst_42 = arith.constant 0.000000e+00 : f32
      %72 = vector.broadcast %cst_42 : f32 to vector<1x1x8xf32>
      %c0_43 = arith.constant 0 : index
      %c0_44 = arith.constant 0 : index
      %c0_45 = arith.constant 0 : index
      %73 = vector.load %arg7[%c0_43, %c0_44, %c0_45] : memref<1x1x8xf32, #tpu.memory_space<vmem>>, vector<1x1x8xf32>
      tpu.vector_store %arg7[%c0_43, %c0_44, %c0_45], %72 {strides = array<i32>} : memref<1x1x8xf32, #tpu.memory_space<vmem>>, vector<1x1x8xf32>,
    } else {
    }
    %c0_24 = arith.constant 0 : index
    %c0_25 = arith.constant 0 : index
    %c0_26 = arith.constant 0 : index
    %57 = vector.load %arg6[%c0_24, %c0_25, %c0_26] : memref<1x1x8xf32, #tpu.memory_space<vmem>>, vector<1x1x8xf32>
    %cst_27 = arith.constant dense<0.000000e+00> : vector<8xf32>
    %58 = vector.multi_reduction <add>, %49, %cst_27 [0] : vector<256x8xf32> to vector<8xf32>
    %59 = vector.shape_cast %58 : vector<8xf32> to vector<1x8xf32>
    %60 = vector.shape_cast %59 : vector<1x8xf32> to vector<1x1x8xf32>
    %61 = arith.addf %57, %60 : vector<1x1x8xf32>
    %c0_28 = arith.constant 0 : index
    %c0_29 = arith.constant 0 : index
    %c0_30 = arith.constant 0 : index
    %62 = vector.load %arg6[%c0_28, %c0_29, %c0_30] : memref<1x1x8xf32, #tpu.memory_space<vmem>>, vector<1x1x8xf32>
    tpu.vector_store %arg6[%c0_28, %c0_29, %c0_30], %61 {strides = array<i32>} : memref<1x1x8xf32, #tpu.memory_space<vmem>>, vector<1x1x8xf32>,
    %c0_31 = arith.constant 0 : index
    %c0_32 = arith.constant 0 : index
    %c0_33 = arith.constant 0 : index
    %63 = vector.load %arg7[%c0_31, %c0_32, %c0_33] : memref<1x1x8xf32, #tpu.memory_space<vmem>>, vector<1x1x8xf32>
    %64 = arith.mulf %49, %49 : vector<256x8xf32>
    %cst_34 = arith.constant dense<0.000000e+00> : vector<8xf32>
    %65 = vector.multi_reduction <add>, %64, %cst_34 [0] : vector<256x8xf32> to vector<8xf32>
    %66 = vector.shape_cast %65 : vector<8xf32> to vector<1x8xf32>
    %67 = vector.shape_cast %66 : vector<1x8xf32> to vector<1x1x8xf32>
    %68 = arith.addf %63, %67 : vector<1x1x8xf32>
    %c0_35 = arith.constant 0 : index
    %c0_36 = arith.constant 0 : index
    %c0_37 = arith.constant 0 : index
    %69 = vector.load %arg7[%c0_35, %c0_36, %c0_37] : memref<1x1x8xf32, #tpu.memory_space<vmem>>, vector<1x1x8xf32>
    tpu.vector_store %arg7[%c0_35, %c0_36, %c0_37], %68 {strides = array<i32>} : memref<1x1x8xf32, #tpu.memory_space<vmem>>, vector<1x1x8xf32>,
    return
  }
  func.func @transform_0(%arg0: i32, %arg1: i32) -> (i32, i32, i32, i32) {
    %c0_i32 = arith.constant 0 : i32
    %c0_i32_0 = arith.constant 0 : i32
    %c0_i32_1 = arith.constant 0 : i32
    %c0_i32_2 = arith.constant 0 : i32
    return %arg0, %c0_i32, %c0_i32_0, %c0_i32_1 : i32, i32, i32, i32
  }
  func.func @transform_1(%arg0: i32, %arg1: i32) -> (i32, i32, i32) {
    %c0_i32 = arith.constant 0 : i32
    %c0_i32_0 = arith.constant 0 : i32
    %c0_i32_1 = arith.constant 0 : i32
    %c0_i32_2 = arith.constant 0 : i32
    return %c0_i32, %c0_i32_0, %c0_i32_1 : i32, i32, i32
  }
  func.func @transform_2(%arg0: i32, %arg1: i32) -> (i32, i32) {
    %c0_i32 = arith.constant 0 : i32
    %c0_i32_0 = arith.constant 0 : i32
    %c0_i32_1 = arith.constant 0 : i32
    return %c0_i32, %c0_i32_0 : i32, i32
  }
  func.func @transform_3(%arg0: i32, %arg1: i32) -> (i32, i32, i32) {
    %c0_i32 = arith.constant 0 : i32
    %c0_i32_0 = arith.constant 0 : i32
    return %arg0, %arg1, %c0_i32 : i32, i32, i32
  }
  func.func @transform_4(%arg0: i32, %arg1: i32) -> (i32, i32, i32) {
    %c0_i32 = arith.constant 0 : i32
    %c0_i32_0 = arith.constant 0 : i32
    %c0_i32_1 = arith.constant 0 : i32
    return %arg0, %c0_i32, %c0_i32_0 : i32, i32, i32
  }
  func.func @transform_5(%arg0: i32, %arg1: i32) -> (i32, i32, i32) {
    %c0_i32 = arith.constant 0 : i32
    %c0_i32_0 = arith.constant 0 : i32
    %c0_i32_1 = arith.constant 0 : i32
    return %arg0, %c0_i32, %c0_i32_0 : i32, i32, i32
  }
}

</mosaic_0001>

<bundles_post_ra>
// kernel: tpu_custom_call.1
= control target key start
LH: loop header
LB: loop body
LE: loop exit
PB: predicated region body
PF: predicated region fallthrough
CT: control target
= control target key end

     0   :  { %11 = vsyncpa [#allocation3], 0  ;;  %s6429_s0 = inlined_call_operand.vmem [shape: bf16[2,18,18,4], index: 0, kind: input, shape index: {}]   ;;  %s6430_s1 = inlined_call_operand.vmem [shape: bf16[3,12,128], index: 1, kind: input, shape index: {}]   ;;  %s6431_s2 = inlined_call_operand.vmem [shape: f32[1,128], index: 2, kind: input, shape index: {}]   ;;  %s6432_s3 = inlined_call_operand.vmem [shape: bf16[2,256,8], index: 3, kind: output, shape index: {0}]   ;;  %s6433_s4 = inlined_call_operand.hbm [shape: f32[2,1,8], index: 4, kind: output, shape index: {1}]   ;;  %s6434_s5 = inlined_call_operand.hbm [shape: f32[2,1,8], index: 5, kind: output, shape index: {2}]  }
   0x1   :  { %13 = vsyncpa [#allocation3 + $0x1], 0 }
   0x2   :  { %14 = vsyncpa [#allocation5], 0 }
   0x3   :  { %16 = vsyncpa [#allocation5 + $0x1], 0  ;;  %s4531_s18 = smov 0   ;;  %s4533_s19 = smov 0  }
   0x4   :  { %s4535_s20 = smov 0   ;;  %s4537_s21 = smov 0  }
   0x5   :  { %s4539_s22 = smov 0   ;;  %s4541_s23 = smov 0  }
   0x6 LB: > { %s3855_s24 = sadd.s32 4294967295, %s4496_s23   ;;  %s3856_s25 = sadd.s32 4294967294, %s4496_s23   ;;  %s4496_s23 = sphi %s4541_s23, %s22_s23   ;;  %s4492_s22 = sphi %s4539_s22, %s6445_s22   ;;  %s4488_s21 = sphi %s4537_s21, %s6444_s21   ;;  %s4484_s20 = sphi %s4535_s20, %s6443_s20   ;;  %s4480_s19 = sphi %s4533_s19, %s6442_s19   ;;  %s4476_s18 = sphi %s4531_s18, %s6441_s18  }
   0x7   : > { %s34_s26 = sadd.s32 1, %s4492_s22  ;;  %s137_s27 = sadd.s32 1, %s4484_s20 }
   0x8   : > { %p36_p0 = scmp.ge.s32.totalorder %s34_s26, 2  ;;  %p147_p1 = scmp.ne.s32.totalorder %s4484_s20, %s4480_s19 }
   0x9   : > { %p148_p2 = scmp.eq.s32.totalorder %s3855_s24, 1  ;;  %p153_p3 = scmp.ne.s32.totalorder %s4480_s19, %s4476_s18 }
   0xa   : > { %s6447_s26 = smov (%p36_p0, %s34_s26), 0  ;;  %p154_p5 = scmp.eq.s32.totalorder %s3856_s25, 1 }
   0xb   : > { %p4571_p4 = por %p148_p2, %p147_p1  ;;  %s134_s29 = ssub.s32 %s4492_s22, %s6447_s26 }
   0xc   : > { %p3859_p6 = scmp.ge.s32.totalorder %s4496_s23, 1  ;;  %p135_p7 = scmp.eq.s32.totalorder %s134_s29, 0 }
   0xd   : > { %p4578_p8 = por %p154_p5, %p153_p3  ;;  %p212_p9 = scmp.lt.s32.totalorder %s4496_s23, 3 }
   0xe   : > { %s4584_s6 = scalar_select %p135_p7, %s4484_s20, %s137_s27  }
   0xf   : > { %p213_p10 = pnand %p3859_p6, %p212_p9 }
  0x10   : > { %p252_p11 = scmp.lt.s32.totalorder (!%p213_p10), %s4488_s21, 1  ;;  %s4498_s12 = smov (!%p213_p10), 8  }
  0x11   : > { %216 = sbr.rel (%p213_p10) target bundleno = 671 (0x29f), region = 32  ;;  %s4499_s13 = smov (!%p213_p10), 4  }
  0x12   : > { %s3700_s10 = scalar_lea.hbm (!%p213_p10), %s6433_s4, %s4488_s21  ;;  %s3713_s16 = scalar_lea.hbm (!%p213_p10), %s6434_s5, %s4488_s21 }
  0x16   : > { %s4588_s7 = scalar_select %p252_p11, %s4488_s21, 1  ;;  %vm759_vm0 = vcmask 1042432   ;;  %vm760_vm1 = vcmask 1046532   ;;  %vm324_vm3 = vsmask.f32 3328  ;;  %vm1204_vm6 = vcmask 1045504  }
  0x17   : > { %vm4596_vm2 = vmor %vm759_vm0, %vm760_vm1  ;;  %vm325_vm4 = vsmask.f32 7440  ;;  %vm1082_vm7 = vcmask 31744   ;;  %vm1131_vm8 = vcmask 64512   ;;  %vm1171_vm9 = vcmask 97280  }
  0x18   : > { %s4320_s8 = smul.u32 216, %s4588_s7  ;;  %vm4639_vm5 = vmor %vm324_vm3, %vm325_vm4  ;;  %s4265_s17 = sshll.u32 %s4588_s7, 7  ;;  %vm3457_vm10 = vcmask 60416   ;;  %vm3494_vm11 = vcmask 57344  }
  0x19   : > { %s5964_s25 = scalar_lea.vmem %s6432_s3, %s4265_s17  ;;  %s3704_s7 = sshll.u32 %s3700_s10, 4  ;;  %s3705_s7 = int_to_ptr.hbm [resolvable:$true] %s3704_s7 }
  0x1a   : > { %s4594_s11 = scalar_lea.vmem %s6429_s0, %s4320_s8  ;;  %s4406_s10 = scalar_lea.hbm %s6433_s4, 2 }
  0x1b   : > { %v4113_v1 = vld [vmem:[%s4594_s11 + $0x18] sm:$0xf]  ;;  %v4114_v2 = vld [vmem:[%s4594_s11 + $0x1c] sm:$0xf]  ;;  %v4115_v3 = vld [vmem:[%s4594_s11 + $0x20] sm:$0x1] }
  0x1c   : > { %v2443_v4 = vshrl.u32 %v4114_v2, 16  ;;  %v2449_v5 = vshll.u32 %v4115_v3, 16  ;;  %v4161_v6 = vrot.slane %v4113_v1, 9  ;;  %v2863_v7 = vrot.slane %v4114_v2, 5  ;;  %v276_v8 = vld [vmem:[%s4594_s11] sm:$0xf] }
  0x1d   : > { %v2866_v9 = vrot.slane %v4115_v3, 5  ;;  %v2430_v10 = vshrl.u32 %v4113_v1, 16  ;;  %v2433_v11 = vshll.u32 %v4113_v1, 16  ;;  %v277_v12 = vld [vmem:[%s4594_s11 + $0x4] sm:$0xf]  ;;  %v3863_v13 = vrot.slane %v276_v8, 9 }
  0x1e   : > { %v2864_v14 = vsel %vm4596_vm2, %v4161_v6, %v2863_v7  ;;  %v2865_v15 = vrot.slane %v2863_v7, 4  ;;  %v278_v16 = vld [vmem:[%s4594_s11 + $0x8] sm:$0x1]  ;;  %v341_v17 = vshrl.u32 %v277_v12, 16  ;;  %v764_v18 = vrot.slane %v277_v12, 5 }
  0x1f   : > { %v3101_v19 = vunpack.c.l.b16 %v2864_v14  ;;  %v347_v20 = vshll.u32 %v278_v16, 16  ;;  %v767_v21 = vrot.slane %v278_v16, 5  ;;  %v328_v22 = vshrl.u32 %v276_v8, 16  ;;  %v4609_v23 = vld [vmem:[%s4594_s11 + $0xc] sm:$0xf] }
  0x20   : > { %v2867_v24 = vsel %vm4596_vm2, %v2865_v15, %v2866_v9  ;;  %v765_v25 = vsel %vm4596_vm2, %v3863_v13, %v764_v18  ;;  %v766_v26 = vrot.slane %v764_v18, 4  ;;  %v331_v27 = vshll.u32 %v276_v8, 16  ;;  %v4616_v28 = vld [vmem:[%s4594_s11 + $0x10] sm:$0xf]  ;;  %v4619_v29 = vld [vmem:[%s4594_s11 + $0x14] sm:$0x1] }
  0x21   : > { %v3102_v30 = vunpack.c.l.b16 %v2867_v24  ;;  %v1002_v31 = vunpack.c.l.b16 %v765_v25  ;;  %v1395_v32 = vshrl.u32 %v4616_v28, 16  ;;  %v1401_v33 = vshll.u32 %v4619_v29, 16  ;;  %v312_v54 = vld [vmem:[%s4594_s11 + $0x90] sm:$0xf]  ;;  %v314_v60 = vld [vmem:[%s4594_s11 + $0x98] sm:$0x1] }
  0x22   : > { %v768_v34 = vsel %vm4596_vm2, %v766_v26, %v767_v21  ;;  %v4011_v35 = vrot.slane %v4609_v23, 9  ;;  %v1815_v36 = vrot.slane %v4616_v28, 5  ;;  %v1818_v37 = vrot.slane %v4619_v29, 5  ;;  %v313_v6 = vld [vmem:[%s4594_s11 + $0x94] sm:$0xf] }
  0x23   : > { %v3133_v38 = vpack.c.b16 %v3102_v30, %v3101_v19  ;;  %v1003_v39 = vunpack.c.l.b16 %v768_v34  ;;  %v1382_v40 = vshrl.u32 %v4609_v23, 16  ;;  %v1385_v41 = vshll.u32 %v4609_v23, 16  ;;  %v4116_v30 = vld [vmem:[%s4594_s11 + $0x24] sm:$0xf] }
  0x24   : > { %v1816_v42 = vsel %vm4596_vm2, %v4011_v35, %v1815_v36  ;;  %v1817_v43 = vrot.slane %v1815_v36, 4  ;;  %v2432_v44 = vrot.slane %v2430_v10, 4  ;;  %v2435_v45 = vrot.slane %v2433_v11, 5 }
  0x25   : > { %3149 = vrot.lane.b32.xlu0 %v3133_v38, %s4498_s12  ;;  %v1034_v46 = vpack.c.b16 %v1003_v39, %v1002_v31  ;;  %v2053_v47 = vunpack.c.l.b16 %v1816_v42  ;;  %v2439_v48 = vshll.u32 %v4114_v2, 16  ;;  %v2445_v49 = vrot.slane %v2443_v4, 4 }
  0x26   : > { %v1819_v50 = vsel %vm4596_vm2, %v1817_v43, %v1818_v37  ;;  %v2436_v51 = vor.u32 %v2435_v45, %v2432_v44  ;;  %v2451_v52 = vrot.slane %v2449_v5, 5  ;;  %v330_v53 = vrot.slane %v328_v22, 4  ;;  %v4117_v43 = vld [vmem:[%s4594_s11 + $0x28] sm:$0xf] }
  0x27   : > { %1050 = vrot.lane.b32.xlu1 %v1034_v46, %s4498_s12  ;;  %v2054_v55 = vunpack.c.l.b16 %v1819_v50  ;;  %v2441_v57 = vrot.slane %v2439_v48, 5  ;;  %v333_v58 = vrot.slane %v331_v27, 5  ;;  %v337_v59 = vshll.u32 %v277_v12, 16 }
  0x28   : > { %v2437_v61 = vrot.slane %v2436_v51, 4  ;;  %v343_v62 = vrot.slane %v341_v17, 4  ;;  %v349_v63 = vrot.slane %v347_v20, 5  ;;  %v3875_v1 = vrot.slane %v312_v54, 9 }
  0x29   : > { %v2085_v2 = vpack.c.b16 %v2054_v55, %v2053_v47  ;;  %v2446_v3 = vor.u32 %v2445_v49, %v2441_v57  ;;  %v334_v4 = vor.u32 %v333_v58, %v330_v53  ;;  %v339_v5 = vrot.slane %v337_v59, 5  ;;  %v4118_v47 = vld [vmem:[%s4594_s11 + $0x2c] sm:$0x1] }
  0x2a   : > { %v2442_v7 = vsel %vm4639_vm5, %v2437_v61, %v2441_v57  ;;  %v848_v8 = vrot.slane %v313_v6, 5  ;;  %v851_v9 = vrot.slane %v314_v60, 5  ;;  %v616_v10 = vshrl.u32 %v312_v54, 16 }
  0x2b   : > { %2101 = vrot.lane.b32.xlu2 %v2085_v2, %s4498_s12  ;;  %v2447_v11 = vrot.slane %v2446_v3, 4  ;;  %v3021_v12 = vunpack.c.l.b16 %v2442_v7  ;;  %v335_v13 = vrot.slane %v334_v4, 4  ;;  %v344_v14 = vor.u32 %v343_v62, %v339_v5 }
  0x2c   : > { %v849_v15 = vsel %vm4596_vm2, %v3875_v1, %v848_v8  ;;  %v850_v16 = vrot.slane %v848_v8, 4  ;;  %v618_v17 = vrot.slane %v616_v10, 4  ;;  %v619_v18 = vshll.u32 %v312_v54, 16 }
  0x2d   : > { %v2452_v19 = vsel %vm4639_vm5, %v2447_v11, %v2451_v52  ;;  %v340_v20 = vsel %vm4639_vm5, %v335_v13, %v339_v5  ;;  %v345_v21 = vrot.slane %v344_v14, 4  ;;  %v1026_v22 = vunpack.c.l.b16 %v849_v15 }
  0x2e   : > { %v3022_v24 = vunpack.c.l.b16 %v2452_v19  ;;  %v922_v25 = vunpack.c.l.b16 %v340_v20  ;;  %v852_v26 = vsel %vm4596_vm2, %v850_v16, %v851_v9  ;;  %v621_v27 = vrot.slane %v619_v18, 5 }
  0x2f   : > { %v350_v31 = vsel %vm4639_vm5, %v345_v21, %v349_v63  ;;  %v1027_v34 = vunpack.c.l.b16 %v852_v26  ;;  %v625_v35 = vshll.u32 %v313_v6, 16  ;;  %v629_v36 = vshrl.u32 %v313_v6, 16  ;;  %v4687_v21 = vld [vmem:[%s4594_s11 + $0x10] sm:$0xf] }
  0x30   : > { %v3053_v37 = vpack.c.b16 %v3022_v24, %v3021_v12  ;;  %v923_v38 = vunpack.c.l.b16 %v350_v31  ;;  %v622_v39 = vor.u32 %v621_v27, %v618_v17  ;;  %v635_v42 = vshll.u32 %v314_v60, 16  ;;  %v4695_v31 = vld [vmem:[%s4594_s11 + $0x14] sm:$0x1] }
  0x31   : > { %v1046_v44 = vpack.c.b16 %v1027_v34, %v1026_v22  ;;  %v627_v45 = vrot.slane %v625_v35, 5  ;;  %v631_v46 = vrot.slane %v629_v36, 4  ;;  %v2454_v48 = vshrl.u32 %v4116_v30, 16  ;;  %v3966_v36 = vld [vmem:[%s4594_s11 + $0x18] sm:$0xf] }
  0x32   : > { %3069 = vrot.lane.b32.xlu0 %v3053_v37, %s4499_s13  ;;  %v954_v49 = vpack.c.b16 %v923_v38, %v922_v25  ;;  %v623_v50 = vrot.slane %v622_v39, 4  ;;  %v637_v51 = vrot.slane %v635_v42, 5  ;;  %v2457_v52 = vshll.u32 %v4116_v30, 16 }
  0x33   : > { %1074 = vrot.lane.b32.xlu2 %v1046_v44, %s4498_s12  ;;  %v632_v53 = vor.u32 %v631_v46, %v627_v45  ;;  %v2456_v54 = vrot.slane %v2454_v48, 4  ;;  %v2463_v55 = vshll.u32 %v4117_v43, 16  ;;  %v2467_v57 = vshrl.u32 %v4117_v43, 16 }
  0x34   : > { %970 = vrot.lane.b32.xlu1 %v954_v49, %s4499_s13  ;;  %v628_v58 = vsel %vm4639_vm5, %v623_v50, %v627_v45  ;;  %v2459_v59 = vrot.slane %v2457_v52, 5  ;;  %v2473_v60 = vshll.u32 %v4118_v47, 16  ;;  %v1384_v61 = vrot.slane %v1382_v40, 4 }
  0x35   : > { %v633_v62 = vrot.slane %v632_v53, 4  ;;  %v946_v63 = vunpack.c.l.b16 %v628_v58  ;;  %v2465_v1 = vrot.slane %v2463_v55, 5  ;;  %v2469_v2 = vrot.slane %v2467_v57, 4 }
  0x36   : > { %v2460_v3 = vor.u32 %v2459_v59, %v2456_v54  ;;  %v2475_v4 = vrot.slane %v2473_v60, 5  ;;  %v1387_v5 = vrot.slane %v1385_v41, 5  ;;  %v1391_v6 = vshll.u32 %v4616_v28, 16 }
  0x37   : > { %v638_v7 = vsel %vm4639_vm5, %v633_v62, %v637_v51  ;;  %v2470_v8 = vor.u32 %v2469_v2, %v2465_v1  ;;  %v1397_v9 = vrot.slane %v1395_v32, 4  ;;  %v1403_v40 = vrot.slane %v1401_v33, 5  ;;  %v4680_v32 = vld [vmem:[%s4594_s11 + $0xc] sm:$0xf]  ;;  %v3968_v51 = vld [vmem:[%s4594_s11 + $0x20] sm:$0x1] }
  0x38   : > { %v947_v10 = vunpack.c.l.b16 %v638_v7  ;;  %v2461_v11 = vrot.slane %v2460_v3, 4  ;;  %v1388_v12 = vor.u32 %v1387_v5, %v1384_v61  ;;  %v1393_v13 = vrot.slane %v1391_v6, 5 }
  0x39   : > { %v2471_v23 = vrot.slane %v2470_v8, 4  ;;  %v4162_v41 = vrot.slane %v4116_v30, 9  ;;  %v2870_v14 = vrot.slane %v4117_v43, 5  ;;  %v2873_v15 = vrot.slane %v4118_v47, 5  ;;  %v3967_v47 = vld [vmem:[%s4594_s11 + $0x1c] sm:$0xf] }
  0x3a   : > { %v966_v16 = vpack.c.b16 %v947_v10, %v946_v63  ;;  %v2466_v17 = vsel %vm4639_vm5, %v2461_v11, %v2465_v1  ;;  %v1389_v18 = vrot.slane %v1388_v12, 4  ;;  %v1398_v28 = vor.u32 %v1397_v9, %v1393_v13  ;;  %v4713_v10 = vld [vmem:[%s4594_s11 + $0x30] sm:$0xf] }
  0x3b   : > { %v2476_v29 = vsel %vm4639_vm5, %v2471_v23, %v2475_v4  ;;  %v3023_v33 = vunpack.c.l.b16 %v2466_v17  ;;  %v2871_v19 = vsel %vm4596_vm2, %v4162_v41, %v2870_v14  ;;  %v2872_v20 = vrot.slane %v2870_v14, 4  ;;  %v4718_v41 = vld [vmem:[%s4594_s11 + $0x34] sm:$0xf] }
  0x3c   : > { %994 = vrot.lane.b32.xlu0 %v966_v16, %s4499_s13  ;;  %v3024_v22 = vunpack.c.l.b16 %v2476_v29  ;;  %v1394_v24 = vsel %vm4639_vm5, %v1389_v18, %v1393_v13  ;;  %v1399_v25 = vrot.slane %v1398_v28, 4  ;;  %v3103_v26 = vunpack.c.l.b16 %v2871_v19 }
  0x3d   : > { %v1973_v27 = vunpack.c.l.b16 %v1394_v24  ;;  %v2874_v30 = vsel %vm4596_vm2, %v2872_v20, %v2873_v15  ;;  %v352_v34 = vshrl.u32 %v4680_v32, 16  ;;  %v355_v35 = vshll.u32 %v4680_v32, 16 }
  0x3e   : > { %v3054_v37 = vpack.c.b16 %v3024_v22, %v3023_v33  ;;  %v1404_v38 = vsel %vm4639_vm5, %v1399_v25, %v1403_v40  ;;  %v3104_v39 = vunpack.c.l.b16 %v2874_v30  ;;  %v361_v42 = vshll.u32 %v4687_v21, 16  ;;  %v4729_v22 = vld [vmem:[%s4594_s11 + $0x38] sm:$0x1] }
  0x3f   : > { %v1974_v43 = vunpack.c.l.b16 %v1404_v38  ;;  %v354_v44 = vrot.slane %v352_v34, 4  ;;  %v357_v45 = vrot.slane %v355_v35, 5  ;;  %v365_v46 = vshrl.u32 %v4687_v21, 16 }
  0x40   : > { %3071 = vrot.lane.b32.xlu1 %v3054_v37, %s4499_s13  ;;  %v3134_v48 = vpack.c.b16 %v3104_v39, %v3103_v26  ;;  %v363_v49 = vrot.slane %v361_v42, 5  ;;  %v371_v50 = vshll.u32 %v4695_v31, 16  ;;  %v1406_v52 = vshrl.u32 %v3966_v36, 16  ;;  %v4734_v26 = vld [vmem:[%s4594_s11 + $0x9c] sm:$0xf] }
  0x41   : > { %v2005_v53 = vpack.c.b16 %v1974_v43, %v1973_v27  ;;  %v358_v54 = vor.u32 %v357_v45, %v354_v44  ;;  %v367_v55 = vrot.slane %v365_v46, 4  ;;  %v1409_v57 = vshll.u32 %v3966_v36, 16  ;;  %v4742_v37 = vld [vmem:[%s4594_s11 + $0xa4] sm:$0x1]  ;;  %v282_v44 = vld [vmem:[%s4594_s11 + $0x18] sm:$0xf] }
  0x42   : > { %v373_v58 = vrot.slane %v371_v50, 5  ;;  %v1408_v59 = vrot.slane %v1406_v52, 4  ;;  %v1415_v60 = vshll.u32 %v3967_v47, 16  ;;  %v1419_v61 = vshrl.u32 %v3967_v47, 16 }
  0x43   : > { %2021 = vrot.lane.b32.xlu2 %v2005_v53, %s4499_s13  ;;  %v359_v62 = vrot.slane %v358_v54, 4  ;;  %v368_v63 = vor.u32 %v367_v55, %v363_v49  ;;  %v1411_v1 = vrot.slane %v1409_v57, 5  ;;  %v1425_v2 = vshll.u32 %v3968_v51, 16 }
  0x44   : > { %3151 = vrot.lane.b32.xlu0 %v3134_v48, %s4498_s12  ;;  %v1417_v3 = vrot.slane %v1415_v60, 5  ;;  %v1421_v4 = vrot.slane %v1419_v61, 4  ;;  %v4012_v5 = vrot.slane %v3966_v36, 9  ;;  %v1822_v6 = vrot.slane %v3967_v47, 5  ;;  %v4739_v36 = vld [vmem:[%s4594_s11 + $0xa0] sm:$0xf] }
  0x45   : > { %v364_v7 = vsel %vm4639_vm5, %v359_v62, %v363_v49  ;;  %v369_v8 = vrot.slane %v368_v63, 4  ;;  %v1412_v9 = vor.u32 %v1411_v1, %v1408_v59  ;;  %v1427_v40 = vrot.slane %v1425_v2, 5  ;;  %v283_v49 = vld [vmem:[%s4594_s11 + $0x1c] sm:$0xf]  ;;  %v284_v2 = vld [vmem:[%s4594_s11 + $0x20] sm:$0x1] }
  0x46   : > { %v924_v11 = vunpack.c.l.b16 %v364_v7  ;;  %v1422_v12 = vor.u32 %v1421_v4, %v1417_v3  ;;  %v1823_v13 = vsel %vm4596_vm2, %v4012_v5, %v1822_v6  ;;  %v1824_v23 = vrot.slane %v1822_v6, 4 }
  0x47   : > { %v374_v14 = vsel %vm4639_vm5, %v369_v8, %v373_v58  ;;  %v1413_v15 = vrot.slane %v1412_v9, 4  ;;  %v1825_v16 = vrot.slane %v3968_v51, 5  ;;  %v2055_v17 = vunpack.c.l.b16 %v1823_v13 }
  0x48   : > { %v925_v18 = vunpack.c.l.b16 %v374_v14  ;;  %v1423_v28 = vrot.slane %v1422_v12, 4  ;;  %v2478_v29 = vshrl.u32 %v4713_v10, 16  ;;  %v2481_v33 = vshll.u32 %v4713_v10, 16 }
  0x49   : > { %v1418_v19 = vsel %vm4639_vm5, %v1413_v15, %v1417_v3  ;;  %v1826_v20 = vsel %vm4596_vm2, %v1824_v23, %v1825_v16  ;;  %v2487_v24 = vshll.u32 %v4718_v41, 16  ;;  %v2491_v25 = vshrl.u32 %v4718_v41, 16 }
  0x4a   : > { %v955_v27 = vpack.c.b16 %v925_v18, %v924_v11  ;;  %v1428_v30 = vsel %vm4639_vm5, %v1423_v28, %v1427_v40  ;;  %v1975_v34 = vunpack.c.l.b16 %v1418_v19  ;;  %v2056_v35 = vunpack.c.l.b16 %v1826_v20 }
  0x4b   : > { %v1976_v38 = vunpack.c.l.b16 %v1428_v30  ;;  %v2480_v39 = vrot.slane %v2478_v29, 4  ;;  %v2483_v42 = vrot.slane %v2481_v33, 5  ;;  %v2489_v43 = vrot.slane %v2487_v24, 5  ;;  %v4764_v24 = vld [vmem:[%s4594_s11 + $0x24] sm:$0xf] }
  0x4c   : > { %972 = vrot.lane.b32.xlu1 %v955_v27, %s4499_s13  ;;  %v2086_v45 = vpack.c.b16 %v2056_v35, %v2055_v17  ;;  %v2493_v46 = vrot.slane %v2491_v25, 4  ;;  %v2497_v47 = vshll.u32 %v4729_v22, 16  ;;  %v3876_v48 = vrot.slane %v4734_v26, 9  ;;  %v4772_v35 = vld [vmem:[%s4594_s11 + $0x28] sm:$0xf] }
  0x4d   : > { %v2006_v50 = vpack.c.b16 %v1976_v38, %v1975_v34  ;;  %v2484_v51 = vor.u32 %v2483_v42, %v2480_v39  ;;  %v855_v52 = vrot.slane %v4739_v36, 5  ;;  %v858_v53 = vrot.slane %v4742_v37, 5 }
  0x4e   : > { %v2494_v54 = vor.u32 %v2493_v46, %v2489_v43  ;;  %v2499_v55 = vrot.slane %v2497_v47, 5  ;;  %v376_v57 = vshrl.u32 %v282_v44, 16  ;;  %v379_v58 = vshll.u32 %v282_v44, 16 }
  0x4f   : > { %2023 = vrot.lane.b32.xlu0 %v2006_v50, %s4499_s13  ;;  %v2485_v59 = vrot.slane %v2484_v51, 4  ;;  %v856_v60 = vsel %vm4596_vm2, %v3876_v48, %v855_v52  ;;  %v857_v61 = vrot.slane %v855_v52, 4  ;;  %v385_v62 = vshll.u32 %v283_v49, 16 }
  0x50   : > { %v2495_v63 = vrot.slane %v2494_v54, 4  ;;  %v1028_v1 = vunpack.c.l.b16 %v856_v60  ;;  %v378_v3 = vrot.slane %v376_v57, 4  ;;  %v381_v4 = vrot.slane %v379_v58, 5  ;;  %v319_v54 = vld [vmem:[%s4594_s11 + $0xac] sm:$0xf] }
  0x51   : > { %v2490_v5 = vsel %vm4639_vm5, %v2485_v59, %v2489_v43  ;;  %v859_v6 = vsel %vm4596_vm2, %v857_v61, %v858_v53  ;;  %v387_v7 = vrot.slane %v385_v62, 5  ;;  %v389_v8 = vshrl.u32 %v283_v49, 16  ;;  %v4777_v43 = vld [vmem:[%s4594_s11 + $0x2c] sm:$0x1]  ;;  %v320_v61 = vld [vmem:[%s4594_s11 + $0xb0] sm:$0x1] }
  0x52   : > { %v2500_v9 = vsel %vm4639_vm5, %v2495_v63, %v2499_v55  ;;  %v3025_v40 = vunpack.c.l.b16 %v2490_v5  ;;  %v1029_v11 = vunpack.c.l.b16 %v859_v6  ;;  %v382_v12 = vor.u32 %v381_v4, %v378_v3 }
  0x53   : > { %v3026_v13 = vunpack.c.l.b16 %v2500_v9  ;;  %v391_v23 = vrot.slane %v389_v8, 4  ;;  %v395_v14 = vshll.u32 %v284_v2, 16  ;;  %v3865_v15 = vrot.slane %v282_v44, 9  ;;  %v318_v44 = vld [vmem:[%s4594_s11 + $0xa8] sm:$0xf] }
  0x54   : > { %2103 = vrot.lane.b32.xlu1 %v2086_v45, %s4498_s12  ;;  %v1047_v16 = vpack.c.b16 %v1029_v11, %v1028_v1  ;;  %v383_v17 = vrot.slane %v382_v12, 4  ;;  %v778_v18 = vrot.slane %v283_v49, 5  ;;  %v781_v28 = vrot.slane %v284_v2, 5 }
  0x55   : > { %v3055_v29 = vpack.c.b16 %v3026_v13, %v3025_v40  ;;  %v392_v33 = vor.u32 %v391_v23, %v387_v7  ;;  %v397_v19 = vrot.slane %v395_v14, 5  ;;  %v3864_v20 = vrot.slane %v4680_v32, 9 }
  0x56   : > { %v388_v25 = vsel %vm4639_vm5, %v383_v17, %v387_v7  ;;  %v779_v27 = vsel %vm4596_vm2, %v3865_v15, %v778_v18  ;;  %v780_v30 = vrot.slane %v778_v18, 4  ;;  %v771_v34 = vrot.slane %v4687_v21, 5 }
  0x57   : > { %3073 = vrot.lane.b32.xlu0 %v3055_v29, %s4499_s13  ;;  %v393_v38 = vrot.slane %v392_v33, 4  ;;  %v926_v39 = vunpack.c.l.b16 %v388_v25  ;;  %v1006_v42 = vunpack.c.l.b16 %v779_v27  ;;  %v774_v32 = vrot.slane %v4695_v31, 5 }
  0x58   : > { %v782_v45 = vsel %vm4596_vm2, %v780_v30, %v781_v28  ;;  %v772_v46 = vsel %vm4596_vm2, %v3864_v20, %v771_v34  ;;  %v773_v21 = vrot.slane %v771_v34, 4  ;;  %v4013_v47 = vrot.slane %v4764_v24, 9 }
  0x59   : > { %v398_v48 = vsel %vm4639_vm5, %v393_v38, %v397_v19  ;;  %v1007_v49 = vunpack.c.l.b16 %v782_v45  ;;  %v1004_v50 = vunpack.c.l.b16 %v772_v46  ;;  %v1829_v31 = vrot.slane %v4772_v35, 5 }
  0x5a   : > { %v927_v51 = vunpack.c.l.b16 %v398_v48  ;;  %v775_v52 = vsel %vm4596_vm2, %v773_v21, %v774_v32  ;;  %v1832_v53 = vrot.slane %v4777_v43, 5  ;;  %v664_v55 = vshrl.u32 %v318_v44, 16  ;;  %v4819_v48 = vld [vmem:[%s4594_s11 + $0x44] sm:$0x1] }
  0x5b   : > { %v1036_v57 = vpack.c.b16 %v1007_v49, %v1006_v42  ;;  %v1005_v58 = vunpack.c.l.b16 %v775_v52  ;;  %v1830_v59 = vsel %vm4596_vm2, %v4013_v47, %v1829_v31  ;;  %v1831_v60 = vrot.slane %v1829_v31, 4 }
  0x5c   : > { %1076 = vrot.lane.b32.xlu1 %v1047_v16, %s4498_s12  ;;  %v956_v62 = vpack.c.b16 %v927_v51, %v926_v39  ;;  %v2057_v63 = vunpack.c.l.b16 %v1830_v59  ;;  %v666_v1 = vrot.slane %v664_v55, 4  ;;  %v667_v2 = vshll.u32 %v318_v44, 16  ;;  %v4806_v39 = vld [vmem:[%s4594_s11 + $0x3c] sm:$0xf] }
  0x5d   : > { %v1035_v3 = vpack.c.b16 %v1005_v58, %v1004_v50  ;;  %v1833_v4 = vsel %vm4596_vm2, %v1831_v60, %v1832_v53  ;;  %v673_v5 = vshll.u32 %v319_v54, 16  ;;  %v677_v6 = vshrl.u32 %v319_v54, 16 }
  0x5e   : > { %v2058_v7 = vunpack.c.l.b16 %v1833_v4  ;;  %v669_v8 = vrot.slane %v667_v2, 5  ;;  %v683_v9 = vshll.u32 %v320_v61, 16  ;;  %v640_v40 = vshrl.u32 %v4734_v26, 16 }
  0x5f   : > { %974 = vrot.lane.b32.xlu0 %v956_v62, %s4499_s13  ;;  %1052 = vrot.lane.b32.xlu2 %v1035_v3, %s4498_s12  ;;  %v675_v11 = vrot.slane %v673_v5, 5  ;;  %v679_v12 = vrot.slane %v677_v6, 4  ;;  %v643_v13 = vshll.u32 %v4734_v26, 16  ;;  %v649_v23 = vshll.u32 %v4739_v36, 16  ;;  %v4834_v62 = vld [vmem:[%s4594_s11 + $0x24] sm:$0xf] }
  0x60   : > { %v2087_v14 = vpack.c.b16 %v2058_v7, %v2057_v63  ;;  %v670_v15 = vor.u32 %v669_v8, %v666_v1  ;;  %v685_v16 = vrot.slane %v683_v9, 5  ;;  %v642_v17 = vrot.slane %v640_v40, 4  ;;  %v4837_v63 = vld [vmem:[%s4594_s11 + $0x2c] sm:$0x1]  ;;  %v4846_v8 = vld [vmem:[%s4594_s11 + $0x30] sm:$0xf] }
  0x61   : > { %v680_v18 = vor.u32 %v679_v12, %v675_v11  ;;  %v645_v28 = vrot.slane %v643_v13, 5  ;;  %v651_v29 = vrot.slane %v649_v23, 5  ;;  %v653_v33 = vshrl.u32 %v4739_v36, 16 }
  0x62   : > { %v671_v19 = vrot.slane %v670_v15, 4  ;;  %v659_v20 = vshll.u32 %v4742_v37, 16  ;;  %v3877_v25 = vrot.slane %v318_v44, 9  ;;  %v862_v27 = vrot.slane %v319_v54, 5  ;;  %v4814_v37 = vld [vmem:[%s4594_s11 + $0x40] sm:$0xf] }
  0x63   : > { %v681_v26 = vrot.slane %v680_v18, 4  ;;  %v646_v30 = vor.u32 %v645_v28, %v642_v17  ;;  %v655_v34 = vrot.slane %v653_v33, 4  ;;  %v865_v38 = vrot.slane %v320_v61, 5  ;;  %v4862_v18 = vld [vmem:[%s4594_s11 + $0x38] sm:$0x1] }
  0x64   : > { %1054 = vrot.lane.b32.xlu1 %v1036_v57, %s4498_s12  ;;  %v676_v42 = vsel %vm4639_vm5, %v671_v19, %v675_v11  ;;  %v661_v32 = vrot.slane %v659_v20, 5  ;;  %v863_v36 = vsel %vm4596_vm2, %v3877_v25, %v862_v27  ;;  %v864_v45 = vrot.slane %v862_v27, 4  ;;  %v4829_v57 = vld [vmem:[%s4594_s11 + $0x28] sm:$0xf] }
  0x65   : > { %v686_v44 = vsel %vm4639_vm5, %v681_v26, %v685_v16  ;;  %v950_v46 = vunpack.c.l.b16 %v676_v42  ;;  %v647_v21 = vrot.slane %v646_v30, 4  ;;  %v656_v47 = vor.u32 %v655_v34, %v651_v29 }
  0x66   : > { %v951_v49 = vunpack.c.l.b16 %v686_v44  ;;  %v866_v50 = vsel %vm4596_vm2, %v864_v45, %v865_v38  ;;  %v1030_v31 = vunpack.c.l.b16 %v863_v36  ;;  %v4164_v51 = vrot.slane %v4806_v39, 9 }
  0x67   : > { %2105 = vrot.lane.b32.xlu0 %v2087_v14, %s4498_s12  ;;  %v652_v52 = vsel %vm4639_vm5, %v647_v21, %v651_v29  ;;  %v657_v53 = vrot.slane %v656_v47, 4  ;;  %v1031_v54 = vunpack.c.l.b16 %v866_v50  ;;  %v2884_v55 = vrot.slane %v4814_v37, 5  ;;  %v4878_v21 = vld [vmem:[%s4594_s11 + $0xb4] sm:$0xf] }
  0x68   : > { %v968_v58 = vpack.c.b16 %v951_v49, %v950_v46  ;;  %v948_v59 = vunpack.c.l.b16 %v652_v52  ;;  %v2887_v60 = vrot.slane %v4819_v48, 5  ;;  %v4163_v61 = vrot.slane %v4713_v10, 9 }
  0x69   : > { %v662_v1 = vsel %vm4639_vm5, %v657_v53, %v661_v32  ;;  %v1048_v2 = vpack.c.b16 %v1031_v54, %v1030_v31  ;;  %v2885_v3 = vsel %vm4596_vm2, %v4164_v51, %v2884_v55  ;;  %v2886_v4 = vrot.slane %v2884_v55, 4 }
  0x6a   : > { %v949_v5 = vunpack.c.l.b16 %v662_v1  ;;  %v3107_v6 = vunpack.c.l.b16 %v2885_v3  ;;  %v2877_v7 = vrot.slane %v4718_v41, 5  ;;  %v2880_v10 = vrot.slane %v4729_v22, 5  ;;  %v4857_v22 = vld [vmem:[%s4594_s11 + $0x34] sm:$0xf]  ;;  %v4889_v3 = vld [vmem:[%s4594_s11 + $0xbc] sm:$0x1] }
  0x6b   : > { %v2888_v9 = vsel %vm4596_vm2, %v2886_v4, %v2887_v60  ;;  %v3866_v40 = vrot.slane %v4834_v62, 9  ;;  %v785_v11 = vrot.slane %v4829_v57, 5  ;;  %v788_v12 = vrot.slane %v4837_v63, 5 }
  0x6c   : > { %998 = vrot.lane.b32.xlu1 %v968_v58, %s4499_s13  ;;  %v967_v13 = vpack.c.b16 %v949_v5, %v948_v59  ;;  %v3108_v23 = vunpack.c.l.b16 %v2888_v9  ;;  %v2878_v41 = vsel %vm4596_vm2, %v4163_v61, %v2877_v7  ;;  %v2879_v14 = vrot.slane %v2877_v7, 4 }
  0x6d   : > { %v3105_v15 = vunpack.c.l.b16 %v2878_v41  ;;  %v786_v16 = vsel %vm4596_vm2, %v3866_v40, %v785_v11  ;;  %v787_v17 = vrot.slane %v785_v11, 4  ;;  %v1454_v28 = vshrl.u32 %v4846_v8, 16  ;;  %v4902_v41 = vld [vmem:[%s4594_s11 + $0x48] sm:$0xf] }
  0x6e   : > { %996 = vrot.lane.b32.xlu2 %v967_v13, %s4499_s13  ;;  %v3136_v29 = vpack.c.b16 %v3108_v23, %v3107_v6  ;;  %v2881_v33 = vsel %vm4596_vm2, %v2879_v14, %v2880_v10  ;;  %v1008_v19 = vunpack.c.l.b16 %v786_v16  ;;  %v1457_v20 = vshll.u32 %v4846_v8, 16 }
  0x6f   : > { %1078 = vrot.lane.b32.xlu0 %v1048_v2, %s4498_s12  ;;  %v3106_v25 = vunpack.c.l.b16 %v2881_v33  ;;  %v789_v27 = vsel %vm4596_vm2, %v787_v17, %v788_v12  ;;  %v1456_v26 = vrot.slane %v1454_v28, 4  ;;  %v1463_v30 = vshll.u32 %v4857_v22, 16  ;;  %v4126_v28 = vld [vmem:[%s4594_s11 + $0x4c] sm:$0xf] }
  0x70   : > { %v1009_v34 = vunpack.c.l.b16 %v789_v27  ;;  %v1459_v38 = vrot.slane %v1457_v20, 5  ;;  %v1467_v42 = vshrl.u32 %v4857_v22, 16  ;;  %v1473_v32 = vshll.u32 %v4862_v18, 16 }
  0x71   : > { %v3135_v36 = vpack.c.b16 %v3106_v25, %v3105_v15  ;;  %v1465_v45 = vrot.slane %v1463_v30, 5  ;;  %v1430_v44 = vshrl.u32 %v4764_v24, 16  ;;  %v1433_v46 = vshll.u32 %v4764_v24, 16  ;;  %v4885_v24 = vld [vmem:[%s4594_s11 + $0xb8] sm:$0xf] }
  0x72   : > { %v1037_v47 = vpack.c.b16 %v1009_v34, %v1008_v19  ;;  %v1460_v49 = vor.u32 %v1459_v38, %v1456_v26  ;;  %v1469_v50 = vrot.slane %v1467_v42, 4  ;;  %v1475_v31 = vrot.slane %v1473_v32, 5  ;;  %v4127_v25 = vld [vmem:[%s4594_s11 + $0x50] sm:$0x1] }
  0x73   : > { %v1432_v51 = vrot.slane %v1430_v44, 4  ;;  %v1435_v52 = vrot.slane %v1433_v46, 5  ;;  %v1439_v53 = vshll.u32 %v4772_v35, 16  ;;  %v1443_v54 = vshrl.u32 %v4772_v35, 16 }
  0x74   : > { %3155 = vrot.lane.b32.xlu1 %v3136_v29, %s4498_s12  ;;  %v1461_v55 = vrot.slane %v1460_v49, 4  ;;  %v1470_v58 = vor.u32 %v1469_v50, %v1465_v45  ;;  %v1449_v59 = vshll.u32 %v4777_v43, 16  ;;  %v688_v60 = vshrl.u32 %v4878_v21, 16 }
  0x75   : > { %v1436_v61 = vor.u32 %v1435_v52, %v1432_v51  ;;  %v1441_v1 = vrot.slane %v1439_v53, 5  ;;  %v1445_v2 = vrot.slane %v1443_v54, 4  ;;  %v691_v4 = vshll.u32 %v4878_v21, 16 }
  0x76   : > { %3153 = vrot.lane.b32.xlu2 %v3135_v36, %s4498_s12  ;;  %v1466_v35 = vsel %vm4639_vm5, %v1461_v55, %v1465_v45  ;;  %v1471_v5 = vrot.slane %v1470_v58, 4  ;;  %v1451_v6 = vrot.slane %v1449_v59, 5  ;;  %v690_v43 = vrot.slane %v688_v60, 4 }
  0x77   : > { %1056 = vrot.lane.b32.xlu0 %v1037_v47, %s4498_s12  ;;  %v1979_v7 = vunpack.c.l.b16 %v1466_v35  ;;  %v1437_v10 = vrot.slane %v1436_v61, 4  ;;  %v1446_v9 = vor.u32 %v1445_v2, %v1441_v1  ;;  %v693_v40 = vrot.slane %v691_v4, 5 }
  0x78   : > { %v1476_v11 = vsel %vm4639_vm5, %v1471_v5, %v1475_v31  ;;  %v697_v12 = vshll.u32 %v4885_v24, 16  ;;  %v701_v13 = vshrl.u32 %v4885_v24, 16  ;;  %v707_v23 = vshll.u32 %v4889_v3, 16 }
  0x79   : > { %v1980_v14 = vunpack.c.l.b16 %v1476_v11  ;;  %v1442_v15 = vsel %vm4639_vm5, %v1437_v10, %v1441_v1  ;;  %v1447_v16 = vrot.slane %v1446_v9, 4  ;;  %v694_v17 = vor.u32 %v693_v40, %v690_v43 }
  0x7a   : > { %v1977_v29 = vunpack.c.l.b16 %v1442_v15  ;;  %v699_v33 = vrot.slane %v697_v12, 5  ;;  %v703_v19 = vrot.slane %v701_v13, 4  ;;  %v709_v20 = vrot.slane %v707_v23, 5 }
  0x7b   : > { %v2008_v27 = vpack.c.b16 %v1980_v14, %v1979_v7  ;;  %v1452_v26 = vsel %vm4639_vm5, %v1447_v16, %v1451_v6  ;;  %v695_v30 = vrot.slane %v694_v17, 4  ;;  %v2526_v34 = vshrl.u32 %v4902_v41, 16  ;;  %v4927_v14 = vld [vmem:[%s4594_s11 + $0x30] sm:$0xf]  ;;  %v4933_v17 = vld [vmem:[%s4594_s11 + $0x34] sm:$0xf] }
  0x7c   : > { %v1978_v38 = vunpack.c.l.b16 %v1452_v26  ;;  %v704_v42 = vor.u32 %v703_v19, %v699_v33  ;;  %v2529_v32 = vshll.u32 %v4902_v41, 16  ;;  %v2535_v36 = vshll.u32 %v4126_v28, 16 }
  0x7d   : > { %2027 = vrot.lane.b32.xlu1 %v2008_v27, %s4499_s13  ;;  %v700_v45 = vsel %vm4639_vm5, %v695_v30, %v699_v33  ;;  %v2528_v44 = vrot.slane %v2526_v34, 4  ;;  %v2539_v46 = vshrl.u32 %v4126_v28, 16  ;;  %v2545_v47 = vshll.u32 %v4127_v25, 16 }
  0x7e   : > { %v2007_v49 = vpack.c.b16 %v1978_v38, %v1977_v29  ;;  %v705_v50 = vrot.slane %v704_v42, 4  ;;  %v952_v31 = vunpack.c.l.b16 %v700_v45  ;;  %v2531_v51 = vrot.slane %v2529_v32, 5  ;;  %v4944_v38 = vld [vmem:[%s4594_s11 + $0x38] sm:$0x1] }
  0x7f   : > { %v2537_v52 = vrot.slane %v2535_v36, 5  ;;  %v2541_v53 = vrot.slane %v2539_v46, 4  ;;  %v2547_v54 = vrot.slane %v2545_v47, 5  ;;  %v2502_v55 = vshrl.u32 %v4806_v39, 16 }
  0x80   : > { %2025 = vrot.lane.b32.xlu2 %v2007_v49, %s4499_s13  ;;  %v710_v58 = vsel %vm4639_vm5, %v705_v50, %v709_v20  ;;  %v2532_v59 = vor.u32 %v2531_v51, %v2528_v44  ;;  %v2505_v60 = vshll.u32 %v4806_v39, 16  ;;  %v2511_v61 = vshll.u32 %v4814_v37, 16 }
  0x81   : > { %v953_v1 = vunpack.c.l.b16 %v710_v58  ;;  %v2542_v2 = vor.u32 %v2541_v53, %v2537_v52  ;;  %v2504_v4 = vrot.slane %v2502_v55, 4  ;;  %v2515_v35 = vshrl.u32 %v4814_v37, 16 }
  0x82   : > { %v2533_v5 = vrot.slane %v2532_v59, 4  ;;  %v2507_v6 = vrot.slane %v2505_v60, 5  ;;  %v2513_v43 = vrot.slane %v2511_v61, 5  ;;  %v2521_v7 = vshll.u32 %v4819_v48, 16  ;;  %v3975_v60 = vld [vmem:[%s4594_s11 + $0x3c] sm:$0xf] }
  0x83   : > { %v969_v10 = vpack.c.b16 %v953_v1, %v952_v31  ;;  %v2543_v9 = vrot.slane %v2542_v2, 4  ;;  %v2517_v40 = vrot.slane %v2515_v35, 4  ;;  %v4165_v11 = vrot.slane %v4902_v41, 9  ;;  %v3976_v35 = vld [vmem:[%s4594_s11 + $0x40] sm:$0xf] }
  0x84   : > { %v2538_v39 = vsel %vm4639_vm5, %v2533_v5, %v2537_v52  ;;  %v2508_v12 = vor.u32 %v2507_v6, %v2504_v4  ;;  %v2523_v13 = vrot.slane %v2521_v7, 5  ;;  %v2891_v23 = vrot.slane %v4126_v28, 5 }
  0x85   : > { %1000 = vrot.lane.b32.xlu0 %v969_v10, %s4499_s13  ;;  %v2548_v37 = vsel %vm4639_vm5, %v2543_v9, %v2547_v54  ;;  %v3029_v48 = vunpack.c.l.b16 %v2538_v39  ;;  %v2518_v15 = vor.u32 %v2517_v40, %v2513_v43  ;;  %v2894_v16 = vrot.slane %v4127_v25, 5  ;;  %v4961_v9 = vpop.permute.xlu2 %2101 }
  0x86   : > { %v3030_v41 = vunpack.c.l.b16 %v2548_v37  ;;  %v2509_v29 = vrot.slane %v2508_v12, 4  ;;  %v2892_v33 = vsel %vm4596_vm2, %v4165_v11, %v2891_v23  ;;  %v2893_v19 = vrot.slane %v2891_v23, 4 }
  0x87   : > { %v2519_v28 = vrot.slane %v2518_v15, 4  ;;  %v3109_v20 = vunpack.c.l.b16 %v2892_v33  ;;  %v424_v27 = vshrl.u32 %v4927_v14, 16  ;;  %v427_v26 = vshll.u32 %v4927_v14, 16 }
  0x88   : > { %v3057_v30 = vpack.c.b16 %v3030_v41, %v3029_v48  ;;  %v2514_v34 = vsel %vm4639_vm5, %v2509_v29, %v2513_v43  ;;  %v2895_v25 = vsel %vm4596_vm2, %v2893_v19, %v2894_v16  ;;  %v433_v42 = vshll.u32 %v4933_v17, 16 }
  0x89   : > { %v2524_v32 = vsel %vm4639_vm5, %v2519_v28, %v2523_v13  ;;  %v3027_v36 = vunpack.c.l.b16 %v2514_v34  ;;  %v3110_v45 = vunpack.c.l.b16 %v2895_v25  ;;  %v426_v44 = vrot.slane %v424_v27, 4 }
  0x8a   : > { %3077 = vrot.lane.b32.xlu1 %v3057_v30, %s4499_s13  ;;  %v3028_v46 = vunpack.c.l.b16 %v2524_v32  ;;  %v429_v47 = vrot.slane %v427_v26, 5  ;;  %v435_v49 = vrot.slane %v433_v42, 5  ;;  %v437_v50 = vshrl.u32 %v4933_v17, 16 }
  0x8b   : > { %v3137_v31 = vpack.c.b16 %v3110_v45, %v3109_v20  ;;  %v443_v51 = vshll.u32 %v4944_v38, 16  ;;  %v400_v52 = vshrl.u32 %v4834_v62, 16  ;;  %v403_v53 = vshll.u32 %v4834_v62, 16 }
  0x8c   : > { %v3056_v54 = vpack.c.b16 %v3028_v46, %v3027_v36  ;;  %v430_v55 = vor.u32 %v429_v47, %v426_v44  ;;  %v439_v58 = vrot.slane %v437_v50, 4  ;;  %v409_v59 = vshll.u32 %v4829_v57, 16 }
  0x8d   : > { %3157 = vrot.lane.b32.xlu0 %v3137_v31, %s4498_s12  ;;  %v445_v61 = vrot.slane %v443_v51, 5  ;;  %v402_v1 = vrot.slane %v400_v52, 4  ;;  %v405_v2 = vrot.slane %v403_v53, 5  ;;  %v413_v4 = vshrl.u32 %v4829_v57, 16  ;;  %v3977_v57 = vld [vmem:[%s4594_s11 + $0x44] sm:$0x1] }
  0x8e   : > { %3075 = vrot.lane.b32.xlu2 %v3056_v54, %s4499_s13  ;;  %v431_v5 = vrot.slane %v430_v55, 4  ;;  %v440_v6 = vor.u32 %v439_v58, %v435_v49  ;;  %v411_v62 = vrot.slane %v409_v59, 5  ;;  %v419_v43 = vshll.u32 %v4837_v63, 16  ;;  %v4980_v59 = vld [vmem:[%s4594_s11 + $0x54] sm:$0xf] }
  0x8f   : > { %v406_v7 = vor.u32 %v405_v2, %v402_v1  ;;  %v415_v10 = vrot.slane %v413_v4, 4  ;;  %v1478_v40 = vshrl.u32 %v3975_v60, 16  ;;  %v1481_v11 = vshll.u32 %v3975_v60, 16  ;;  %v4992_v4 = vld [vmem:[%s4594_s11 + $0x5c] sm:$0x1] }
  0x90   : > { %v436_v39 = vsel %vm4639_vm5, %v431_v5, %v435_v49  ;;  %v441_v12 = vrot.slane %v440_v6, 4  ;;  %v421_v13 = vrot.slane %v419_v43, 5  ;;  %v1487_v23 = vshll.u32 %v3976_v35, 16 }
  0x91   : > { %v930_v37 = vunpack.c.l.b16 %v436_v39  ;;  %v407_v48 = vrot.slane %v406_v7, 4  ;;  %v416_v15 = vor.u32 %v415_v10, %v411_v62  ;;  %v1480_v16 = vrot.slane %v1478_v40, 4 }
  0x92   : > { %v446_v63 = vsel %vm4639_vm5, %v441_v12, %v445_v61  ;;  %v1483_v41 = vrot.slane %v1481_v11, 5  ;;  %v1489_v29 = vrot.slane %v1487_v23, 5  ;;  %v1491_v33 = vshrl.u32 %v3976_v35, 16  ;;  %v5002_v11 = vld [vmem:[%s4594_s11 + $0x9c] sm:$0xf] }
  0x93   : > { %v931_v19 = vunpack.c.l.b16 %v446_v63  ;;  %v412_v28 = vsel %vm4639_vm5, %v407_v48, %v411_v62  ;;  %v417_v20 = vrot.slane %v416_v15, 4  ;;  %v1497_v27 = vshll.u32 %v3977_v57, 16  ;;  %v5009_v23 = vld [vmem:[%s4594_s11 + $0xa0] sm:$0xf] }
  0x94   : > { %v928_v26 = vunpack.c.l.b16 %v412_v28  ;;  %v1484_v30 = vor.u32 %v1483_v41, %v1480_v16  ;;  %v1493_v34 = vrot.slane %v1491_v33, 4  ;;  %v4015_v25 = vrot.slane %v3975_v60, 9  ;;  %v4983_v60 = vld [vmem:[%s4594_s11 + $0x58] sm:$0xf] }
  0x95   : > { %v958_v42 = vpack.c.b16 %v931_v19, %v930_v37  ;;  %v422_v32 = vsel %vm4639_vm5, %v417_v20, %v421_v13  ;;  %v1499_v36 = vrot.slane %v1497_v27, 5  ;;  %v1843_v45 = vrot.slane %v3976_v35, 5 }
  0x96   : > { %v929_v44 = vunpack.c.l.b16 %v422_v32  ;;  %v1485_v46 = vrot.slane %v1484_v30, 4  ;;  %v1494_v47 = vor.u32 %v1493_v34, %v1489_v29  ;;  %v1846_v49 = vrot.slane %v3977_v57, 5  ;;  %v4299_v32 = vld [vmem:[%s6430_s1 + $0x8] sm:$0x30] }
  0x97   : > { %978 = vrot.lane.b32.xlu1 %v958_v42, %s4499_s13  ;;  %v1844_v50 = vsel %vm4596_vm2, %v4015_v25, %v1843_v45  ;;  %v1845_v31 = vrot.slane %v1843_v45, 4  ;;  %v4014_v51 = vrot.slane %v4846_v8, 9  ;;  %v1836_v52 = vrot.slane %v4857_v22, 5  ;;  %v4989_v22 = vpop.permute.xlu2 %1074 }
  0x98   : > { %v957_v53 = vpack.c.b16 %v929_v44, %v928_v26  ;;  %v1490_v54 = vsel %vm4639_vm5, %v1485_v46, %v1489_v29  ;;  %v1495_v55 = vrot.slane %v1494_v47, 4  ;;  %v2061_v58 = vunpack.c.l.b16 %v1844_v50  ;;  %v4095_v26 = vld [vmem:[%s6430_s1 + $0x8] sm:$0xf]  ;;  %v4283_v47 = vld [vmem:[%s4594_s11 + $0xc] sm:$0xff] }
  0x99   : > { %v1981_v61 = vunpack.c.l.b16 %v1490_v54  ;;  %v1847_v1 = vsel %vm4596_vm2, %v1845_v31, %v1846_v49  ;;  %v1837_v8 = vsel %vm4596_vm2, %v4014_v51, %v1836_v52  ;;  %v1838_v2 = vrot.slane %v1836_v52, 4 }
  0x9a   : > { %976 = vrot.lane.b32.xlu2 %v957_v53, %s4499_s13  ;;  %v1500_v35 = vsel %vm4639_vm5, %v1495_v55, %v1499_v36  ;;  %v2062_v5 = vunpack.c.l.b16 %v1847_v1  ;;  %v1839_v6 = vrot.slane %v4862_v18, 5  ;;  %v2059_v62 = vunpack.c.l.b16 %v1837_v8  ;;  %v5012_v18 = vld [vmem:[%s4594_s11 + $0xa4] sm:$0x1]  ;;  %v291_v53 = vld [vmem:[%s4594_s11 + $0x3c] sm:$0xf] }
  0x9b   : > { %v1982_v43 = vunpack.c.l.b16 %v1500_v35  ;;  %v2550_v7 = vshrl.u32 %v4980_v59, 16  ;;  %v2553_v10 = vshll.u32 %v4980_v59, 16  ;;  %v2559_v40 = vshll.u32 %v4983_v60, 16  ;;  %v292_v1 = vld [vmem:[%s4594_s11 + $0x40] sm:$0xf] }
  0x9c   : > { %v2089_v39 = vpack.c.b16 %v2062_v5, %v2061_v58  ;;  %v1840_v12 = vsel %vm4596_vm2, %v1838_v2, %v1839_v6  ;;  %v2563_v13 = vshrl.u32 %v4983_v60, 16  ;;  %v2569_v57 = vshll.u32 %v4992_v4, 16  ;;  %v293_v5 = vld [vmem:[%s4594_s11 + $0x44] sm:$0x1] }
  0x9d   : > { %v2009_v37 = vpack.c.b16 %v1982_v43, %v1981_v61  ;;  %v2060_v48 = vunpack.c.l.b16 %v1840_v12  ;;  %v2552_v15 = vrot.slane %v2550_v7, 4  ;;  %v2555_v16 = vrot.slane %v2553_v10, 5 }
  0x9e   : > { %v2561_v63 = vrot.slane %v2559_v40, 5  ;;  %v2565_v41 = vrot.slane %v2563_v13, 4  ;;  %v2571_v29 = vrot.slane %v2569_v57, 5  ;;  %v4023_v33 = vrot.slane %v5002_v11, 9 }
  0x9f   : > { %2029 = vrot.lane.b32.xlu0 %v2009_v37, %s4499_s13  ;;  %2109 = vrot.lane.b32.xlu1 %v2089_v39, %s4498_s12  ;;  %v2088_v19 = vpack.c.b16 %v2060_v48, %v2059_v62  ;;  %v2556_v28 = vor.u32 %v2555_v16, %v2552_v15  ;;  %v1899_v20 = vrot.slane %v5009_v23, 5  ;;  %v1902_v27 = vrot.slane %v5012_v18, 5  ;;  %v2022_v52 = vpop.permute.xlu2 %2021 }
  0xa0   : > { %v2566_v30 = vor.u32 %v2565_v41, %v2561_v63  ;;  %v3878_v34 = vrot.slane %v4878_v21, 9  ;;  %v869_v25 = vrot.slane %v4885_v24, 5  ;;  %v872_v42 = vrot.slane %v4889_v3, 5 }
  0xa1   : > { %v2557_v36 = vrot.slane %v2556_v28, 4  ;;  %v1900_v45 = vsel %vm4596_vm2, %v4023_v33, %v1899_v20  ;;  %v1901_v44 = vrot.slane %v1899_v20, 4  ;;  %v4096_v51 = vor.u32 %v4299_v32, %v4095_v26 }
  0xa2   : > { %2107 = vrot.lane.b32.xlu2 %v2088_v19, %s4498_s12  ;;  %v2567_v46 = vrot.slane %v2566_v30, 4  ;;  %v2077_v21 = vunpack.c.l.b16 %v1900_v45  ;;  %v870_v24 = vsel %vm4596_vm2, %v3878_v34, %v869_v25  ;;  %v871_v3 = vrot.slane %v869_v25, 4  ;;  %v5058_v34 = vpop.permute.xlu0 %3149 }
  0xa3   : > { %v2562_v49 = vsel %vm4639_vm5, %v2557_v36, %v2561_v63  ;;  %v1903_v50 = vsel %vm4596_vm2, %v1901_v44, %v1902_v27  ;;  %v1032_v31 = vunpack.c.l.b16 %v870_v24  ;;  %v5045_v35 = vsel %vm1204_vm6, %v4096_v51, 0  ;;  %v5064_v44 = vpop.permute.xlu1 %1050 }
  0xa4   : > { %v2572_v54 = vsel %vm4639_vm5, %v2567_v46, %v2571_v29  ;;  %v3031_v55 = vunpack.c.l.b16 %v2562_v49  ;;  %v2078_v58 = vunpack.c.l.b16 %v1903_v50  ;;  %v873_v61 = vsel %vm4596_vm2, %v871_v3, %v872_v42  ;;  %2263 = vmatpush.bf16.msra.mxu1 %v5045_v35  ;;  %v5070_v46 = vld [vmem:[%s4594_s11 + $0x4c] sm:$0xf]  ;;  %v5080_v49 = vld [vmem:[%s4594_s11 + $0xa8] sm:$0xf] }
  0xa5   : > { %v3032_v8 = vunpack.c.l.b16 %v2572_v54  ;;  %v1033_v2 = vunpack.c.l.b16 %v873_v61  ;;  %v2135_v62 = vsel %vm1082_vm7, %v4283_v47, %v2022_v52  ;;  %v448_v43 = vshrl.u32 %v291_v53, 16  ;;  %v5077_v47 = vld [vmem:[%s4594_s11 + $0x50] sm:$0x1] }
  0xa6   : > { %v2097_v6 = vpack.c.b16 %v2078_v58, %v2077_v21  ;;  %v451_v7 = vshll.u32 %v291_v53, 16  ;;  %v457_v39 = vshll.u32 %v292_v1, 16  ;;  %v461_v12 = vshrl.u32 %v292_v1, 16 }
  0xa7   : > { %v3058_v10 = vpack.c.b16 %v3032_v8, %v3031_v55  ;;  %v1049_v40 = vpack.c.b16 %v1033_v2, %v1032_v31  ;;  %v450_v13 = vrot.slane %v448_v43, 4  ;;  %v467_v37 = vshll.u32 %v293_v5, 16  ;;  %v5094_v2 = vld [vmem:[%s4594_s11 + $0xb0] sm:$0x1] }
  0xa8   : > { %2125 = vrot.lane.b32.xlu1 %v2097_v6, %s4498_s12  ;;  %v453_v57 = vrot.slane %v451_v7, 5  ;;  %v3868_v48 = vrot.slane %v291_v53, 9  ;;  %v459_v15 = vrot.slane %v457_v39, 5  ;;  %v463_v16 = vrot.slane %v461_v12, 4  ;;  %v5087_v53 = vld [vmem:[%s4594_s11 + $0xac] sm:$0xf] }
  0xa9   : > { %3079 = vrot.lane.b32.xlu0 %v3058_v10, %s4499_s13  ;;  %v799_v63 = vrot.slane %v292_v1, 5  ;;  %v802_v41 = vrot.slane %v293_v5, 5  ;;  %v469_v33 = vrot.slane %v467_v37, 5  ;;  %v3867_v19 = vrot.slane %v4927_v14, 9 }
  0xaa   : > { %1080 = vrot.lane.b32.xlu2 %v1049_v40, %s4498_s12  ;;  %v454_v29 = vor.u32 %v453_v57, %v450_v13  ;;  %v792_v28 = vrot.slane %v4933_v17, 5  ;;  %v464_v20 = vor.u32 %v463_v16, %v459_v15  ;;  %v795_v30 = vrot.slane %v4944_v38, 5  ;;  %v5067_v38 = vld [vmem:[%s4594_s11 + $0x48] sm:$0xf] }
  0xab   : > { %v800_v27 = vsel %vm4596_vm2, %v3868_v48, %v799_v63  ;;  %v801_v26 = vrot.slane %v799_v63, 4  ;;  %v2182_v52 = vsel %vm1131_vm8, %v2135_v62, %v4961_v9  ;;  %v4016_v58 = vrot.slane %v5067_v38, 9 }
  0xac   : > { %v455_v25 = vrot.slane %v454_v29, 4  ;;  %v1012_v42 = vunpack.c.l.b16 %v800_v27  ;;  %v793_v14 = vsel %vm4596_vm2, %v3867_v19, %v792_v28  ;;  %v794_v32 = vrot.slane %v792_v28, 4  ;;  %4097 = vmatmul.msk.bf16.vlgmr.msra.gmra.mxu1 %vm1171_vm9, %v2182_v52  ;;  %v4245_v19 = vld [vmem:[%s6430_s1 + $0x10] sm:$0xf]  ;;  %v3070_v28 = vpop.permute.xlu0 %3069 }
  0xad   : > { %v465_v36 = vrot.slane %v464_v20, 4  ;;  %v803_v17 = vsel %vm4596_vm2, %v801_v26, %v802_v41  ;;  %v1010_v45 = vunpack.c.l.b16 %v793_v14  ;;  %v1850_v61 = vrot.slane %v5070_v46, 5 }
  0xae   : > { %v460_v21 = vsel %vm4639_vm5, %v455_v25, %v459_v15  ;;  %v1013_v24 = vunpack.c.l.b16 %v803_v17  ;;  %v796_v3 = vsel %vm4596_vm2, %v794_v32, %v795_v30  ;;  %v1853_v8 = vrot.slane %v5077_v47, 5  ;;  %v3945_v15 = vld [vmem:[%s6430_s1] sm:$0xf]  ;;  %v971_v17 = vpop.permute.xlu1 %970 }
  0xaf   : > { %v470_v50 = vsel %vm4639_vm5, %v465_v36, %v469_v33  ;;  %v932_v31 = vunpack.c.l.b16 %v460_v21  ;;  %v1011_v51 = vunpack.c.l.b16 %v796_v3  ;;  %v1694_v5 = vshrl.u32 %v5080_v49, 16  ;;  %v4282_v33 = vld [vmem:[%s6430_s1] sm:$0x30]  ;;  %v4300_v36 = vld [vmem:[%s4594_s11 + $0x18] sm:$0xff] }
  0xb0   : > { %v933_v54 = vunpack.c.l.b16 %v470_v50  ;;  %v1039_v55 = vpack.c.b16 %v1013_v24, %v1012_v42  ;;  %v1697_v6 = vshll.u32 %v5080_v49, 16  ;;  %v1851_v62 = vsel %vm4596_vm2, %v4016_v58, %v1850_v61  ;;  %v4266_v50 = vld [vmem:[%s4594_s11] sm:$0xff] }
  0xb1   : > { %v1038_v1 = vpack.c.b16 %v1011_v51, %v1010_v45  ;;  %v1852_v43 = vrot.slane %v1850_v61, 4  ;;  %v1703_v7 = vshll.u32 %v5087_v53, 16  ;;  %v2063_v10 = vunpack.c.l.b16 %v1851_v62 }
  0xb2   : > { %v959_v9 = vpack.c.b16 %v933_v54, %v932_v31  ;;  %1060 = vrot.lane.b32.xlu1 %v1039_v55, %s4498_s12  ;;  %v1696_v40 = vrot.slane %v1694_v5, 4  ;;  %v1699_v39 = vrot.slane %v1697_v6, 5  ;;  %v1707_v12 = vshrl.u32 %v5087_v53, 16 }
  0xb3   : > { %1058 = vrot.lane.b32.xlu2 %v1038_v1, %s4498_s12  ;;  %v1854_v13 = vsel %vm4596_vm2, %v1852_v43, %v1853_v8  ;;  %v1705_v57 = vrot.slane %v1703_v7, 5  ;;  %v1713_v37 = vshll.u32 %v5094_v2, 16  ;;  %v1670_v48 = vshrl.u32 %v5002_v11, 16  ;;  %v5142_v7 = vld [vmem:[%s4594_s11 + $0x60] sm:$0xf] }
  0xb4   : > { %980 = vrot.lane.b32.xlu0 %v959_v9, %s4499_s13  ;;  %v2064_v16 = vunpack.c.l.b16 %v1854_v13  ;;  %v1700_v63 = vor.u32 %v1699_v39, %v1696_v40  ;;  %v1709_v41 = vrot.slane %v1707_v12, 4  ;;  %v1673_v29 = vshll.u32 %v5002_v11, 16  ;;  %v4316_v11 = vld [vmem:[%s6430_s1 + $0x10] sm:$0x30]  ;;  %v5151_v13 = vld [vmem:[%s4594_s11 + $0x64] sm:$0xf] }
  0xb5   : > { %v1715_v20 = vrot.slane %v1713_v37, 5  ;;  %v1672_v27 = vrot.slane %v1670_v48, 4  ;;  %v1679_v26 = vshll.u32 %v5009_v23, 16  ;;  %v1683_v30 = vshrl.u32 %v5009_v23, 16 }
  0xb6   : > { %v2090_v25 = vpack.c.b16 %v2064_v16, %v2063_v10  ;;  %v1701_v42 = vrot.slane %v1700_v63, 4  ;;  %v1710_v14 = vor.u32 %v1709_v41, %v1705_v57  ;;  %v1675_v32 = vrot.slane %v1673_v29, 5  ;;  %v4301_v41 = vld [vmem:[%s4594_s11 + $0x24] sm:$0xff] }
  0xb7   : > { %v1681_v45 = vrot.slane %v1679_v26, 5  ;;  %v1685_v21 = vrot.slane %v1683_v30, 4  ;;  %v1689_v24 = vshll.u32 %v5012_v18, 16  ;;  %v3946_v3 = vor.u32 %v4282_v33, %v3945_v15  ;;  %v4278_v15 = vld [vmem:[%s4594_s11 + $0x90] sm:$0xff]  ;;  %v3072_v30 = vpop.permute.xlu1 %3071 }
  0xb8   : > { %v1706_v31 = vsel %vm4639_vm5, %v1701_v42, %v1705_v57  ;;  %v1711_v23 = vrot.slane %v1710_v14, 4  ;;  %v1676_v51 = vor.u32 %v1675_v32, %v1672_v27  ;;  %v4246_v52 = vor.u32 %v4316_v11, %v4245_v19  ;;  %v5154_v57 = vld [vmem:[%s4594_s11 + $0x68] sm:$0x1]  ;;  %v5182_v32 = vld [vmem:[%s4594_s11 + $0x4c] sm:$0xf] }
  0xb9   : > { %v1999_v54 = vunpack.c.l.b16 %v1706_v31  ;;  %v1686_v55 = vor.u32 %v1685_v21, %v1681_v45  ;;  %v1691_v58 = vrot.slane %v1689_v24, 5  ;;  %v1206_v61 = vsel %vm1204_vm6, %v3946_v3, 0  ;;  %v5192_v21 = vld [vmem:[%s4594_s11 + $0x54] sm:$0xf] }
  0xba   : > { %v1716_v1 = vsel %vm4639_vm5, %v1711_v23, %v1715_v20  ;;  %v1677_v8 = vrot.slane %v1676_v51, 4  ;;  %1215 = vmatpush.bf16.msra.mxu0 %v1206_v61  ;;  %v5133_v18 = vsel %vm1204_vm6, %v4246_v52, 0  ;;  %v3183_v5 = vsel %vm1082_vm7, %v4300_v36, %v3070_v28  ;;  %4317 = vmatpush.bf16.msra.mxu3 %v1206_v61  ;;  %v5199_v23 = vld [vmem:[%s4594_s11 + $0x58] sm:$0xf] }
  0xbb   : > { %v2000_v6 = vunpack.c.l.b16 %v1716_v1  ;;  %v1687_v9 = vrot.slane %v1686_v55, 4  ;;  %3311 = vmatpush.bf16.msra.mxu2 %v5133_v18  ;;  %v1085_v62 = vsel %vm1082_vm7, %v4266_v50, %v971_v17  ;;  %v3230_v43 = vsel %vm1131_vm8, %v3183_v5, %v5058_v34  ;;  %v5209_v1 = vld [vmem:[%s4594_s11 + $0x5c] sm:$0x1] }
  0xbc   : > { %2111 = vrot.lane.b32.xlu0 %v2090_v25, %s4498_s12  ;;  %v1682_v10 = vsel %vm4639_vm5, %v1677_v8, %v1681_v45  ;;  %v1133_v40 = vsel %vm1131_vm8, %v1085_v62, %v5064_v44  ;;  %v4024_v39 = vrot.slane %v5080_v49, 9  ;;  %v1906_v12 = vrot.slane %v5087_v53, 5  ;;  %v5189_v45 = vld [vmem:[%s4594_s11 + $0x50] sm:$0x1] }
  0xbd   : > { %v2018_v34 = vpack.c.b16 %v2000_v6, %v1999_v54  ;;  %v1692_v37 = vsel %vm4639_vm5, %v1687_v9, %v1691_v58  ;;  %v1997_v48 = vunpack.c.l.b16 %v1682_v10  ;;  %3947 = vmatmul.msk.bf16.vlgmr.msra.gmra.mxu0 %vm1171_vm9, %v1133_v40  ;;  %v1909_v44 = vrot.slane %v5094_v2, 5 }
  0xbe   : > { %4318 = vmatpush.bf16.msrb.mxu3 %v5045_v35  ;;  %v1998_v49 = vunpack.c.l.b16 %v1692_v37  ;;  %4247 = vmatmul.msk.bf16.vlgmr.msra.gmra.mxu2 %vm1171_vm9, %v3230_v43  ;;  %v1907_v53 = vsel %vm4596_vm2, %v4024_v39, %v1906_v12  ;;  %v1908_v16 = vrot.slane %v1906_v12, 4  ;;  %v4167_v63 = vrot.slane %v5142_v7, 9  ;;  %v995_v35 = vpop.permute.xlu0 %994 }
  0xbf   : > { %2047 = vrot.lane.b32.xlu1 %v2018_v34, %s4499_s13  ;;  %v2079_v29 = vunpack.c.l.b16 %v1907_v53  ;;  %v2905_v33 = vrot.slane %v5151_v13, 5  ;;  %v2908_v2 = vrot.slane %v5154_v57, 5  ;;  %v4166_v19 = vrot.slane %v4980_v59, 9  ;;  %v5179_v59 = vld [vmem:[%s4594_s11 + $0x48] sm:$0xf]  ;;  %v4267_v53 = vld [vmem:[%s4594_s11 + $0xc] sm:$0xff] }
  0xc0   : > { %v2017_v28 = vpack.c.b16 %v1998_v49, %v1997_v48  ;;  %v1910_v20 = vsel %vm4596_vm2, %v1908_v16, %v1909_v44  ;;  %v2898_v27 = vrot.slane %v4983_v60, 5  ;;  %v2901_v26 = vrot.slane %v4992_v4, 5 }
  0xc1   : > { %v2080_v11 = vunpack.c.l.b16 %v1910_v20  ;;  %v2906_v25 = vsel %vm4596_vm2, %v4167_v63, %v2905_v33  ;;  %v2907_v42 = vrot.slane %v2905_v33, 4  ;;  %v1121_v14 = vsel %vm1082_vm7, %v4278_v15, %v995_v35  ;;  %v973_v33 = vpop.permute.xlu1 %972 }
  0xc2   : > { %2045 = vrot.lane.b32.xlu2 %v2017_v28, %s4499_s13  ;;  %v3113_v36 = vunpack.c.l.b16 %v2906_v25  ;;  %v2899_v60 = vsel %vm4596_vm2, %v4166_v19, %v2898_v27  ;;  %v2900_v4 = vrot.slane %v2898_v27, 4  ;;  %v3186_v17 = vsel %vm1082_vm7, %v4301_v41, %v3072_v30  ;;  %v5230_v25 = vld [vmem:[%s4594_s11 + $0xb4] sm:$0xf] }
  0xc3   : > { %v2098_v24 = vpack.c.b16 %v2080_v11, %v2079_v29  ;;  %v2909_v3 = vsel %vm4596_vm2, %v2907_v42, %v2908_v2  ;;  %v3111_v50 = vunpack.c.l.b16 %v2899_v60  ;;  %v1157_v31 = vsel %vm1131_vm8, %v1121_v14, %v4989_v22  ;;  %v1053_v11 = vpop.permute.xlu2 %1052  ;;  %v5238_v60 = vld [vmem:[%s4594_s11 + $0xb8] sm:$0xf] }
  0xc4   : > { %v3114_v51 = vunpack.c.l.b16 %v2909_v3  ;;  %v2902_v52 = vsel %vm4596_vm2, %v2900_v4, %v2901_v26  ;;  %3959 = vmatmul.msk.bf16.vlgmr.msra.gmra.mxu3 %vm1171_vm9, %v1157_v31  ;;  %v3869_v54 = vrot.slane %v5179_v59, 9  ;;  %v806_v55 = vrot.slane %v5182_v32, 5 }
  0xc5   : > { %2127 = vrot.lane.b32.xlu0 %v2098_v24, %s4498_s12  ;;  %v3112_v58 = vunpack.c.l.b16 %v2902_v52  ;;  %v809_v61 = vrot.slane %v5189_v45, 5  ;;  %v1526_v22 = vshrl.u32 %v5192_v21, 16  ;;  %v1529_v8 = vshll.u32 %v5192_v21, 16  ;;  %4319 = vmatpush.bf16.msra.mxu3 %v5133_v18 }
  0xc6   : > { %v3139_v5 = vpack.c.b16 %v3114_v51, %v3113_v36  ;;  %v807_v6 = vsel %vm4596_vm2, %v3869_v54, %v806_v55  ;;  %v808_v9 = vrot.slane %v806_v55, 4  ;;  %v1535_v62 = vshll.u32 %v5199_v23, 16  ;;  %v3152_v29 = vpop.permute.xlu0 %3151  ;;  %v5248_v55 = vld [vmem:[%s4594_s11 + $0xbc] sm:$0x1] }
  0xc7   : > { %v3138_v43 = vpack.c.b16 %v3112_v58, %v3111_v50  ;;  %v1014_v10 = vunpack.c.l.b16 %v807_v6  ;;  %v1528_v40 = vrot.slane %v1526_v22, 4  ;;  %v1531_v39 = vrot.slane %v1529_v8, 5 }
  0xc8   : > { %3161 = vrot.lane.b32.xlu1 %v3139_v5, %s4498_s12  ;;  %v810_v12 = vsel %vm4596_vm2, %v808_v9, %v809_v61  ;;  %v1537_v34 = vrot.slane %v1535_v62, 5  ;;  %v1539_v18 = vshrl.u32 %v5199_v23, 16  ;;  %v1545_v37 = vshll.u32 %v5209_v1, 16  ;;  %v5255_v9 = vld [vmem:[%s4594_s11 + $0x6c] sm:$0xf] }
  0xc9   : > { %v1015_v48 = vunpack.c.l.b16 %v810_v12  ;;  %v1532_v44 = vor.u32 %v1531_v39, %v1528_v40  ;;  %v1502_v15 = vshrl.u32 %v5067_v38, 16  ;;  %v1505_v49 = vshll.u32 %v5067_v38, 16  ;;  %v5258_v62 = vld [vmem:[%s4594_s11 + $0x70] sm:$0xf] }
  0xca   : > { %3159 = vrot.lane.b32.xlu2 %v3138_v43, %s4498_s12  ;;  %v1541_v16 = vrot.slane %v1539_v18, 4  ;;  %v1547_v63 = vrot.slane %v1545_v37, 5  ;;  %v1511_v35 = vshll.u32 %v5070_v46, 16  ;;  %v1515_v41 = vshrl.u32 %v5070_v46, 16 }
  0xcb   : > { %v1040_v2 = vpack.c.b16 %v1015_v48, %v1014_v10  ;;  %v1533_v19 = vrot.slane %v1532_v44, 4  ;;  %v1504_v28 = vrot.slane %v1502_v15, 4  ;;  %v1507_v20 = vrot.slane %v1505_v49, 5  ;;  %v5264_v44 = vld [vmem:[%s4594_s11 + $0x74] sm:$0x1] }
  0xcc   : > { %v1542_v27 = vor.u32 %v1541_v16, %v1537_v34  ;;  %v1513_v26 = vrot.slane %v1511_v35, 5  ;;  %v1517_v38 = vrot.slane %v1515_v41, 4  ;;  %v1521_v30 = vshll.u32 %v5077_v47, 16 }
  0xcd   : > { %1062 = vrot.lane.b32.xlu0 %v1040_v2, %s4498_s12  ;;  %v1538_v46 = vsel %vm4639_vm5, %v1533_v19, %v1537_v34  ;;  %v1508_v42 = vor.u32 %v1507_v20, %v1504_v28  ;;  %v1088_v14 = vsel %vm1082_vm7, %v4267_v53, %v973_v33  ;;  %v3232_v36 = vsel %vm1131_vm8, %v3186_v17, %v3152_v29 }
  0xce   : > { %v1543_v4 = vrot.slane %v1542_v27, 4  ;;  %v1985_v24 = vunpack.c.l.b16 %v1538_v46  ;;  %v1518_v3 = vor.u32 %v1517_v38, %v1513_v26  ;;  %v1523_v47 = vrot.slane %v1521_v30, 5  ;;  %4248 = vmatmul.msk.bf16.gmra.mxu2 %vm1171_vm9, %v3232_v36  ;;  %v2024_v28 = vpop.permute.xlu0 %2023  ;;  %v4284_v30 = vld [vmem:[%s4594_s11 + $0x18] sm:$0xff] }
  0xcf   : > { %v1509_v50 = vrot.slane %v1508_v42, 4  ;;  %v1135_v31 = vsel %vm1131_vm8, %v1088_v14, %v1053_v11  ;;  %v1718_v51 = vshrl.u32 %v5230_v25, 16  ;;  %v1721_v52 = vshll.u32 %v5230_v25, 16  ;;  %v2104_v11 = vpop.permute.xlu1 %2103 }
  0xd0   : > { %v1548_v17 = vsel %vm4639_vm5, %v1543_v4, %v1547_v63  ;;  %v1519_v54 = vrot.slane %v1518_v3, 4  ;;  %3948 = vmatmul.msk.bf16.gmra.mxu0 %vm1171_vm9, %v1135_v31  ;;  %v1727_v58 = vshll.u32 %v5238_v60, 16  ;;  %v1731_v61 = vshrl.u32 %v5238_v60, 16  ;;  %v997_v4 = vpop.permute.xlu2 %996  ;;  %v4279_v31 = vld [vmem:[%s4594_s11 + $0x9c] sm:$0xff] }
  0xd1   : > { %v1986_v22 = vunpack.c.l.b16 %v1548_v17  ;;  %v1514_v8 = vsel %vm4639_vm5, %v1509_v50, %v1513_v26  ;;  %v1720_v5 = vrot.slane %v1718_v51, 4  ;;  %v1723_v6 = vrot.slane %v1721_v52, 5 }
  0xd2   : > { %v1524_v43 = vsel %vm4639_vm5, %v1519_v54, %v1523_v47  ;;  %v1983_v10 = vunpack.c.l.b16 %v1514_v8  ;;  %v1729_v40 = vrot.slane %v1727_v58, 5  ;;  %v1733_v39 = vrot.slane %v1731_v61, 4 }
  0xd3   : > { %v2011_v12 = vpack.c.b16 %v1986_v22, %v1985_v24  ;;  %v1984_v34 = vunpack.c.l.b16 %v1524_v43  ;;  %v1724_v18 = vor.u32 %v1723_v6, %v1720_v5  ;;  %v1737_v37 = vshll.u32 %v5248_v55, 16 }
  0xd4   : > { %v1734_v48 = vor.u32 %v1733_v39, %v1729_v40  ;;  %v2598_v15 = vshrl.u32 %v5255_v9, 16  ;;  %v2601_v49 = vshll.u32 %v5255_v9, 16  ;;  %v2607_v53 = vshll.u32 %v5258_v62, 16 }
  0xd5   : > { %2033 = vrot.lane.b32.xlu1 %v2011_v12, %s4499_s13  ;;  %v2010_v16 = vpack.c.b16 %v1984_v34, %v1983_v10  ;;  %v1725_v63 = vrot.slane %v1724_v18, 4  ;;  %v1739_v35 = vrot.slane %v1737_v37, 5  ;;  %v2611_v41 = vshrl.u32 %v5258_v62, 16  ;;  %v5288_v10 = vld [vmem:[%s4594_s11 + $0x54] sm:$0xf] }
  0xd6   : > { %v1735_v29 = vrot.slane %v1734_v48, 4  ;;  %v2600_v33 = vrot.slane %v2598_v15, 4  ;;  %v2603_v2 = vrot.slane %v2601_v49, 5  ;;  %v2609_v19 = vrot.slane %v2607_v53, 5  ;;  %v5300_v53 = vld [vmem:[%s4594_s11 + $0x58] sm:$0xf] }
  0xd7   : > { %2031 = vrot.lane.b32.xlu2 %v2010_v16, %s4499_s13  ;;  %v1730_v20 = vsel %vm4639_vm5, %v1725_v63, %v1729_v40  ;;  %v2613_v27 = vrot.slane %v2611_v41, 4  ;;  %v2617_v26 = vshll.u32 %v5264_v44, 16  ;;  %v2574_v38 = vshrl.u32 %v5142_v7, 16 }
  0xd8   : > { %v1740_v46 = vsel %vm4639_vm5, %v1735_v29, %v1739_v35  ;;  %v2001_v42 = vunpack.c.l.b16 %v1730_v20  ;;  %v2604_v14 = vor.u32 %v2603_v2, %v2600_v33  ;;  %v2577_v36 = vshll.u32 %v5142_v7, 16  ;;  %v5306_v29 = vld [vmem:[%s4594_s11 + $0x5c] sm:$0x1]  ;;  %v3074_v2 = vpop.permute.xlu0 %3073 }
  0xd9   : > { %v2002_v24 = vunpack.c.l.b16 %v1740_v46  ;;  %v2614_v3 = vor.u32 %v2613_v27, %v2609_v19  ;;  %v2619_v47 = vrot.slane %v2617_v26, 5  ;;  %v2576_v50 = vrot.slane %v2574_v38, 4 }
  0xda   : > { %v2605_v51 = vrot.slane %v2604_v14, 4  ;;  %v2579_v52 = vrot.slane %v2577_v36, 5  ;;  %v2583_v17 = vshll.u32 %v5151_v13, 16  ;;  %v2587_v54 = vshrl.u32 %v5151_v13, 16 }
  0xdb   : > { %v2019_v58 = vpack.c.b16 %v2002_v24, %v2001_v42  ;;  %v2615_v61 = vrot.slane %v2614_v3, 4  ;;  %v2593_v22 = vshll.u32 %v5154_v57, 16  ;;  %v2138_v8 = vsel %vm1082_vm7, %v4284_v30, %v2024_v28  ;;  %v1077_v28 = vpop.permute.xlu1 %1076  ;;  %v3154_v30 = vpop.permute.xlu2 %3153 }
  0xdc   : > { %v2610_v7 = vsel %vm4639_vm5, %v2605_v51, %v2609_v19  ;;  %v2580_v5 = vor.u32 %v2579_v52, %v2576_v50  ;;  %v2585_v6 = vrot.slane %v2583_v17, 5  ;;  %v2589_v43 = vrot.slane %v2587_v54, 4 }
  0xdd   : > { %2049 = vrot.lane.b32.xlu0 %v2019_v58, %s4499_s13  ;;  %v2620_v13 = vsel %vm4639_vm5, %v2615_v61, %v2619_v47  ;;  %v3035_v40 = vunpack.c.l.b16 %v2610_v7  ;;  %v2595_v39 = vrot.slane %v2593_v22, 5  ;;  %v1124_v57 = vsel %vm1082_vm7, %v4279_v31, %v997_v4  ;;  %v4302_v47 = vld [vmem:[%s4594_s11 + $0x30] sm:$0xff] }
  0xde   : > { %v3036_v12 = vunpack.c.l.b16 %v2620_v13  ;;  %v2581_v34 = vrot.slane %v2580_v5, 4  ;;  %v2590_v18 = vor.u32 %v2589_v43, %v2585_v6  ;;  %v2184_v37 = vsel %vm1131_vm8, %v2138_v8, %v2104_v11 }
  0xdf   : > { %4098 = vmatmul.msk.bf16.gmra.mxu1 %vm1171_vm9, %v2184_v37  ;;  %v4168_v48 = vrot.slane %v5255_v9, 9  ;;  %v2912_v15 = vrot.slane %v5258_v62, 5  ;;  %v2915_v49 = vrot.slane %v5264_v44, 5  ;;  %v496_v16 = vshrl.u32 %v5288_v10, 16 }
  0xe0   : > { %v3060_v63 = vpack.c.b16 %v3036_v12, %v3035_v40  ;;  %v2586_v35 = vsel %vm4639_vm5, %v2581_v34, %v2585_v6  ;;  %v2591_v41 = vrot.slane %v2590_v18, 4  ;;  %v499_v33 = vshll.u32 %v5288_v10, 16  ;;  %v3984_v6 = vld [vmem:[%s4594_s11 + $0x60] sm:$0xf] }
  0xe1   : > { %v3033_v19 = vunpack.c.l.b16 %v2586_v35  ;;  %v2913_v9 = vsel %vm4596_vm2, %v4168_v48, %v2912_v15  ;;  %v2914_v62 = vrot.slane %v2912_v15, 4  ;;  %v498_v44 = vrot.slane %v496_v16, 4  ;;  %v3986_v48 = vld [vmem:[%s4594_s11 + $0x68] sm:$0x1]  ;;  %v975_v16 = vpop.permute.xlu0 %974 }
  0xe2   : > { %3083 = vrot.lane.b32.xlu1 %v3060_v63, %s4499_s13  ;;  %v2596_v20 = vsel %vm4639_vm5, %v2591_v41, %v2595_v39  ;;  %v3115_v27 = vunpack.c.l.b16 %v2913_v9  ;;  %v501_v26 = vrot.slane %v499_v33, 5  ;;  %v505_v38 = vshll.u32 %v5300_v53, 16  ;;  %v3985_v39 = vld [vmem:[%s4594_s11 + $0x64] sm:$0xf] }
  0xe3   : > { %v3034_v11 = vunpack.c.l.b16 %v2596_v20  ;;  %v2916_v46 = vsel %vm4596_vm2, %v2914_v62, %v2915_v49  ;;  %v509_v42 = vshrl.u32 %v5300_v53, 16  ;;  %v515_v14 = vshll.u32 %v5306_v29, 16  ;;  %v1055_v33 = vpop.permute.xlu1 %1054 }
  0xe4   : > { %v3116_v36 = vunpack.c.l.b16 %v2916_v46  ;;  %v502_v4 = vor.u32 %v501_v26, %v498_v44  ;;  %v507_v24 = vrot.slane %v505_v38, 5  ;;  %v472_v3 = vshrl.u32 %v5179_v59, 16  ;;  %v2026_v44 = vpop.permute.xlu2 %2025 }
  0xe5   : > { %v3059_v50 = vpack.c.b16 %v3034_v11, %v3033_v19  ;;  %v511_v31 = vrot.slane %v509_v42, 4  ;;  %v517_v51 = vrot.slane %v515_v14, 5  ;;  %v475_v52 = vshll.u32 %v5179_v59, 16 }
  0xe6   : > { %v3140_v17 = vpack.c.b16 %v3116_v36, %v3115_v27  ;;  %v503_v54 = vrot.slane %v502_v4, 4  ;;  %v474_v58 = vrot.slane %v472_v3, 4  ;;  %v481_v61 = vshll.u32 %v5182_v32, 16 }
  0xe7   : > { %3081 = vrot.lane.b32.xlu2 %v3059_v50, %s4499_s13  ;;  %v512_v22 = vor.u32 %v511_v31, %v507_v24  ;;  %v477_v8 = vrot.slane %v475_v52, 5  ;;  %v485_v7 = vshrl.u32 %v5182_v32, 16  ;;  %v491_v5 = vshll.u32 %v5189_v45, 16 }
  0xe8   : > { %3163 = vrot.lane.b32.xlu0 %v3140_v17, %s4498_s12  ;;  %v508_v59 = vsel %vm4639_vm5, %v503_v54, %v507_v24  ;;  %v483_v43 = vrot.slane %v481_v61, 5  ;;  %v3189_v13 = vsel %vm1082_vm7, %v4302_v47, %v3074_v2  ;;  %v1159_v40 = vsel %vm1131_vm8, %v1124_v57, %v1077_v28  ;;  %v4268_v54 = vld [vmem:[%s4594_s11 + $0x18] sm:$0xff] }
  0xe9   : > { %v513_v12 = vrot.slane %v512_v22, 4  ;;  %v936_v34 = vunpack.c.l.b16 %v508_v59  ;;  %v478_v18 = vor.u32 %v477_v8, %v474_v58  ;;  %v487_v37 = vrot.slane %v485_v7, 4  ;;  %3960 = vmatmul.msk.bf16.gmra.mxu3 %vm1171_vm9, %v1159_v40  ;;  %v4285_v58 = vld [vmem:[%s4594_s11 + $0x24] sm:$0xff] }
  0xea   : > { %v493_v32 = vrot.slane %v491_v5, 5  ;;  %v3234_v45 = vsel %vm1131_vm8, %v3189_v13, %v3154_v30  ;;  %v1550_v15 = vshrl.u32 %v3984_v6, 16  ;;  %v1553_v49 = vshll.u32 %v3984_v6, 16  ;;  %v5353_v5 = vld [vmem:[%s4594_s11 + $0x78] sm:$0xf] }
  0xeb   : > { %v518_v63 = vsel %vm4639_vm5, %v513_v12, %v517_v51  ;;  %v479_v35 = vrot.slane %v478_v18, 4  ;;  %v488_v41 = vor.u32 %v487_v37, %v483_v43  ;;  %4249 = vmatmul.msk.bf16.gmra.mxu2 %vm1171_vm9, %v3234_v45  ;;  %v1559_v57 = vshll.u32 %v3985_v39, 16  ;;  %v5364_v12 = vld [vmem:[%s4594_s11 + $0x7c] sm:$0xf]  ;;  %v5369_v45 = vld [vmem:[%s4594_s11 + $0x80] sm:$0x1] }
  0xec   : > { %v937_v2 = vunpack.c.l.b16 %v518_v63  ;;  %v1552_v19 = vrot.slane %v1550_v15, 4  ;;  %v1555_v9 = vrot.slane %v1553_v49, 5  ;;  %v1563_v62 = vshrl.u32 %v3985_v39, 16  ;;  %v5373_v15 = vld [vmem:[%s4594_s11 + $0xc0] sm:$0xf]  ;;  %v999_v49 = vpop.permute.xlu1 %998 }
  0xed   : > { %v484_v28 = vsel %vm4639_vm5, %v479_v35, %v483_v43  ;;  %v489_v20 = vrot.slane %v488_v41, 4  ;;  %v1561_v27 = vrot.slane %v1559_v57, 5  ;;  %v1569_v26 = vshll.u32 %v3986_v48, 16  ;;  %v5380_v57 = vld [vmem:[%s4594_s11 + $0xc4] sm:$0xf] }
  0xee   : > { %v961_v38 = vpack.c.b16 %v937_v2, %v936_v34  ;;  %v934_v30 = vunpack.c.l.b16 %v484_v28  ;;  %v1556_v11 = vor.u32 %v1555_v9, %v1552_v19  ;;  %v1565_v46 = vrot.slane %v1563_v62, 4  ;;  %v2106_v34 = vpop.permute.xlu0 %2105  ;;  %v3076_v2 = vpop.permute.xlu2 %3075 }
  0xef   : > { %v494_v42 = vsel %vm4639_vm5, %v489_v20, %v493_v32  ;;  %v1571_v14 = vrot.slane %v1569_v26, 5  ;;  %v4018_v36 = vrot.slane %v3984_v6, 9  ;;  %v1864_v4 = vrot.slane %v3985_v39, 5  ;;  %v4280_v26 = vld [vmem:[%s4594_s11 + $0xa8] sm:$0xff] }
  0xf0   : > { %984 = vrot.lane.b32.xlu1 %v961_v38, %s4499_s13  ;;  %v935_v24 = vunpack.c.l.b16 %v494_v42  ;;  %v1557_v3 = vrot.slane %v1556_v11, 4  ;;  %v1566_v47 = vor.u32 %v1565_v46, %v1561_v27  ;;  %v1867_v50 = vrot.slane %v3986_v48, 5  ;;  %v4303_v42 = vld [vmem:[%s4594_s11 + $0x3c] sm:$0xff] }
  0xf1   : > { %v1865_v31 = vsel %vm4596_vm2, %v4018_v36, %v1864_v4  ;;  %v1866_v51 = vrot.slane %v1864_v4, 4  ;;  %v4017_v52 = vrot.slane %v5192_v21, 9  ;;  %v1857_v17 = vrot.slane %v5199_v23, 5 }
  0xf2   : > { %v960_v61 = vpack.c.b16 %v935_v24, %v934_v30  ;;  %v1562_v22 = vsel %vm4639_vm5, %v1557_v3, %v1561_v27  ;;  %v1567_v8 = vrot.slane %v1566_v47, 4  ;;  %v2067_v7 = vunpack.c.l.b16 %v1865_v31 }
  0xf3   : > { %v1987_v6 = vunpack.c.l.b16 %v1562_v22  ;;  %v1868_v59 = vsel %vm4596_vm2, %v1866_v51, %v1867_v50  ;;  %v1858_v21 = vsel %vm4596_vm2, %v4017_v52, %v1857_v17  ;;  %v1859_v23 = vrot.slane %v1857_v17, 4 }
  0xf4   : > { %982 = vrot.lane.b32.xlu2 %v960_v61, %s4499_s13  ;;  %v1572_v43 = vsel %vm4639_vm5, %v1567_v8, %v1571_v14  ;;  %v2068_v13 = vunpack.c.l.b16 %v1868_v59  ;;  %v1860_v40 = vrot.slane %v5209_v1, 5  ;;  %v2065_v39 = vunpack.c.l.b16 %v1858_v21  ;;  %v301_v59 = vld [vmem:[%s4594_s11 + $0x64] sm:$0xf] }
  0xf5   : > { %v1988_v18 = vunpack.c.l.b16 %v1572_v43  ;;  %v1091_v37 = vsel %vm1082_vm7, %v4268_v54, %v975_v16  ;;  %v2141_v32 = vsel %vm1082_vm7, %v4285_v58, %v2026_v44  ;;  %v2622_v48 = vshrl.u32 %v5353_v5, 16  ;;  %v5383_v16 = vld [vmem:[%s4594_s11 + $0xc8] sm:$0x1]  ;;  %v300_v58 = vld [vmem:[%s4594_s11 + $0x60] sm:$0xf] }
  0xf6   : > { %v2092_v63 = vpack.c.b16 %v2068_v13, %v2067_v7  ;;  %v1861_v1 = vsel %vm4596_vm2, %v1859_v23, %v1860_v40  ;;  %v1137_v35 = vsel %vm1131_vm8, %v1091_v37, %v1055_v33  ;;  %v2625_v41 = vshll.u32 %v5353_v5, 16  ;;  %v1079_v21 = vpop.permute.xlu0 %1078  ;;  %v302_v40 = vld [vmem:[%s4594_s11 + $0x68] sm:$0x1] }
  0xf7   : > { %v2012_v19 = vpack.c.b16 %v1988_v18, %v1987_v6  ;;  %v2066_v9 = vunpack.c.l.b16 %v1861_v1  ;;  %3949 = vmatmul.msk.bf16.gmra.mxu0 %vm1171_vm9, %v1137_v35  ;;  %v2624_v62 = vrot.slane %v2622_v48, 4  ;;  %v2631_v44 = vshll.u32 %v5364_v12, 16  ;;  %v3156_v18 = vpop.permute.xlu1 %3155  ;;  %v977_v1 = vpop.permute.xlu2 %976 }
  0xf8   : > { %2115 = vrot.lane.b32.xlu1 %v2092_v63, %s4498_s12  ;;  %v2627_v28 = vrot.slane %v2625_v41, 5  ;;  %v2635_v33 = vshrl.u32 %v5364_v12, 16  ;;  %v2641_v20 = vshll.u32 %v5369_v45, 16  ;;  %v4026_v27 = vrot.slane %v5373_v15, 9 }
  0xf9   : > { %2035 = vrot.lane.b32.xlu0 %v2012_v19, %s4499_s13  ;;  %v2091_v38 = vpack.c.b16 %v2066_v9, %v2065_v39  ;;  %v2633_v30 = vrot.slane %v2631_v44, 5  ;;  %v1920_v11 = vrot.slane %v5380_v57, 5  ;;  %v1923_v46 = vrot.slane %v5383_v16, 5  ;;  %v4269_v44 = vld [vmem:[%s4594_s11 + $0x24] sm:$0xff] }
  0xfa   : > { %v2628_v14 = vor.u32 %v2627_v28, %v2624_v62  ;;  %v2637_v36 = vrot.slane %v2635_v33, 4  ;;  %v2643_v4 = vrot.slane %v2641_v20, 5  ;;  %v4025_v24 = vrot.slane %v5230_v25, 9 }
  0xfb   : > { %v1921_v3 = vsel %vm4596_vm2, %v4026_v27, %v1920_v11  ;;  %v1922_v47 = vrot.slane %v1920_v11, 4  ;;  %v1913_v50 = vrot.slane %v5238_v60, 5  ;;  %v1916_v31 = vrot.slane %v5248_v55, 5 }
  0xfc   : > { %2113 = vrot.lane.b32.xlu2 %v2091_v38, %s4498_s12  ;;  %v2629_v51 = vrot.slane %v2628_v14, 4  ;;  %v2638_v52 = vor.u32 %v2637_v36, %v2633_v30  ;;  %v2083_v17 = vunpack.c.l.b16 %v1921_v3  ;;  %v1127_v54 = vsel %vm1082_vm7, %v4280_v26, %v999_v49 }
  0xfd   : > { %v1924_v25 = vsel %vm4596_vm2, %v1922_v47, %v1923_v46  ;;  %v1914_v61 = vsel %vm4596_vm2, %v4025_v24, %v1913_v50  ;;  %v1915_v22 = vrot.slane %v1913_v50, 4  ;;  %v5409_v60 = vsel %vm1082_vm7, %v4303_v42, %v3076_v2 }
  0xfe   : > { %v2634_v55 = vsel %vm4639_vm5, %v2629_v51, %v2633_v30  ;;  %v2639_v8 = vrot.slane %v2638_v52, 4  ;;  %v2084_v7 = vunpack.c.l.b16 %v1924_v25  ;;  %v2081_v6 = vunpack.c.l.b16 %v1914_v61  ;;  %v5438_v52 = vld [vmem:[%s4594_s11 + $0x6c] sm:$0xf]  ;;  %v5444_v25 = vld [vmem:[%s4594_s11 + $0x70] sm:$0xf] }
  0xff   : > { %v3037_v23 = vunpack.c.l.b16 %v2634_v55  ;;  %v1917_v43 = vsel %vm4596_vm2, %v1915_v22, %v1916_v31  ;;  %v2186_v13 = vsel %vm1131_vm8, %v2141_v32, %v2106_v34  ;;  %v520_v39 = vshrl.u32 %v300_v58, 16  ;;  %v5447_v61 = vld [vmem:[%s4594_s11 + $0x74] sm:$0x1]  ;;  %v5450_v22 = vld [vmem:[%s4594_s11 + $0x84] sm:$0xf]  ;;  %v1057_v55 = vpop.permute.xlu0 %1056 }
 0x100   : > { %v2644_v37 = vsel %vm4639_vm5, %v2639_v8, %v2643_v4  ;;  %v2100_v48 = vpack.c.b16 %v2084_v7, %v2083_v17  ;;  %v2082_v49 = vunpack.c.l.b16 %v1917_v43  ;;  %4099 = vmatmul.msk.bf16.gmra.mxu1 %vm1171_vm9, %v2186_v13  ;;  %v523_v63 = vshll.u32 %v300_v58, 16 }
 0x101   : > { %v3038_v35 = vunpack.c.l.b16 %v2644_v37  ;;  %v522_v41 = vrot.slane %v520_v39, 4  ;;  %v529_v2 = vshll.u32 %v301_v59, 16  ;;  %v533_v19 = vshrl.u32 %v301_v59, 16  ;;  %v2108_v39 = vpop.permute.xlu2 %2107 }
 0x102   : > { %2131 = vrot.lane.b32.xlu1 %v2100_v48, %s4498_s12  ;;  %v2099_v34 = vpack.c.b16 %v2082_v49, %v2081_v6  ;;  %v525_v32 = vrot.slane %v523_v63, 5  ;;  %v539_v9 = vshll.u32 %v302_v40, 16  ;;  %v3871_v62 = vrot.slane %v300_v58, 9  ;;  %v5467_v49 = vld [vmem:[%s4594_s11 + $0x8c] sm:$0x1] }
 0x103   : > { %v3061_v28 = vpack.c.b16 %v3038_v35, %v3037_v23  ;;  %v531_v33 = vrot.slane %v529_v2, 5  ;;  %v535_v20 = vrot.slane %v533_v19, 4  ;;  %v820_v27 = vrot.slane %v301_v59, 5  ;;  %v5460_v59 = vld [vmem:[%s4594_s11 + $0x88] sm:$0xf] }
 0x104   : > { %2129 = vrot.lane.b32.xlu2 %v2099_v34, %s4498_s12  ;;  %v526_v26 = vor.u32 %v525_v32, %v522_v41  ;;  %v541_v38 = vrot.slane %v539_v9, 5  ;;  %v823_v30 = vrot.slane %v302_v40, 5  ;;  %v3870_v11 = vrot.slane %v5288_v10, 9 }
 0x105   : > { %3085 = vrot.lane.b32.xlu0 %v3061_v28, %s4499_s13  ;;  %v536_v46 = vor.u32 %v535_v20, %v531_v33  ;;  %v821_v42 = vsel %vm4596_vm2, %v3871_v62, %v820_v27  ;;  %v822_v14 = vrot.slane %v820_v27, 4  ;;  %v813_v36 = vrot.slane %v5300_v53, 5 }
 0x106   : > { %v527_v4 = vrot.slane %v526_v26, 4  ;;  %v1018_v24 = vunpack.c.l.b16 %v821_v42  ;;  %v816_v3 = vrot.slane %v5306_v29, 5  ;;  %v5431_v47 = vsel %vm1082_vm7, %v4269_v44, %v977_v1 }
 0x107   : > { %v537_v10 = vrot.slane %v536_v46, 4  ;;  %v824_v50 = vsel %vm4596_vm2, %v822_v14, %v823_v30  ;;  %v814_v31 = vsel %vm4596_vm2, %v3870_v11, %v813_v36  ;;  %v815_v51 = vrot.slane %v813_v36, 4 }
 0x108   : > { %v532_v53 = vsel %vm4639_vm5, %v527_v4, %v531_v33  ;;  %v1019_v17 = vunpack.c.l.b16 %v824_v50  ;;  %v1016_v58 = vunpack.c.l.b16 %v814_v31  ;;  %v1161_v29 = vsel %vm1131_vm8, %v1127_v54, %v1079_v21  ;;  %v2028_v21 = vpop.permute.xlu1 %2027 }
 0x109   : > { %v542_v8 = vsel %vm4639_vm5, %v537_v10, %v541_v38  ;;  %v938_v7 = vunpack.c.l.b16 %v532_v53  ;;  %v817_v6 = vsel %vm4596_vm2, %v815_v51, %v816_v3  ;;  %3961 = vmatmul.msk.bf16.gmra.mxu3 %vm1171_vm9, %v1161_v29  ;;  %v3236_v54 = vsel %vm1131_vm8, %v5409_v60, %v3156_v18  ;;  %v4286_v38 = vld [vmem:[%s4594_s11 + $0x30] sm:$0xff]  ;;  %v1001_v51 = vpop.permute.xlu0 %1000  ;;  %v5491_v29 = vld [vmem:[%s4594_s11 + $0xa8] sm:$0xf] }
 0x10a   : > { %v939_v23 = vunpack.c.l.b16 %v542_v8  ;;  %v1042_v43 = vpack.c.b16 %v1019_v17, %v1018_v24  ;;  %v1017_v13 = vunpack.c.l.b16 %v817_v6  ;;  %4250 = vmatmul.msk.bf16.gmra.mxu2 %vm1171_vm9, %v3236_v54  ;;  %v4019_v40 = vrot.slane %v5438_v52, 9  ;;  %v5498_v54 = vld [vmem:[%s4594_s11 + $0xac] sm:$0xf] }
 0x10b   : > { %v1871_v37 = vrot.slane %v5444_v25, 5  ;;  %v1874_v48 = vrot.slane %v5447_v61, 5  ;;  %v2646_v63 = vshrl.u32 %v5450_v22, 16  ;;  %v2649_v60 = vshll.u32 %v5450_v22, 16 }
 0x10c   : > { %v962_v18 = vpack.c.b16 %v939_v23, %v938_v7  ;;  %1066 = vrot.lane.b32.xlu1 %v1042_v43, %s4498_s12  ;;  %v1041_v1 = vpack.c.b16 %v1017_v13, %v1016_v58  ;;  %v2655_v35 = vshll.u32 %v5460_v59, 16  ;;  %v2659_v41 = vshrl.u32 %v5460_v59, 16  ;;  %v1081_v23 = vpop.permute.xlu2 %1080 }
 0x10d   : > { %v1872_v2 = vsel %vm4596_vm2, %v4019_v40, %v1871_v37  ;;  %v1873_v19 = vrot.slane %v1871_v37, 4  ;;  %v2648_v34 = vrot.slane %v2646_v63, 4  ;;  %v2651_v32 = vrot.slane %v2649_v60, 5  ;;  %v5503_v37 = vld [vmem:[%s4594_s11 + $0xb0] sm:$0x1] }
 0x10e   : > { %986 = vrot.lane.b32.xlu0 %v962_v18, %s4499_s13  ;;  %1064 = vrot.lane.b32.xlu2 %v1041_v1, %s4498_s12  ;;  %v2069_v9 = vunpack.c.l.b16 %v1872_v2  ;;  %v2657_v62 = vrot.slane %v2655_v35, 5  ;;  %v2661_v44 = vrot.slane %v2659_v41, 4  ;;  %v2665_v28 = vshll.u32 %v5467_v49, 16 }
 0x10f   : > { %v1875_v33 = vsel %vm4596_vm2, %v1873_v19, %v1874_v48  ;;  %v2652_v20 = vor.u32 %v2651_v32, %v2648_v34  ;;  %v1742_v27 = vshrl.u32 %v5373_v15, 16  ;;  %v1745_v26 = vshll.u32 %v5373_v15, 16 }
 0x110   : > { %v2070_v30 = vunpack.c.l.b16 %v1875_v33  ;;  %v2662_v11 = vor.u32 %v2661_v44, %v2657_v62  ;;  %v2667_v46 = vrot.slane %v2665_v28, 5  ;;  %v1751_v42 = vshll.u32 %v5380_v57, 16  ;;  %v3078_v8 = vpop.permute.xlu1 %3077 }
 0x111   : > { %v2653_v14 = vrot.slane %v2652_v20, 4  ;;  %v1744_v36 = vrot.slane %v1742_v27, 4  ;;  %v1747_v4 = vrot.slane %v1745_v26, 5  ;;  %v1755_v24 = vshrl.u32 %v5380_v57, 16 }
 0x112   : > { %v2093_v3 = vpack.c.b16 %v2070_v30, %v2069_v9  ;;  %v2663_v10 = vrot.slane %v2662_v11, 4  ;;  %v1753_v50 = vrot.slane %v1751_v42, 5  ;;  %v1761_v31 = vshll.u32 %v5383_v16, 16  ;;  %v5532_v30 = vld [vmem:[%s4594_s11 + $0x6c] sm:$0xf] }
 0x113   : > { %v2658_v15 = vsel %vm4639_vm5, %v2653_v14, %v2657_v62  ;;  %v1748_v53 = vor.u32 %v1747_v4, %v1744_v36  ;;  %v1757_v17 = vrot.slane %v1755_v24, 4  ;;  %v2144_v58 = vsel %vm1082_vm7, %v4286_v38, %v2028_v21  ;;  %v5535_v11 = vld [vmem:[%s4594_s11 + $0x70] sm:$0xf]  ;;  %v5543_v4 = vld [vmem:[%s4594_s11 + $0x78] sm:$0xf]  ;;  %v3158_v24 = vpop.permute.xlu0 %3157 }
 0x114   : > { %v2668_v57 = vsel %vm4639_vm5, %v2663_v10, %v2667_v46  ;;  %v3039_v7 = vunpack.c.l.b16 %v2658_v15  ;;  %v1763_v6 = vrot.slane %v1761_v31, 5  ;;  %v1139_v16 = vsel %vm1131_vm8, %v5431_v47, %v1057_v55 }
 0x115   : > { %v3040_v43 = vunpack.c.l.b16 %v2668_v57  ;;  %v1749_v13 = vrot.slane %v1748_v53, 4  ;;  %v1758_v40 = vor.u32 %v1757_v17, %v1753_v50  ;;  %3950 = vmatmul.msk.bf16.gmra.mxu0 %vm1171_vm9, %v1139_v16  ;;  %v2188_v21 = vsel %vm1131_vm8, %v2144_v58, %v2108_v39  ;;  %v1059_v58 = vpop.permute.xlu2 %1058 }
 0x116   : > { %2117 = vrot.lane.b32.xlu0 %v2093_v3, %s4498_s12  ;;  %4100 = vmatmul.msk.bf16.gmra.mxu1 %vm1171_vm9, %v2188_v21  ;;  %v4170_v47 = vrot.slane %v5450_v22, 9  ;;  %v2926_v55 = vrot.slane %v5460_v59, 5  ;;  %v2929_v48 = vrot.slane %v5467_v49, 5  ;;  %v4173_v63 = vrot.slane %v5491_v29, 9  ;;  %v4281_v59 = vld [vmem:[%s4594_s11 + $0xb4] sm:$0xff]  ;;  %v4304_v49 = vld [vmem:[%s4594_s11 + $0x48] sm:$0xff] }
 0x117   : > { %v3062_v60 = vpack.c.b16 %v3040_v43, %v3039_v7  ;;  %v1754_v39 = vsel %vm4639_vm5, %v1749_v13, %v1753_v50  ;;  %v1759_v18 = vrot.slane %v1758_v40, 4  ;;  %v2947_v1 = vrot.slane %v5498_v54, 5  ;;  %v5549_v50 = vld [vmem:[%s4594_s11 + $0x7c] sm:$0xf]  ;;  %v5560_v7 = vld [vmem:[%s4594_s11 + $0x80] sm:$0x1] }
 0x118   : > { %v2003_v35 = vunpack.c.l.b16 %v1754_v39  ;;  %v2927_v41 = vsel %vm4596_vm2, %v4170_v47, %v2926_v55  ;;  %v2928_v2 = vrot.slane %v2926_v55, 4  ;;  %v2950_v22 = vrot.slane %v5503_v37, 5  ;;  %v979_v31 = vpop.permute.xlu1 %978 }
 0x119   : > { %3087 = vrot.lane.b32.xlu1 %v3062_v60, %s4499_s13  ;;  %v1764_v19 = vsel %vm4639_vm5, %v1759_v18, %v1763_v6  ;;  %v3119_v34 = vunpack.c.l.b16 %v2927_v41  ;;  %v2948_v32 = vsel %vm4596_vm2, %v4173_v63, %v2947_v1  ;;  %v2949_v9 = vrot.slane %v2947_v1, 4 }
 0x11a   : > { %v2004_v62 = vunpack.c.l.b16 %v1764_v19  ;;  %v2930_v44 = vsel %vm4596_vm2, %v2928_v2, %v2929_v48  ;;  %v3125_v28 = vunpack.c.l.b16 %v2948_v32  ;;  %v4169_v33 = vrot.slane %v5353_v5, 9  ;;  %v5540_v5 = vld [vmem:[%s4594_s11 + $0x74] sm:$0x1] }
 0x11b   : > { %v3120_v20 = vunpack.c.l.b16 %v2930_v44  ;;  %v2951_v27 = vsel %vm4596_vm2, %v2949_v9, %v2950_v22  ;;  %v2919_v26 = vrot.slane %v5364_v12, 5  ;;  %v2922_v38 = vrot.slane %v5369_v45, 5  ;;  %v4270_v22 = vld [vmem:[%s4594_s11 + $0x30] sm:$0xff] }
 0x11c   : > { %v2020_v46 = vpack.c.b16 %v2004_v62, %v2003_v35  ;;  %v3126_v42 = vunpack.c.l.b16 %v2951_v27  ;;  %v1130_v14 = vsel %vm1082_vm7, %v4281_v59, %v1001_v51  ;;  %v3195_v36 = vsel %vm1082_vm7, %v4304_v49, %v3078_v8 }
 0x11d   : > { %v3142_v3 = vpack.c.b16 %v3120_v20, %v3119_v34  ;;  %v2920_v12 = vsel %vm4596_vm2, %v4169_v33, %v2919_v26  ;;  %v2921_v45 = vrot.slane %v2919_v26, 4  ;;  %v1163_v10 = vsel %vm1131_vm8, %v1130_v14, %v1081_v23  ;;  %v5580_v26 = vld [vmem:[%s4594_s11 + $0x90] sm:$0xf]  ;;  %v5590_v14 = vld [vmem:[%s4594_s11 + $0x94] sm:$0xf] }
 0x11e   : > { %2051 = vrot.lane.b32.xlu2 %v2020_v46, %s4499_s13  ;;  %v3145_v51 = vpack.c.b16 %v3126_v42, %v3125_v28  ;;  %v3117_v15 = vunpack.c.l.b16 %v2920_v12  ;;  %3962 = vmatmul.msk.bf16.gmra.mxu3 %vm1171_vm9, %v1163_v10  ;;  %v3872_v53 = vrot.slane %v5532_v30, 9  ;;  %v827_v17 = vrot.slane %v5535_v11, 5 }
 0x11f   : > { %3167 = vrot.lane.b32.xlu0 %v3142_v3, %s4498_s12  ;;  %v2923_v8 = vsel %vm4596_vm2, %v2921_v45, %v2922_v38  ;;  %v830_v57 = vrot.slane %v5540_v5, 5  ;;  %v1598_v6 = vshrl.u32 %v5543_v4, 16  ;;  %v1601_v16 = vshll.u32 %v5543_v4, 16 }
 0x120   : > { %v3118_v23 = vunpack.c.l.b16 %v2923_v8  ;;  %v828_v43 = vsel %vm4596_vm2, %v3872_v53, %v827_v17  ;;  %v829_v13 = vrot.slane %v827_v17, 4  ;;  %v1607_v40 = vshll.u32 %v5549_v50, 16  ;;  %v5592_v3 = vpop.permute.xlu1 %2109 }
 0x121   : > { %3173 = vrot.lane.b32.xlu1 %v3145_v51, %s4498_s12  ;;  %v1020_v21 = vunpack.c.l.b16 %v828_v43  ;;  %v1600_v47 = vrot.slane %v1598_v6, 4  ;;  %v1603_v55 = vrot.slane %v1601_v16, 5  ;;  %v1611_v48 = vshrl.u32 %v5549_v50, 16  ;;  %v5596_v51 = vld [vmem:[%s4594_s11 + $0x98] sm:$0x1] }
 0x122   : > { %v3141_v63 = vpack.c.b16 %v3118_v23, %v3117_v15  ;;  %v831_v60 = vsel %vm4596_vm2, %v829_v13, %v830_v57  ;;  %v1609_v39 = vrot.slane %v1607_v40, 5  ;;  %v1617_v18 = vshll.u32 %v5560_v7, 16  ;;  %v5598_v15 = vpop.permute.xlu2 %2045  ;;  %v5608_v16 = vld [vmem:[%s4594_s11 + $0xb4] sm:$0xf]  ;;  %v5613_v40 = vld [vmem:[%s4594_s11 + $0xb8] sm:$0xf] }
 0x123   : > { %v1021_v1 = vunpack.c.l.b16 %v831_v60  ;;  %v1604_v35 = vor.u32 %v1603_v55, %v1600_v47  ;;  %v1613_v41 = vrot.slane %v1611_v48, 4  ;;  %v1574_v2 = vshrl.u32 %v5438_v52, 16 }
 0x124   : > { %v1619_v59 = vrot.slane %v1617_v18, 5  ;;  %v1577_v49 = vshll.u32 %v5438_v52, 16  ;;  %v1583_v19 = vshll.u32 %v5444_v25, 16  ;;  %v1587_v34 = vshrl.u32 %v5444_v25, 16  ;;  %v5582_v52 = vpop.permute.xlu0 %2029 }
 0x125   : > { %v1043_v32 = vpack.c.b16 %v1021_v1, %v1020_v21  ;;  %v1605_v9 = vrot.slane %v1604_v35, 4  ;;  %v1614_v62 = vor.u32 %v1613_v41, %v1609_v39  ;;  %v1576_v44 = vrot.slane %v1574_v2, 4  ;;  %v5620_v1 = vld [vmem:[%s4594_s11 + $0xbc] sm:$0x1] }
 0x126   : > { %3165 = vrot.lane.b32.xlu2 %v3141_v63, %s4498_s12  ;;  %v1579_v28 = vrot.slane %v1577_v49, 5  ;;  %v1585_v33 = vrot.slane %v1583_v19, 5  ;;  %v1589_v20 = vrot.slane %v1587_v34, 4  ;;  %v1593_v27 = vshll.u32 %v5447_v61, 16 }
 0x127   : > { %1068 = vrot.lane.b32.xlu0 %v1043_v32, %s4498_s12  ;;  %v1610_v25 = vsel %vm4639_vm5, %v1605_v9, %v1609_v39  ;;  %v1615_v38 = vrot.slane %v1614_v62, 4  ;;  %v1097_v46 = vsel %vm1082_vm7, %v4270_v22, %v979_v31  ;;  %v3238_v42 = vsel %vm1131_vm8, %v3195_v36, %v3158_v24 }
 0x128   : > { %v1991_v12 = vunpack.c.l.b16 %v1610_v25  ;;  %v1580_v61 = vor.u32 %v1579_v28, %v1576_v44  ;;  %v1590_v45 = vor.u32 %v1589_v20, %v1585_v33  ;;  %v1595_v10 = vrot.slane %v1593_v27, 5  ;;  %4251 = vmatmul.msk.bf16.gmra.mxu2 %vm1171_vm9, %v3238_v42 }
 0x129   : > { %v1620_v31 = vsel %vm4639_vm5, %v1615_v38, %v1619_v59  ;;  %v1141_v36 = vsel %vm1131_vm8, %v1097_v46, %v1059_v58  ;;  %v2670_v24 = vshrl.u32 %v5580_v26, 16  ;;  %v2673_v53 = vshll.u32 %v5580_v26, 16  ;;  %v4287_v38 = vld [vmem:[%s4594_s11 + $0x3c] sm:$0xff]  ;;  %v5635_v46 = vpop.permute.xlu1 %2125 }
 0x12a   : > { %v1992_v17 = vunpack.c.l.b16 %v1620_v31  ;;  %v1581_v8 = vrot.slane %v1580_v61, 4  ;;  %v1591_v57 = vrot.slane %v1590_v45, 4  ;;  %3951 = vmatmul.msk.bf16.gmra.mxu0 %vm1171_vm9, %v1141_v36  ;;  %v2679_v6 = vshll.u32 %v5590_v14, 16 }
 0x12b   : > { %v2672_v23 = vrot.slane %v2670_v24, 4  ;;  %v2675_v43 = vrot.slane %v2673_v53, 5  ;;  %v2683_v13 = vshrl.u32 %v5590_v14, 16  ;;  %v2689_v58 = vshll.u32 %v5596_v51, 16 }
 0x12c   : > { %v2014_v21 = vpack.c.b16 %v1992_v17, %v1991_v12  ;;  %v1586_v47 = vsel %vm4639_vm5, %v1581_v8, %v1585_v33  ;;  %v1596_v55 = vsel %vm4639_vm5, %v1591_v57, %v1595_v10  ;;  %v2681_v48 = vrot.slane %v2679_v6, 5  ;;  %v5628_v28 = vpop.permute.xlu0 %3079  ;;  %v5638_v10 = vpop.permute.xlu2 %3159  ;;  %v4295_v17 = vld [vmem:[%s4594_s11 + $0x9c] sm:$0xff] }
 0x12d   : > { %v1989_v63 = vunpack.c.l.b16 %v1586_v47  ;;  %v1990_v60 = vunpack.c.l.b16 %v1596_v55  ;;  %v2676_v39 = vor.u32 %v2675_v43, %v2672_v23  ;;  %v2685_v18 = vrot.slane %v2683_v13, 4 }
 0x12e   : > { %2039 = vrot.lane.b32.xlu1 %v2014_v21, %s4499_s13  ;;  %v2691_v35 = vrot.slane %v2689_v58, 5  ;;  %v2742_v41 = vshrl.u32 %v5608_v16, 16  ;;  %v2745_v2 = vshll.u32 %v5608_v16, 16  ;;  %v2751_v22 = vshll.u32 %v5613_v40, 16 }
 0x12f   : > { %v2013_v59 = vpack.c.b16 %v1990_v60, %v1989_v63  ;;  %v2677_v49 = vrot.slane %v2676_v39, 4  ;;  %v2686_v19 = vor.u32 %v2685_v18, %v2681_v48  ;;  %v2755_v34 = vshrl.u32 %v5613_v40, 16  ;;  %v5651_v63 = vld [vmem:[%s4594_s11 + $0x78] sm:$0xf] }
 0x130   : > { %v2744_v32 = vrot.slane %v2742_v41, 4  ;;  %v2747_v9 = vrot.slane %v2745_v2, 5  ;;  %v2753_v62 = vrot.slane %v2751_v22, 5  ;;  %v2761_v44 = vshll.u32 %v5620_v1, 16 }
 0x131   : > { %2037 = vrot.lane.b32.xlu2 %v2013_v59, %s4499_s13  ;;  %v2682_v33 = vsel %vm4639_vm5, %v2677_v49, %v2681_v48  ;;  %v2687_v20 = vrot.slane %v2686_v19, 4  ;;  %v2757_v27 = vrot.slane %v2755_v34, 4  ;;  %v2718_v25 = vshrl.u32 %v5491_v29, 16  ;;  %v5665_v49 = vld [vmem:[%s4594_s11 + $0x7c] sm:$0xf] }
 0x132   : > { %v3041_v42 = vunpack.c.l.b16 %v2682_v33  ;;  %v2748_v12 = vor.u32 %v2747_v9, %v2744_v32  ;;  %v2763_v61 = vrot.slane %v2761_v44, 5  ;;  %v2721_v45 = vshll.u32 %v5491_v29, 16  ;;  %v5671_v9 = vld [vmem:[%s4594_s11 + $0x80] sm:$0x1]  ;;  %v5678_v33 = vpop.permute.xlu1 %1060 }
 0x133   : > { %v2692_v31 = vsel %vm4639_vm5, %v2687_v20, %v2691_v35  ;;  %v2758_v36 = vor.u32 %v2757_v27, %v2753_v62  ;;  %v2720_v24 = vrot.slane %v2718_v25, 4  ;;  %v2727_v53 = vshll.u32 %v5498_v54, 16 }
 0x134   : > { %v3042_v8 = vunpack.c.l.b16 %v2692_v31  ;;  %v2749_v57 = vrot.slane %v2748_v12, 4  ;;  %v2723_v6 = vrot.slane %v2721_v45, 5  ;;  %v2731_v23 = vshrl.u32 %v5498_v54, 16 }
 0x135   : > { %v2759_v43 = vrot.slane %v2758_v36, 4  ;;  %v2729_v13 = vrot.slane %v2727_v53, 5  ;;  %v2737_v29 = vshll.u32 %v5503_v37, 16  ;;  %v2147_v58 = vsel %vm1082_vm7, %v4287_v38, %v5582_v52 }
 0x136   : > { %v3063_v21 = vpack.c.b16 %v3042_v8, %v3041_v42  ;;  %v2754_v47 = vsel %vm4639_vm5, %v2749_v57, %v2753_v62  ;;  %v2724_v55 = vor.u32 %v2723_v6, %v2720_v24  ;;  %v2733_v48 = vrot.slane %v2731_v23, 4  ;;  %v5674_v62 = vpop.permute.xlu0 %980  ;;  %v5684_v42 = vpop.permute.xlu2 %2031  ;;  %v4305_v8 = vld [vmem:[%s4594_s11 + $0x54] sm:$0xff] }
 0x137   : > { %v2764_v60 = vsel %vm4639_vm5, %v2759_v43, %v2763_v61  ;;  %v3047_v54 = vunpack.c.l.b16 %v2754_v47  ;;  %v2739_v39 = vrot.slane %v2737_v29, 5  ;;  %v2171_v37 = vsel %vm1082_vm7, %v4295_v17, %v5598_v15 }
 0x138   : > { %3089 = vrot.lane.b32.xlu0 %v3063_v21, %s4499_s13  ;;  %v3048_v52 = vunpack.c.l.b16 %v2764_v60  ;;  %v2725_v18 = vrot.slane %v2724_v55, 4  ;;  %v2734_v35 = vor.u32 %v2733_v48, %v2729_v13  ;;  %v2190_v41 = vsel %vm1131_vm8, %v2147_v58, %v5592_v3 }
 0x139   : > { %4101 = vmatmul.msk.bf16.gmra.mxu1 %vm1171_vm9, %v2190_v41  ;;  %v4174_v2 = vrot.slane %v5608_v16, 9  ;;  %v2954_v22 = vrot.slane %v5613_v40, 5  ;;  %v2957_v59 = vrot.slane %v5620_v1, 5  ;;  %v568_v15 = vshrl.u32 %v5651_v63, 16 }
 0x13a   : > { %v3066_v19 = vpack.c.b16 %v3048_v52, %v3047_v54  ;;  %v2730_v34 = vsel %vm4639_vm5, %v2725_v18, %v2729_v13  ;;  %v2735_v32 = vrot.slane %v2734_v35, 4  ;;  %v571_v3 = vshll.u32 %v5651_v63, 16  ;;  %v3993_v54 = vld [vmem:[%s4594_s11 + $0x84] sm:$0xf]  ;;  %v3994_v35 = vld [vmem:[%s4594_s11 + $0x88] sm:$0xf] }
 0x13b   : > { %v3045_v16 = vunpack.c.l.b16 %v2730_v34  ;;  %v2955_v40 = vsel %vm4596_vm2, %v4174_v2, %v2954_v22  ;;  %v2956_v1 = vrot.slane %v2954_v22, 4  ;;  %v570_v44 = vrot.slane %v568_v15, 4  ;;  %v3995_v15 = vld [vmem:[%s4594_s11 + $0x8c] sm:$0x1] }
 0x13c   : > { %3095 = vrot.lane.b32.xlu1 %v3066_v19, %s4499_s13  ;;  %v2740_v20 = vsel %vm4639_vm5, %v2735_v32, %v2739_v39  ;;  %v3127_v27 = vunpack.c.l.b16 %v2955_v40  ;;  %v573_v25 = vrot.slane %v571_v3, 5  ;;  %v577_v38 = vshll.u32 %v5665_v49, 16 }
 0x13d   : > { %v3046_v12 = vunpack.c.l.b16 %v2740_v20  ;;  %v2958_v61 = vsel %vm4596_vm2, %v2956_v1, %v2957_v59  ;;  %v581_v45 = vshrl.u32 %v5665_v49, 16  ;;  %v587_v31 = vshll.u32 %v5671_v9, 16 }
 0x13e   : > { %v3128_v36 = vunpack.c.l.b16 %v2958_v61  ;;  %v574_v24 = vor.u32 %v573_v25, %v570_v44  ;;  %v579_v53 = vrot.slane %v577_v38, 5  ;;  %v544_v17 = vshrl.u32 %v5532_v30, 16  ;;  %v5710_v32 = vpop.permute.xlu0 %2111 }
 0x13f   : > { %v3065_v57 = vpack.c.b16 %v3046_v12, %v3045_v16  ;;  %v583_v6 = vrot.slane %v581_v45, 4  ;;  %v589_v23 = vrot.slane %v587_v31, 5  ;;  %v547_v43 = vshll.u32 %v5532_v30, 16  ;;  %v5715_v16 = vpop.permute.xlu1 %2047 }
 0x140   : > { %v3146_v13 = vpack.c.b16 %v3128_v36, %v3127_v27  ;;  %v575_v29 = vrot.slane %v574_v24, 4  ;;  %v546_v58 = vrot.slane %v544_v17, 4  ;;  %v553_v21 = vshll.u32 %v5535_v11, 16 }
 0x141   : > { %3093 = vrot.lane.b32.xlu2 %v3065_v57, %s4499_s13  ;;  %v584_v47 = vor.u32 %v583_v6, %v579_v53  ;;  %v549_v55 = vrot.slane %v547_v43, 5  ;;  %v557_v48 = vshrl.u32 %v5535_v11, 16  ;;  %v563_v60 = vshll.u32 %v5540_v5, 16 }
 0x142   : > { %3175 = vrot.lane.b32.xlu0 %v3146_v13, %s4498_s12  ;;  %v580_v30 = vsel %vm4639_vm5, %v575_v29, %v579_v53  ;;  %v555_v39 = vrot.slane %v553_v21, 5  ;;  %v3198_v52 = vsel %vm1082_vm7, %v4305_v8, %v5628_v28  ;;  %v2206_v18 = vsel %vm1131_vm8, %v2171_v37, %v5635_v46 }
 0x143   : > { %v585_v41 = vrot.slane %v584_v47, 4  ;;  %v942_v2 = vunpack.c.l.b16 %v580_v30  ;;  %v550_v11 = vor.u32 %v549_v55, %v546_v58  ;;  %v559_v22 = vrot.slane %v557_v48, 4  ;;  %4109 = vmatmul.msk.bf16.vlgmr.msrb.gmra.mxu3 %vm1171_vm9, %v2206_v18  ;;  %v4271_v47 = vld [vmem:[%s4594_s11 + $0x3c] sm:$0xff]  ;;  %v4288_v55 = vld [vmem:[%s4594_s11 + $0x48] sm:$0xff] }
 0x144   : > { %v565_v5 = vrot.slane %v563_v60, 5  ;;  %v3240_v59 = vsel %vm1131_vm8, %v3198_v52, %v5638_v10  ;;  %v1622_v19 = vshrl.u32 %v3993_v54, 16  ;;  %v1625_v34 = vshll.u32 %v3993_v54, 16  ;;  %v5717_v10 = vpop.permute.xlu2 %3081 }
 0x145   : > { %v590_v28 = vsel %vm4639_vm5, %v585_v41, %v589_v23  ;;  %v551_v46 = vrot.slane %v550_v11, 4  ;;  %v560_v37 = vor.u32 %v559_v22, %v555_v39  ;;  %4252 = vmatmul.msk.bf16.gmra.mxu2 %vm1171_vm9, %v3240_v59  ;;  %v1631_v3 = vshll.u32 %v3994_v35, 16  ;;  %v5744_v22 = vld [vmem:[%s4594_s11 + $0xc4] sm:$0xf] }
 0x146   : > { %v943_v40 = vunpack.c.l.b16 %v590_v28  ;;  %v1624_v1 = vrot.slane %v1622_v19, 4  ;;  %v1627_v44 = vrot.slane %v1625_v34, 5  ;;  %v1635_v20 = vshrl.u32 %v3994_v35, 16  ;;  %v5753_v34 = vld [vmem:[%s4594_s11 + $0xc8] sm:$0x1] }
 0x147   : > { %v556_v27 = vsel %vm4639_vm5, %v551_v46, %v555_v39  ;;  %v561_v25 = vrot.slane %v560_v37, 4  ;;  %v1633_v38 = vrot.slane %v1631_v3, 5  ;;  %v1641_v12 = vshll.u32 %v3995_v15, 16  ;;  %v5733_v39 = vld [vmem:[%s4594_s11 + $0xc0] sm:$0xf] }
 0x148   : > { %v964_v61 = vpack.c.b16 %v943_v40, %v942_v2  ;;  %v940_v45 = vunpack.c.l.b16 %v556_v27  ;;  %v1628_v31 = vor.u32 %v1627_v44, %v1624_v1  ;;  %v1637_v36 = vrot.slane %v1635_v20, 4  ;;  %v5757_v46 = vld [vmem:[%s4594_s11 + $0x9c] sm:$0xf]  ;;  %v5767_v1 = vld [vmem:[%s4594_s11 + $0xa0] sm:$0xf] }
 0x149   : > { %v566_v24 = vsel %vm4639_vm5, %v561_v25, %v565_v5  ;;  %v1643_v53 = vrot.slane %v1641_v12, 5  ;;  %v4021_v17 = vrot.slane %v3993_v54, 9  ;;  %v1885_v8 = vrot.slane %v3994_v35, 5  ;;  %v5746_v5 = vpop.permute.xlu0 %2127 }
 0x14a   : > { %990 = vrot.lane.b32.xlu1 %v964_v61, %s4499_s13  ;;  %v941_v57 = vunpack.c.l.b16 %v566_v24  ;;  %v1629_v6 = vrot.slane %v1628_v31, 4  ;;  %v1638_v23 = vor.u32 %v1637_v36, %v1633_v38  ;;  %v1888_v43 = vrot.slane %v3995_v15, 5  ;;  %v4296_v31 = vld [vmem:[%s4594_s11 + $0xa8] sm:$0xff] }
 0x14b   : > { %v1886_v13 = vsel %vm4596_vm2, %v4021_v17, %v1885_v8  ;;  %v1887_v29 = vrot.slane %v1885_v8, 4  ;;  %v4020_v58 = vrot.slane %v5543_v4, 9  ;;  %v1878_v21 = vrot.slane %v5549_v50, 5  ;;  %v4306_v8 = vld [vmem:[%s4594_s11 + $0x60] sm:$0xff] }
 0x14c   : > { %v963_v48 = vpack.c.b16 %v941_v57, %v940_v45  ;;  %v1634_v60 = vsel %vm4639_vm5, %v1629_v6, %v1633_v38  ;;  %v1639_v54 = vrot.slane %v1638_v23, 4  ;;  %v2073_v30 = vunpack.c.l.b16 %v1886_v13 }
 0x14d   : > { %v1993_v52 = vunpack.c.l.b16 %v1634_v60  ;;  %v1889_v18 = vsel %vm4596_vm2, %v1887_v29, %v1888_v43  ;;  %v1879_v4 = vsel %vm4596_vm2, %v4020_v58, %v1878_v21  ;;  %v1880_v50 = vrot.slane %v1878_v21, 4 }
 0x14e   : > { %988 = vrot.lane.b32.xlu2 %v963_v48, %s4499_s13  ;;  %v1644_v35 = vsel %vm4639_vm5, %v1639_v54, %v1643_v53  ;;  %v2074_v41 = vunpack.c.l.b16 %v1889_v18  ;;  %v1881_v2 = vrot.slane %v5560_v7, 5  ;;  %v2071_v11 = vunpack.c.l.b16 %v1879_v4  ;;  %v5759_v7 = vpop.permute.xlu1 %3161  ;;  %v5772_v44 = vpop.permute.xlu2 %982 }
 0x14f   : > { %v1994_v59 = vunpack.c.l.b16 %v1644_v35  ;;  %v1100_v15 = vsel %vm1082_vm7, %v4271_v47, %v5674_v62  ;;  %v2150_v19 = vsel %vm1082_vm7, %v4288_v55, %v5684_v42  ;;  %v2766_v28 = vshrl.u32 %v5733_v39, 16  ;;  %v5770_v42 = vld [vmem:[%s4594_s11 + $0xa4] sm:$0x1] }
 0x150   : > { %v2095_v37 = vpack.c.b16 %v2074_v41, %v2073_v30  ;;  %v1882_v3 = vsel %vm4596_vm2, %v1880_v50, %v1881_v2  ;;  %v1143_v40 = vsel %vm1131_vm8, %v1100_v15, %v5678_v33  ;;  %v2769_v62 = vshll.u32 %v5733_v39, 16  ;;  %v310_v50 = vld [vmem:[%s4594_s11 + $0x88] sm:$0xf]  ;;  %v5809_v41 = vpop.f32.mrf.mxu0 }
 0x151   : > { %v2015_v20 = vpack.c.b16 %v1994_v59, %v1993_v52  ;;  %v2072_v27 = vunpack.c.l.b16 %v1882_v3  ;;  %3952 = vmatmul.msk.bf16.gmra.mxu0 %vm1171_vm9, %v1143_v40  ;;  %v2768_v25 = vrot.slane %v2766_v28, 4  ;;  %v2775_v38 = vshll.u32 %v5744_v22, 16  ;;  %v5807_v35 = vpop.permute.xlu0 %1062 }
 0x152   : > { %2121 = vrot.lane.b32.xlu1 %v2095_v37, %s4498_s12  ;;  %v2771_v12 = vrot.slane %v2769_v62, 5  ;;  %v2779_v33 = vshrl.u32 %v5744_v22, 16  ;;  %v2785_v61 = vshll.u32 %v5753_v34, 16  ;;  %v4172_v45 = vrot.slane %v5757_v46, 9 }
 0x153   : > { %2041 = vrot.lane.b32.xlu0 %v2015_v20, %s4499_s13  ;;  %v2094_v36 = vpack.c.b16 %v2072_v27, %v2071_v11  ;;  %v2777_v24 = vrot.slane %v2775_v38, 5  ;;  %v2940_v53 = vrot.slane %v5767_v1, 5  ;;  %v2943_v17 = vrot.slane %v5770_v42, 5  ;;  %v5823_v27 = vpop.f32.mrf.mxu2 }
 0x154   : > { %v2772_v57 = vor.u32 %v2771_v12, %v2768_v25  ;;  %v2781_v6 = vrot.slane %v2779_v33, 4  ;;  %v2787_v23 = vrot.slane %v2785_v61, 5  ;;  %v4171_v43 = vrot.slane %v5580_v26, 9  ;;  %v309_v26 = vld [vmem:[%s4594_s11 + $0x84] sm:$0xf] }
 0x155   : > { %v2941_v13 = vsel %vm4596_vm2, %v4172_v45, %v2940_v53  ;;  %v2942_v29 = vrot.slane %v2940_v53, 4  ;;  %v2933_v58 = vrot.slane %v5590_v14, 5  ;;  %v2936_v21 = vrot.slane %v5596_v51, 5 }
 0x156   : > { %2119 = vrot.lane.b32.xlu2 %v2094_v36, %s4498_s12  ;;  %v2773_v47 = vrot.slane %v2772_v57, 4  ;;  %v2782_v55 = vor.u32 %v2781_v6, %v2777_v24  ;;  %v3123_v48 = vunpack.c.l.b16 %v2941_v13  ;;  %v5793_v60 = vsel %vm1082_vm7, %v4296_v31, %v5715_v16  ;;  %v5816_v28 = vpop.permute.xlu1 %2033  ;;  %v5821_v20 = vpop.permute.xlu2 %2113  ;;  %v4272_v31 = vld [vmem:[%s4594_s11 + $0x48] sm:$0xff] }
 0x157   : > { %v2944_v54 = vsel %vm4596_vm2, %v2942_v29, %v2943_v17  ;;  %v2934_v14 = vsel %vm4596_vm2, %v4171_v43, %v2933_v58  ;;  %v2935_v30 = vrot.slane %v2933_v58, 4  ;;  %v5802_v51 = vsel %vm1082_vm7, %v4306_v8, %v5717_v10  ;;  %v311_v10 = vld [vmem:[%s4594_s11 + $0x8c] sm:$0x1]  ;;  %v5828_v8 = vpop.f32.mrf.mxu1 }
 0x158   : > { %v2778_v52 = vsel %vm4639_vm5, %v2773_v47, %v2777_v24  ;;  %v2783_v18 = vrot.slane %v2782_v55, 4  ;;  %v3124_v4 = vunpack.c.l.b16 %v2944_v54  ;;  %v3121_v16 = vunpack.c.l.b16 %v2934_v14  ;;  %v5842_v54 = vpop.f32.mrf.mxu0 }
 0x159   : > { %v3049_v2 = vunpack.c.l.b16 %v2778_v52  ;;  %v2937_v11 = vsel %vm4596_vm2, %v2935_v30, %v2936_v21  ;;  %v2192_v59 = vsel %vm1131_vm8, %v2150_v19, %v5710_v32  ;;  %v592_v15 = vshrl.u32 %v309_v26, 16 }
 0x15a   : > { %v2788_v37 = vsel %vm4639_vm5, %v2783_v18, %v2787_v23  ;;  %v3144_v3 = vpack.c.b16 %v3124_v4, %v3123_v48  ;;  %v3122_v40 = vunpack.c.l.b16 %v2937_v11  ;;  %4102 = vmatmul.msk.bf16.gmra.mxu1 %vm1171_vm9, %v2192_v59  ;;  %v595_v62 = vshll.u32 %v309_v26, 16  ;;  %v5849_v18 = vld [vmem:[%s4594_s11 + $0x90] sm:$0xf]  ;;  %v5862_v11 = vld [vmem:[%s4594_s11 + $0x98] sm:$0x1] }
 0x15b   : > { %v3050_v25 = vunpack.c.l.b16 %v2788_v37  ;;  %v594_v38 = vrot.slane %v592_v15, 4  ;;  %v601_v32 = vshll.u32 %v310_v50, 16  ;;  %v605_v19 = vshrl.u32 %v310_v50, 16  ;;  %v5865_v59 = vld [vmem:[%s4594_s11 + $0xcc] sm:$0xf] }
 0x15c   : > { %3171 = vrot.lane.b32.xlu1 %v3144_v3, %s4498_s12  ;;  %v3143_v12 = vpack.c.b16 %v3122_v40, %v3121_v16  ;;  %v597_v33 = vrot.slane %v595_v62, 5  ;;  %v611_v61 = vshll.u32 %v311_v10, 16  ;;  %v3874_v45 = vrot.slane %v309_v26, 9  ;;  %v5840_v26 = vpop.permute.xlu0 %2049  ;;  %v5878_v3 = vpop.f32.mrf.mxu2 }
 0x15d   : > { %v3067_v36 = vpack.c.b16 %v3050_v25, %v3049_v2  ;;  %v603_v24 = vrot.slane %v601_v32, 5  ;;  %v607_v53 = vrot.slane %v605_v19, 4  ;;  %v841_v17 = vrot.slane %v310_v50, 5  ;;  %v5859_v2 = vld [vmem:[%s4594_s11 + $0x94] sm:$0xf] }
 0x15e   : > { %3169 = vrot.lane.b32.xlu2 %v3143_v12, %s4498_s12  ;;  %v598_v57 = vor.u32 %v597_v33, %v594_v38  ;;  %v613_v6 = vrot.slane %v611_v61, 5  ;;  %v844_v23 = vrot.slane %v311_v10, 5  ;;  %v3873_v43 = vrot.slane %v5651_v63, 9  ;;  %v5882_v32 = vpop.permute.xlu2 %2129  ;;  %v5887_v33 = vld [vmem:[%s4594_s11 + $0xd4] sm:$0x1] }
 0x15f   : > { %3097 = vrot.lane.b32.xlu0 %v3067_v36, %s4499_s13  ;;  %v608_v13 = vor.u32 %v607_v53, %v603_v24  ;;  %v842_v29 = vsel %vm4596_vm2, %v3874_v45, %v841_v17  ;;  %v843_v58 = vrot.slane %v841_v17, 4  ;;  %v834_v21 = vrot.slane %v5665_v49, 5 }
 0x160   : > { %v599_v47 = vrot.slane %v598_v57, 4  ;;  %v1024_v55 = vunpack.c.l.b16 %v842_v29  ;;  %v837_v48 = vrot.slane %v5671_v9, 5  ;;  %v5838_v63 = vsel %vm1082_vm7, %v4272_v31, %v5772_v44  ;;  %v5851_v9 = vpop.permute.xlu1 %3083 }
 0x161   : > { %v609_v14 = vrot.slane %v608_v13, 4  ;;  %v845_v30 = vsel %vm4596_vm2, %v843_v58, %v844_v23  ;;  %v835_v49 = vsel %vm4596_vm2, %v3873_v43, %v834_v21  ;;  %v836_v52 = vrot.slane %v834_v21, 4 }
 0x162   : > { %v604_v44 = vsel %vm4639_vm5, %v599_v47, %v603_v24  ;;  %v1025_v4 = vunpack.c.l.b16 %v845_v30  ;;  %v1022_v16 = vunpack.c.l.b16 %v835_v49  ;;  %v2208_v50 = vsel %vm1131_vm8, %v5793_v60, %v5746_v5  ;;  %v5876_v60 = vld [vmem:[%s4594_s11 + $0xd0] sm:$0xf]  ;;  %v5912_v30 = vpop.f32.mrf.mxu0 }
 0x163   : > { %v614_v10 = vsel %vm4639_vm5, %v609_v14, %v613_v6  ;;  %v944_v15 = vunpack.c.l.b16 %v604_v44  ;;  %v838_v37 = vsel %vm4596_vm2, %v836_v52, %v837_v48  ;;  %4110 = vmatmul.msk.bf16.gmra.mxu3 %vm1171_vm9, %v2208_v50  ;;  %v3242_v5 = vsel %vm1131_vm8, %v5802_v51, %v5759_v7  ;;  %v5898_v6 = vpop.f32.mrf.mxu1  ;;  %v5910_v14 = vld [vmem:[%s6431_s2] ss:$0 sm:$0xff]  ;;  %v4289_v50 = vld [vmem:[%s4594_s11 + $0x54] sm:$0xff] }
 0x164   : > { %v945_v40 = vunpack.c.l.b16 %v614_v10  ;;  %v1045_v62 = vpack.c.b16 %v1025_v4, %v1024_v55  ;;  %v1023_v25 = vunpack.c.l.b16 %v838_v37  ;;  %4253 = vmatmul.msk.bf16.gmra.mxu2 %vm1171_vm9, %v3242_v5  ;;  %v4022_v38 = vrot.slane %v5849_v18, 9  ;;  %v5901_v58 = vpop.permute.xlu0 %3163 }
 0x165   : > { %v1892_v19 = vrot.slane %v5859_v2, 5  ;;  %v1895_v12 = vrot.slane %v5862_v11, 5  ;;  %v2790_v7 = vshrl.u32 %v5865_v59, 16  ;;  %v2793_v51 = vshll.u32 %v5865_v59, 16 }
 0x166   : > { %v965_v61 = vpack.c.b16 %v945_v40, %v944_v15  ;;  %1072 = vrot.lane.b32.xlu1 %v1045_v62, %s4498_s12  ;;  %v1044_v45 = vpack.c.b16 %v1023_v25, %v1022_v16  ;;  %v2799_v31 = vshll.u32 %v5876_v60, 16  ;;  %v2803_v36 = vshrl.u32 %v5876_v60, 16 }
 0x167   : > { %v1893_v24 = vsel %vm4596_vm2, %v4022_v38, %v1892_v19  ;;  %v1894_v53 = vrot.slane %v1892_v19, 4  ;;  %v2792_v17 = vrot.slane %v2790_v7, 4  ;;  %v2795_v57 = vrot.slane %v2793_v51, 5  ;;  %v5924_v51 = vpop.f32.mrf.mxu2 }
 0x168   : > { %992 = vrot.lane.b32.xlu0 %v965_v61, %s4499_s13  ;;  %1070 = vrot.lane.b32.xlu2 %v1044_v45, %s4498_s12  ;;  %v2075_v23 = vunpack.c.l.b16 %v1893_v24  ;;  %v2801_v43 = vrot.slane %v2799_v31, 5  ;;  %v2805_v13 = vrot.slane %v2803_v36, 4  ;;  %v2809_v29 = vshll.u32 %v5887_v33, 16  ;;  %v5914_v49 = vpop.permute.xlu1 %984  ;;  %v5931_v36 = vpop.permute.xlu2 %1064 }
 0x169   : > { %v1896_v21 = vsel %vm4596_vm2, %v1894_v53, %v1895_v12  ;;  %v2796_v47 = vor.u32 %v2795_v57, %v2792_v17  ;;  %v2694_v55 = vshrl.u32 %v5757_v46, 16  ;;  %v2697_v48 = vshll.u32 %v5757_v46, 16 }
 0x16a   : > { %v2076_v52 = vunpack.c.l.b16 %v1896_v21  ;;  %v2806_v44 = vor.u32 %v2805_v13, %v2801_v43  ;;  %v2811_v4 = vrot.slane %v2809_v29, 5  ;;  %v2703_v16 = vshll.u32 %v5767_v1, 16 }
 0x16b   : > { %v2797_v10 = vrot.slane %v2796_v47, 4  ;;  %v2696_v15 = vrot.slane %v2694_v55, 4  ;;  %v2699_v37 = vrot.slane %v2697_v48, 5  ;;  %v2707_v46 = vshrl.u32 %v5767_v1, 16  ;;  %v5949_v21 = vpop.f32.mrf.mxu1  ;;  %v4307_v55 = vld [vmem:[%s4594_s11 + $0x6c] sm:$0xff] }
 0x16c   : > { %v2096_v5 = vpack.c.b16 %v2076_v52, %v2075_v23  ;;  %v2807_v40 = vrot.slane %v2806_v44, 4  ;;  %v2705_v62 = vrot.slane %v2703_v16, 5  ;;  %v2713_v25 = vshll.u32 %v5770_v42, 16  ;;  %v4297_v42 = vld [vmem:[%s4594_s11 + $0xb4] sm:$0xff] }
 0x16d   : > { %v2802_v38 = vsel %vm4639_vm5, %v2797_v10, %v2801_v43  ;;  %v2700_v19 = vor.u32 %v2699_v37, %v2696_v15  ;;  %v2709_v12 = vrot.slane %v2707_v46, 4  ;;  %v1297_v7 = vadd.f32 %v5910_v14, %v5809_v41  ;;  %v5943_v43 = vpop.permute.xlu0 %2035 }
 0x16e   : > { %v2812_v61 = vsel %vm4639_vm5, %v2807_v40, %v2811_v4  ;;  %v3051_v1 = vunpack.c.l.b16 %v2802_v38  ;;  %v2715_v45 = vrot.slane %v2713_v25, 5  ;;  %v2153_v31 = vsel %vm1082_vm7, %v4289_v50, %v5816_v28 }
 0x16f   : > { %v3052_v24 = vunpack.c.l.b16 %v2812_v61  ;;  %v2701_v53 = vrot.slane %v2700_v19, 4  ;;  %v2710_v17 = vor.u32 %v2709_v12, %v2705_v62  ;;  %v1145_v41 = vsel %vm1131_vm8, %v5838_v63, %v5807_v35 }
 0x170   : > { %2123 = vrot.lane.b32.xlu0 %v2096_v5, %s4498_s12  ;;  %3953 = vmatmul.msk.bf16.gmra.mxu0 %vm1171_vm9, %v1145_v41  ;;  %v2194_v57 = vsel %vm1131_vm8, %v2153_v31, %v5821_v20  ;;  %v2345_v28 = vadd.f32 %v5828_v8, %v1297_v7  ;;  %v4175_v23 = vrot.slane %v5733_v39, 9  ;;  %v2961_v29 = vrot.slane %v5744_v22, 5  ;;  %v5956_v48 = vpop.permute.xlu1 %2115 }
 0x171   : > { %v3068_v13 = vpack.c.b16 %v3052_v24, %v3051_v1  ;;  %v2706_v35 = vsel %vm4639_vm5, %v2701_v53, %v2705_v62  ;;  %v2711_v63 = vrot.slane %v2710_v17, 4  ;;  %4103 = vmatmul.msk.bf16.gmra.mxu1 %vm1171_vm9, %v2194_v57  ;;  %v2964_v8 = vrot.slane %v5753_v34, 5 }
 0x172   : > { %v3043_v20 = vunpack.c.l.b16 %v2706_v35  ;;  %v3393_v47 = vadd.f32 %v5823_v27, %v2345_v28  ;;  %v2177_v39 = vsel %vm1082_vm7, %v4297_v42, %v5840_v26  ;;  %v2962_v22 = vsel %vm4596_vm2, %v4175_v23, %v2961_v29  ;;  %v5970_v26 = vpop.f32.mrf.mxu0 }
 0x173   : > { %3099 = vrot.lane.b32.xlu1 %v3068_v13, %s4499_s13  ;;  %v2716_v52 = vsel %vm4639_vm5, %v2711_v63, %v2715_v45  ;;  %v2963_v34 = vrot.slane %v2961_v29, 4  ;;  %v1298_v27 = vadd.f32 %v5910_v14, %v5842_v54  ;;  %v2210_v10 = vsel %vm1131_vm8, %v2177_v39, %v5882_v32  ;;  %v4273_v54 = vld [vmem:[%s4594_s11 + $0x54] sm:$0xff]  ;;  %v5986_v32 = vpop.f32.mrf.mxu2  ;;  %v2272_v42 = vpop.f32.mrf.mxu1  ;;  %v4298_v39 = vld [vmem:[%s4594_s11 + $0xc0] sm:$0xff] }
 0x174   : > { %v3044_v44 = vunpack.c.l.b16 %v2716_v52  ;;  %v3425_v4 = vpack.c.bf16 %v3393_v47, %v3393_v47  ;;  %v3571_v16 = vmul.f32 %v3393_v47, %v3393_v47  ;;  %v3129_v37 = vunpack.c.l.b16 %v2962_v22  ;;  %4111 = vmatmul.msk.bf16.gmra.mxu3 %vm1171_vm9, %v2210_v10  ;;  %v4308_v10 = vld [vmem:[%s4594_s11 + $0x78] sm:$0xff] }
 0x175   : > { %v2965_v50 = vsel %vm4596_vm2, %v2963_v34, %v2964_v8  ;;  %v3204_v5 = vsel %vm1082_vm7, %v4307_v55, %v5851_v9  ;;  %v2346_v40 = vadd.f32 %v5898_v6, %v1298_v27  ;;  %v1646_v62 = vshrl.u32 %v5849_v18, 16 }
 0x176   : > { %v3064_v15 = vpack.c.b16 %v3044_v44, %v3043_v20  ;;  %3458 = vst.msk [vmem:[%s5964_s25] sm:$0xf] %vm3457_vm10, %v3425_v4  ;;  %v3130_v46 = vunpack.c.l.b16 %v2965_v50  ;;  %v1649_v25 = vshll.u32 %v5849_v18, 16  ;;  %v1655_v38 = vshll.u32 %v5859_v2, 16 }
 0x177   : > { %v3498_v19 = vsel %vm1131_vm8, %v3393_v47, 0.0  ;;  %v3603_v9 = vsel %vm1131_vm8, %v3571_v16, 0.0  ;;  %v1659_v12 = vshrl.u32 %v5859_v2, 16  ;;  %v1665_v7 = vshll.u32 %v5862_v11, 16  ;;  %v3086_v61 = vpop.permute.xlu0 %3085  ;;  %v4290_v2 = vld [vmem:[%s4594_s11 + $0x60] sm:$0xff] }
 0x178   : > { %3091 = vrot.lane.b32.xlu2 %v3064_v15, %s4499_s13  ;;  %v2052_v6 = vpop.permute.xlu2 %2051  ;;  %v3394_v1 = vadd.f32 %v5878_v3, %v2346_v40  ;;  %v1648_v18 = vrot.slane %v1646_v62, 4  ;;  %v1651_v45 = vrot.slane %v1649_v25, 5  ;;  %v1657_v31 = vrot.slane %v1655_v38, 5 }
 0x179   : > { %v3147_v24 = vpack.c.b16 %v3130_v46, %v3129_v37  ;;  %v1661_v53 = vrot.slane %v1659_v12, 4  ;;  %v1106_v17 = vsel %vm1082_vm7, %v4273_v54, %v5914_v49  ;;  %v3244_v41 = vsel %vm1131_vm8, %v3204_v5, %v5901_v58  ;;  %v2132_v49 = vpop.permute.xlu1 %2131 }
 0x17a   : > { %v3426_v57 = vpack.c.bf16 %v3394_v1, %v3394_v1  ;;  %v3499_v11 = vsel %vm1131_vm8, %v3394_v1, 0.0  ;;  %v3572_v28 = vmul.f32 %v3394_v1, %v3394_v1  ;;  %v1652_v3 = vor.u32 %v1651_v45, %v1648_v18  ;;  %4254 = vmatmul.msk.bf16.gmra.mxu2 %vm1171_vm9, %v3244_v41  ;;  %v1227_v23 = vpop.f32.mrf.mxu0 }
 0x17b   : > { %v3500_v13 = vadd.f32 %v3499_v11, %v3498_v19  ;;  %v1662_v35 = vor.u32 %v1661_v53, %v1657_v31  ;;  %v1667_v63 = vrot.slane %v1665_v7, 5  ;;  %v1299_v29 = vadd.f32 %v5910_v14, %v5912_v30  ;;  %v3323_v5 = vpop.f32.mrf.mxu2  ;;  %v4291_v53 = vld [vmem:[%s4594_s11 + $0x6c] sm:$0xff]  ;;  %v6051_v11 = vpop.f32.mrf.mxu3 }
 0x17c   : > { %3459 = vst.msk [vmem:[%s5964_s25 + $0x4] sm:$0xf] %vm3457_vm10, %v3426_v57  ;;  %v3604_v58 = vsel %vm1131_vm8, %v3572_v28, 0.0  ;;  %v1653_v20 = vrot.slane %v1652_v3, 4  ;;  %v1147_v47 = vsel %vm1131_vm8, %v1106_v17, %v5931_v36  ;;  %v2968_v8 = vrot.slane %v5876_v60, 5 }
 0x17d   : > { %v3605_v55 = vadd.f32 %v3604_v58, %v3603_v9  ;;  %v1663_v52 = vrot.slane %v1662_v35, 4  ;;  %v2156_v22 = vsel %vm1082_vm7, %v4290_v2, %v5943_v43  ;;  %v4176_v34 = vrot.slane %v5865_v59, 9  ;;  %v2275_v37 = vpop.f32.mrf.mxu1 }
 0x17e   : > { %v1658_v30 = vsel %vm4639_vm5, %v1653_v20, %v1657_v31  ;;  %v2970_v27 = vrot.slane %v2968_v8, 4  ;;  %v2971_v44 = vrot.slane %v5887_v33, 5  ;;  %v1300_v4 = vadd.f32 %v5910_v14, %v5970_v26 }
 0x17f   : > { %v1668_v60 = vsel %vm4639_vm5, %v1663_v52, %v1667_v63  ;;  %v1995_v36 = vunpack.c.l.b16 %v1658_v30  ;;  %v2347_v43 = vadd.f32 %v5949_v21, %v1299_v29  ;;  %v2180_v59 = vsel %vm1082_vm7, %v4298_v39, %v2052_v6  ;;  %v4274_v6 = vld [vmem:[%s4594_s11 + $0x60] sm:$0xff] }
 0x180   : > { %3177 = vrot.lane.b32.xlu2 %v3147_v24, %s4498_s12  ;;  %3954 = vmatmul.msk.bf16.gmra.mxu0 %vm1171_vm9, %v1147_v47  ;;  %v3166_v16 = vpop.permute.xlu2 %3165  ;;  %v1996_v50 = vunpack.c.l.b16 %v1668_v60  ;;  %v2196_v33 = vsel %vm1131_vm8, %v2156_v22, %v5956_v48  ;;  %v987_v15 = vpop.permute.xlu0 %986  ;;  %v2348_v46 = vadd.f32 %v2272_v42, %v1300_v4  ;;  %v2969_v21 = vsel %vm4596_vm2, %v4176_v34, %v2968_v8 }
 0x181   : > { %v3395_v56 = vadd.f32 %v5924_v51, %v2347_v43  ;;  %4104 = vmatmul.msk.bf16.gmra.mxu1 %vm1171_vm9, %v2196_v33  ;;  %v2972_v26 = vsel %vm4596_vm2, %v2970_v27, %v2971_v44  ;;  %v2212_v54 = vsel %vm1131_vm8, %v2180_v59, %v2132_v49  ;;  %v3207_v38 = vsel %vm1082_vm7, %v4308_v10, %v3086_v61  ;;  %v1067_v18 = vpop.permute.xlu1 %1066  ;;  %v4309_v43 = vld [vmem:[%s4594_s11 + $0x84] sm:$0xff] }
 0x182   : > { %v2016_v48 = vpack.c.b16 %v1996_v50, %v1995_v36  ;;  %v3396_v19 = vadd.f32 %v5986_v32, %v2348_v46  ;;  %v1229_v9 = vpop.f32.mrf.mxu0  ;;  %v3131_v12 = vunpack.c.l.b16 %v2969_v21  ;;  %v3132_v7 = vunpack.c.l.b16 %v2972_v26  ;;  %v4312_v26 = vld [vmem:[%s4594_s11 + $0xa8] sm:$0xff] }
 0x183   : > { %v3427_v40 = vpack.c.bf16 %v3395_v56, %v3395_v56  ;;  %v3501_v62 = vsel %vm1131_vm8, %v3395_v56, 0.0  ;;  %v3573_v25 = vmul.f32 %v3395_v56, %v3395_v56  ;;  %v1301_v1 = vadd.f32 %v5910_v14, %v1227_v23  ;;  %v3325_v58 = vpop.f32.mrf.mxu2 }
 0x184   : > { %v3502_v51 = vadd.f32 %v3501_v62, %v3500_v13  ;;  %4112 = vmatmul.msk.bf16.gmra.mxu3 %vm1171_vm9, %v2212_v54  ;;  %v3428_v31 = vpack.c.bf16 %v3396_v19, %v3396_v19  ;;  %v3503_v61 = vsel %vm1131_vm8, %v3396_v19, 0.0  ;;  %v3574_v32 = vmul.f32 %v3396_v19, %v3396_v19 }
 0x185   : > { %3460 = vst.msk [vmem:[%s5964_s25 + $0x8] sm:$0xf] %vm3457_vm10, %v3427_v40  ;;  %v3606_v0 = vsel %vm1131_vm8, %v3573_v25, 0.0  ;;  %v3246_v24 = vsel %vm1131_vm8, %v3207_v38, %v3166_v16  ;;  %v2349_v17 = vadd.f32 %v2275_v37, %v1301_v1  ;;  %v1302_v41 = vadd.f32 %v5910_v14, %v1229_v9  ;;  %v2277_v57 = vpop.f32.mrf.mxu1 }
 0x186   : > { %v3607_v45 = vadd.f32 %v3606_v0, %v3605_v55  ;;  %v3504_v42 = vadd.f32 %v3503_v61, %v3502_v51  ;;  %3461 = vst.msk [vmem:[%s5964_s25 + $0xc] sm:$0xf] %vm3457_vm10, %v3428_v31  ;;  %v3608_v2 = vsel %vm1131_vm8, %v3574_v32, 0.0  ;;  %v1109_v3 = vsel %vm1082_vm7, %v4274_v6, %v987_v15  ;;  %v6071_v15 = vpop.f32.mrf.mxu3 }
 0x187   : > { %v3397_v23 = vadd.f32 %v3323_v5, %v2349_v17  ;;  %v2350_v13 = vadd.f32 %v2277_v57, %v1302_v41  ;;  %v3148_v35 = vpack.c.b16 %v3132_v7, %v3131_v12  ;;  %v1149_v39 = vsel %vm1131_vm8, %v1109_v3, %v1067_v18  ;;  %v4275_v57 = vld [vmem:[%s4594_s11 + $0x6c] sm:$0xff] }
 0x188   : > { %2043 = vrot.lane.b32.xlu2 %v2016_v48, %s4499_s13  ;;  %v3609_v28 = vadd.f32 %v3608_v2, %v3607_v45  ;;  %v2118_v29 = vpop.permute.xlu0 %2117  ;;  %s6289_s13 = sand.u32 1, %s4480_s19  }
 0x189   : > { %v3429_v20 = vpack.c.bf16 %v3397_v23, %v3397_v23  ;;  %v3505_v47 = vsel %vm1131_vm8, %v3397_v23, 0.0  ;;  %v3575_v8 = vmul.f32 %v3397_v23, %v3397_v23  ;;  %v3398_v52 = vadd.f32 %v3325_v58, %v2350_v13  ;;  %s6305_s27 = scalar_lea.vmem [#allocation2], %s6289_s13  ;;  %s6311_s29 = scalar_lea.vmem [#allocation4], %s6289_s13 }
 0x18a   : > { %4255 = vmatmul.msk.bf16.gmra.mxu2 %vm1171_vm9, %v3246_v24  ;;  %v3506_v55 = vadd.f32 %v3505_v47, %v3504_v42  ;;  %s3702_s17 = sshll.u32 %s6305_s27, 4  ;;  %s3715_s24 = sshll.u32 %s6311_s29, 4  ;;  %s3703_s17 = int_to_ptr.vmem [resolvable:$true] %s3702_s17  ;;  %s6375_s24 = int_to_ptr.vmem [resolvable:$true] %s3715_s24 }
 0x18b   : > { %v2038_v63 = vpop.permute.xlu2 %2037  ;;  %3462 = vst.msk [vmem:[%s5964_s25 + $0x10] sm:$0xf] %vm3457_vm10, %v3429_v20  ;;  %v3610_v22 = vsel %vm1131_vm8, %v3575_v8, 0.0  ;;  %v3430_v27 = vpack.c.bf16 %v3398_v52, %v3398_v52  ;;  %v3507_v44 = vsel %vm1131_vm8, %v3398_v52, 0.0  ;;  %v3576_v60 = vmul.f32 %v3398_v52, %v3398_v52  ;;  %v3088_v36 = vpop.permute.xlu1 %3087  ;;  %v4313_v20 = vld [vmem:[%s4594_s11 + $0xb4] sm:$0xff]  ;;  %s3684_s21 = scalar_lea.sflag [#allocation3], %s6289_s13 }
 0x18c   : > { %v2159_v49 = vsel %vm1082_vm7, %v4291_v53, %v2038_v63  ;;  %v3611_v34 = vadd.f32 %v3610_v22, %v3609_v28  ;;  %v3508_v4 = vadd.f32 %v3507_v44, %v3506_v55  ;;  %v3210_v56 = vsel %vm1082_vm7, %v4309_v43, %v3088_v36  ;;  %v4310_v52 = vld [vmem:[%s4594_s11 + $0x90] sm:$0xff] }
 0x18d   : > { %v2198_v30 = vsel %vm1131_vm8, %v2159_v49, %v2118_v29  ;;  %3463 = vst.msk [vmem:[%s5964_s25 + $0x14] sm:$0xf] %vm3457_vm10, %v3430_v27  ;;  %v3612_v16 = vsel %vm1131_vm8, %v3576_v60, 0.0  ;;  %v3328_v37 = vpop.f32.mrf.mxu2 }
 0x18e   : > { %v3613_v50 = vadd.f32 %v3612_v16, %v3611_v34  ;;  %v6082_v0 = vpop.f32.mrf.mxu3 }
 0x190   : > { %3179 = vrot.lane.b32.xlu2 %v3148_v35, %s4498_s12  ;;  %3955 = vmatmul.msk.bf16.gmra.mxu0 %vm1171_vm9, %v1149_v39  ;;  %v4292_v35 = vld [vmem:[%s4594_s11 + $0x78] sm:$0xff] }
 0x191   : > { %4105 = vmatmul.msk.bf16.gmra.mxu1 %vm1171_vm9, %v2198_v30  ;;  %v3168_v46 = vpop.permute.xlu0 %3167 }
 0x192   : > { %v1232_v59 = vpop.f32.mrf.mxu0  ;;  %v3248_v54 = vsel %vm1131_vm8, %v3210_v56, %v3168_v46  ;;  %v4276_v46 = vld [vmem:[%s4594_s11 + $0x78] sm:$0xff] }
 0x193   : > { %v1303_v33 = vadd.f32 %v5910_v14, %v1232_v59  ;;  %v2280_v10 = vpop.f32.mrf.mxu1  ;;  %v3174_v25 = vpop.permute.xlu1 %3173 }
 0x195   : > { %v2351_v5 = vadd.f32 %v2280_v10, %v1303_v33  ;;  %v3330_v31 = vpop.f32.mrf.mxu2 }
 0x196   : > { %v6092_v28 = vpop.f32.mrf.mxu3 }
 0x197   : > { %v3399_v21 = vadd.f32 %v3328_v37, %v2351_v5 }
 0x199   : > { %v3431_v48 = vpack.c.bf16 %v3399_v21, %v3399_v21  ;;  %v3509_v40 = vsel %vm1131_vm8, %v3399_v21, 0.0  ;;  %v3577_v62 = vmul.f32 %v3399_v21, %v3399_v21  ;;  %v1069_v32 = vpop.permute.xlu0 %1068 }
 0x19a   : > { %v3510_v51 = vadd.f32 %v3509_v40, %v3508_v4  ;;  %v1234_v38 = vpop.f32.mrf.mxu0  ;;  %4256 = vmatmul.msk.bf16.gmra.mxu2 %vm1171_vm9, %v3248_v54 }
 0x19b   : > { %v3094_v19 = vpop.permute.xlu2 %3093  ;;  %3464 = vst.msk [vmem:[%s5964_s25 + $0x18] sm:$0xf] %vm3457_vm10, %v3431_v48  ;;  %v3614_v9 = vsel %vm1131_vm8, %v3577_v62, 0.0  ;;  %v1304_v12 = vadd.f32 %v5910_v14, %v1234_v38  ;;  %v2282_v7 = vpop.f32.mrf.mxu1 }
 0x19c   : > { %v3219_v6 = vsel %vm1082_vm7, %v4312_v26, %v3094_v19  ;;  %v3615_v1 = vadd.f32 %v3614_v9, %v3613_v50 }
 0x19d   : > { %v3254_v18 = vsel %vm1131_vm8, %v3219_v6, %v3174_v25  ;;  %v2352_v45 = vadd.f32 %v2282_v7, %v1304_v12  ;;  %v4293_v12 = vld [vmem:[%s4594_s11 + $0x84] sm:$0xff] }
 0x19e   : > { %4259 = vmatmul.msk.bf16.vlgmr.msra.gmra.mxu3 %vm1171_vm9, %v3254_v18  ;;  %v6098_v49 = vpop.f32.mrf.mxu3 }
 0x19f   : > { %v3400_v61 = vadd.f32 %v3330_v31, %v2352_v45 }
 0x1a0   : > { %v2040_v3 = vpop.permute.xlu1 %2039 }
 0x1a1   : > { %v3432_v42 = vpack.c.bf16 %v3400_v61, %v3400_v61  ;;  %v3511_v24 = vsel %vm1131_vm8, %v3400_v61, 0.0  ;;  %v3578_v53 = vmul.f32 %v3400_v61, %v3400_v61  ;;  %v2162_v58 = vsel %vm1082_vm7, %v4292_v35, %v2040_v3  ;;  %v4314_v35 = vld [vmem:[%s4594_s11 + $0xc0] sm:$0xff] }
 0x1a2   : > { %v3512_v17 = vadd.f32 %v3511_v24, %v3510_v51 }
 0x1a3   : > { %3465 = vst.msk [vmem:[%s5964_s25 + $0x1c] sm:$0xf] %vm3457_vm10, %v3432_v42  ;;  %v3616_v41 = vsel %vm1131_vm8, %v3578_v53, 0.0 }
 0x1a4   : > { %v3617_v2 = vadd.f32 %v3616_v41, %v3615_v1  ;;  %v4311_v41 = vld [vmem:[%s4594_s11 + $0x9c] sm:$0xff] }
 0x1a6   : > { %v6110_v43 = vpop.f32.mrf.mxu3 }
 0x1a7   : > { %v1237_v8 = vpop.f32.mrf.mxu0 }
 0x1a8   : > { %v989_v23 = vpop.permute.xlu2 %988  ;;  %v1305_v30 = vadd.f32 %v5910_v14, %v1237_v8 }
 0x1a9   : > { %v1112_v13 = vsel %vm1082_vm7, %v4275_v57, %v989_v23 }
 0x1aa   : > { %v1151_v63 = vsel %vm1131_vm8, %v1112_v13, %v1069_v32  ;;  %v3090_v29 = vpop.permute.xlu0 %3089 }
 0x1ab   : > { %3956 = vmatmul.msk.bf16.gmra.mxu0 %vm1171_vm9, %v1151_v63  ;;  %v3213_v44 = vsel %vm1082_vm7, %v4310_v52, %v3090_v29  ;;  %v3333_v60 = vpop.f32.mrf.mxu2 }
 0x1ae   : > { %v3096_v55 = vpop.permute.xlu1 %3095  ;;  %v6121_v19 = vpop.f32.mrf.mxu3 }
 0x1af   : > { %v3222_v22 = vsel %vm1082_vm7, %v4313_v20, %v3096_v55  ;;  %v1239_v33 = vpop.f32.mrf.mxu0 }
 0x1b0   : > { %v2120_v47 = vpop.permute.xlu2 %2119  ;;  %v1306_v26 = vadd.f32 %v5910_v14, %v1239_v33 }
 0x1b1   : > { %v2200_v39 = vsel %vm1131_vm8, %v2162_v58, %v2120_v47  ;;  %v4277_v47 = vld [vmem:[%s4594_s11 + $0x84] sm:$0xff] }
 0x1b2   : > { %4106 = vmatmul.msk.bf16.gmra.mxu1 %vm1171_vm9, %v2200_v39 }
 0x1b3   : > { %v3335_v51 = vpop.f32.mrf.mxu2 }
 0x1b4   : > { %v3176_v34 = vpop.permute.xlu0 %3175 }
 0x1b5   : > { %v3256_v27 = vsel %vm1131_vm8, %v3222_v22, %v3176_v34 }
 0x1b6   : > { %4260 = vmatmul.msk.bf16.gmra.mxu3 %vm1171_vm9, %v3256_v27  ;;  %v2285_v36 = vpop.f32.mrf.mxu1 }
 0x1b7   : > { %v2353_v4 = vadd.f32 %v2285_v36, %v1305_v30 }
 0x1b8   : > { %v3170_v16 = vpop.permute.xlu2 %3169 }
 0x1b9   : > { %v3250_v50 = vsel %vm1131_vm8, %v3213_v44, %v3170_v16  ;;  %v3401_v59 = vadd.f32 %v3333_v60, %v2353_v4 }
 0x1ba   : > { %4257 = vmatmul.msk.bf16.gmra.mxu2 %vm1171_vm9, %v3250_v50 }
 0x1bb   : > { %v3433_v10 = vpack.c.bf16 %v3401_v59, %v3401_v59  ;;  %v3513_v37 = vsel %vm1131_vm8, %v3401_v59, 0.0  ;;  %v3579_v56 = vmul.f32 %v3401_v59, %v3401_v59 }
 0x1bc   : > { %v991_v5 = vpop.permute.xlu1 %990  ;;  %v3514_v21 = vadd.f32 %v3513_v37, %v3512_v17  ;;  %v6133_v17 = vpop.f32.mrf.mxu3 }
 0x1bd   : > { %3466 = vst.msk [vmem:[%s5964_s25 + $0x20] sm:$0xf] %vm3457_vm10, %v3433_v10  ;;  %v3618_v54 = vsel %vm1131_vm8, %v3579_v56, 0.0  ;;  %v1115_v25 = vsel %vm1082_vm7, %v4276_v46, %v991_v5  ;;  %v4294_v56 = vld [vmem:[%s4594_s11 + $0x90] sm:$0xff] }
 0x1be   : > { %v3619_v48 = vadd.f32 %v3618_v54, %v3617_v2  ;;  %v2287_v40 = vpop.f32.mrf.mxu1 }
 0x1bf   : > { %v2354_v62 = vadd.f32 %v2287_v40, %v1306_v26 }
 0x1c1   : > { %v3402_v38 = vadd.f32 %v3335_v51, %v2354_v62 }
 0x1c2   : > { %v1071_v9 = vpop.permute.xlu2 %1070 }
 0x1c3   : > { %v1153_v7 = vsel %vm1131_vm8, %v1115_v25, %v1071_v9  ;;  %v3434_v6 = vpack.c.bf16 %v3402_v38, %v3402_v38  ;;  %v3515_v1 = vsel %vm1131_vm8, %v3402_v38, 0.0  ;;  %v3580_v18 = vmul.f32 %v3402_v38, %v3402_v38  ;;  %v4315_v25 = vld [vmem:[%s4594_s11 + $0xcc] sm:$0xff]  ;;  %s4400_s11 = sshra.s32 %s3705_s7, 4  ;;  %s4401_s11 = int_to_ptr.hbm [resolvable:$true] %s4400_s11 }
 0x1c4   : > { %3957 = vmatmul.msk.bf16.gmra.mxu0 %vm1171_vm9, %v1153_v7  ;;  %v2122_v45 = vpop.permute.xlu1 %2121  ;;  %v3516_v31 = vadd.f32 %v3515_v1, %v3514_v21  ;;  %v1323_v7 = vadd.f32 %v5910_v14, %v6082_v0  ;;  %s4402_s12 = scalar_lea.hbm %s4401_s11, 1  ;;  %p4407_p1 = scmp.lt.s32.totalorder %s4401_s11, %s6433_s4 }
 0x1c5   : > { %v2042_v61 = vpop.permute.xlu0 %2041  ;;  %3467 = vst.msk [vmem:[%s5964_s25 + $0x24] sm:$0xf] %vm3457_vm10, %v3434_v6  ;;  %v3620_v32 = vsel %vm1131_vm8, %v3580_v18, 0.0  ;;  %p4403_p12 = scmp.ne.s32.totalorder %s4401_s11, %s4402_s12  ;;  %p4408_p2 = scmp.lt.s32.totalorder %s4406_s10, %s4402_s12 }
 0x1c6   : > { %v2165_v42 = vsel %vm1082_vm7, %v4293_v12, %v2042_v61  ;;  %v3621_v24 = vadd.f32 %v3620_v32, %v3619_v48  ;;  %v6139_v29 = vpop.f32.mrf.mxu3 }
 0x1c7   : > { %v2202_v53 = vsel %vm1131_vm8, %v2165_v42, %v2122_v45  ;;  %p4404_p13 = pnand %p4403_p12, %p4571_p4  ;;  %p4409_p3 = por %p4408_p2, %p4407_p1 }
 0x1c8   : > { %4107 = vmatmul.msk.bf16.gmra.mxu1 %vm1171_vm9, %v2202_v53  ;;  %v3338_v20 = vpop.f32.mrf.mxu2  ;;  %v1324_v53 = vadd.f32 %v5910_v14, %v6092_v28 }
 0x1c9   : > { %p4405_p0 = pneg %p4404_p13 }
 0x1cb   : > { %p4410_p5 = pnand %p4409_p3, %p4405_p0 }
 0x1ce   : > { %v3172_v2 = vpop.permute.xlu1 %3171  ;;  %v1242_v3 = vpop.f32.mrf.mxu0 }
 0x1cf   : > { %v1307_v58 = vadd.f32 %v5910_v14, %v1242_v3  ;;  %v6151_v33 = vpop.f32.mrf.mxu3 }
 0x1d0   : > { %v3340_v26 = vpop.f32.mrf.mxu2 }
 0x1d1   : > { %v3098_v57 = vpop.permute.xlu0 %3097 }
 0x1d2   : > { %v3092_v23 = vpop.permute.xlu2 %3091  ;;  %v3225_v39 = vsel %vm1082_vm7, %v4314_v35, %v3098_v57 }
 0x1d3   : > { %v3216_v13 = vsel %vm1082_vm7, %v4311_v41, %v3092_v23 }
 0x1d4   : > { %v3252_v63 = vsel %vm1131_vm8, %v3216_v13, %v3172_v2 }
 0x1d5   : > { %4258 = vmatmul.msk.bf16.gmra.mxu2 %vm1171_vm9, %v3252_v63 }
 0x1d6   : > { %v1244_v60 = vpop.f32.mrf.mxu0 }
 0x1d7   : > { %v2290_v8 = vpop.f32.mrf.mxu1  ;;  %v1308_v37 = vadd.f32 %v5910_v14, %v1244_v60 }
 0x1d8   : > { %v2355_v55 = vadd.f32 %v2290_v8, %v1307_v58  ;;  %v1073_v52 = vpop.permute.xlu1 %1072 }
 0x1da   : > { %v3178_v22 = vpop.permute.xlu2 %3177  ;;  %v993_v30 = vpop.permute.xlu0 %992  ;;  %v3403_v34 = vadd.f32 %v3338_v20, %v2355_v55 }
 0x1db   : > { %v3258_v27 = vsel %vm1131_vm8, %v3225_v39, %v3178_v22  ;;  %v1118_v44 = vsel %vm1082_vm7, %v4277_v47, %v993_v30  ;;  %v1325_v30 = vadd.f32 %v5910_v14, %v6098_v49 }
 0x1dc   : > { %4261 = vmatmul.msk.bf16.gmra.mxu3 %vm1171_vm9, %v3258_v27  ;;  %v1155_v36 = vsel %vm1131_vm8, %v1118_v44, %v1073_v52  ;;  %v3435_v4 = vpack.c.bf16 %v3403_v34, %v3403_v34  ;;  %v3517_v16 = vsel %vm1131_vm8, %v3403_v34, 0.0  ;;  %v3581_v50 = vmul.f32 %v3403_v34, %v3403_v34 }
 0x1dd   : > { %3958 = vmatmul.msk.bf16.gmra.mxu0 %vm1171_vm9, %v1155_v36  ;;  %v3518_v59 = vadd.f32 %v3517_v16, %v3516_v31 }
 0x1de   : > { %3468 = vst.msk [vmem:[%s5964_s25 + $0x28] sm:$0xf] %vm3457_vm10, %v3435_v4  ;;  %v3622_v10 = vsel %vm1131_vm8, %v3581_v50, 0.0 }
 0x1df   : > { %v3623_v46 = vadd.f32 %v3622_v10, %v3621_v24  ;;  %v2292_v5 = vpop.f32.mrf.mxu1 }
 0x1e0   : > { %v2356_v21 = vadd.f32 %v2292_v5, %v1308_v37  ;;  %v1326_v5 = vadd.f32 %v5910_v14, %v6110_v43 }
 0x1e2   : > { %v2044_v54 = vpop.permute.xlu2 %2043  ;;  %v2124_v48 = vpop.permute.xlu0 %2123  ;;  %v3404_v40 = vadd.f32 %v3340_v26, %v2356_v21 }
 0x1e3   : > { %v2168_v62 = vsel %vm1082_vm7, %v4294_v56, %v2044_v54 }
 0x1e4   : > { %v2204_v51 = vsel %vm1131_vm8, %v2168_v62, %v2124_v48  ;;  %v3436_v38 = vpack.c.bf16 %v3404_v40, %v3404_v40  ;;  %v3519_v9 = vsel %vm1131_vm8, %v3404_v40, 0.0  ;;  %v3582_v12 = vmul.f32 %v3404_v40, %v3404_v40 }
 0x1e5   : > { %v3100_v6 = vpop.permute.xlu1 %3099  ;;  %4108 = vmatmul.msk.bf16.gmra.mxu1 %vm1171_vm9, %v2204_v51  ;;  %v3520_v1 = vadd.f32 %v3519_v9, %v3518_v59 }
 0x1e6   : > { %3469 = vst.msk [vmem:[%s5964_s25 + $0x2c] sm:$0xf] %vm3457_vm10, %v3436_v38  ;;  %v3624_v18 = vsel %vm1131_vm8, %v3582_v12, 0.0  ;;  %v2330_v45 = vpop.f32.mrf.mxu3  ;;  %v3228_v32 = vsel %vm1082_vm7, %v4315_v25, %v3100_v6 }
 0x1e7   : > { %v3625_v31 = vadd.f32 %v3624_v18, %v3623_v46  ;;  %v6168_v61 = vadd.f32 %v2330_v45, %v1323_v7  ;;  %v3343_v0 = vpop.f32.mrf.mxu2 }
 0x1ea   : > { %v3180_v42 = vpop.permute.xlu2 %3179 }
 0x1eb   : > { %v3260_v24 = vsel %vm1131_vm8, %v3228_v32, %v3180_v42 }
 0x1ec   : > { %4262 = vmatmul.msk.bf16.gmra.mxu3 %vm1171_vm9, %v3260_v24 }
 0x1ed   : > { %v1247_v41 = vpop.f32.mrf.mxu0 }
 0x1ee   : > { %v1309_v2 = vadd.f32 %v5910_v14, %v1247_v41  ;;  %v2295_v57 = vpop.f32.mrf.mxu1  ;;  %v2332_v3 = vpop.f32.mrf.mxu3 }
 0x1ef   : > { %v6176_v23 = vadd.f32 %v2332_v3, %v1324_v53  ;;  %v3345_v39 = vpop.f32.mrf.mxu2 }
 0x1f0   : > { %v2357_v13 = vadd.f32 %v2295_v57, %v1309_v2 }
 0x1f2   : > { %v3405_v35 = vadd.f32 %v3343_v0, %v2357_v13 }
 0x1f4   : > { %v3437_v63 = vpack.c.bf16 %v3405_v35, %v3405_v35  ;;  %v3521_v58 = vsel %vm1131_vm8, %v3405_v35, 0.0  ;;  %v3583_v20 = vmul.f32 %v3405_v35, %v3405_v35  ;;  %v1328_v35 = vadd.f32 %v5910_v14, %v6133_v17 }
 0x1f5   : > { %v3522_v47 = vadd.f32 %v3521_v58, %v3520_v1  ;;  %v1249_v8 = vpop.f32.mrf.mxu0  ;;  %v1327_v1 = vadd.f32 %v5910_v14, %v6121_v19 }
 0x1f6   : > { %3470 = vst.msk [vmem:[%s5964_s25 + $0x30] sm:$0xf] %vm3457_vm10, %v3437_v63  ;;  %v3626_v28 = vsel %vm1131_vm8, %v3583_v20, 0.0  ;;  %v1310_v55 = vadd.f32 %v5910_v14, %v1249_v8  ;;  %v2297_v52 = vpop.f32.mrf.mxu1 }
 0x1f7   : > { %v3627_v22 = vadd.f32 %v3626_v28, %v3625_v31  ;;  %v2335_v27 = vpop.f32.mrf.mxu3 }
 0x1f8   : > { %v2358_v34 = vadd.f32 %v2297_v52, %v1310_v55  ;;  %v6185_v60 = vadd.f32 %v2335_v27, %v1325_v30 }
 0x1fa   : > { %v3406_v44 = vadd.f32 %v3345_v39, %v2358_v34 }
 0x1fc   : > { %v3438_v36 = vpack.c.bf16 %v3406_v44, %v3406_v44  ;;  %v3523_v4 = vsel %vm1131_vm8, %v3406_v44, 0.0  ;;  %v3584_v16 = vmul.f32 %v3406_v44, %v3406_v44 }
 0x1fd   : > { %v3524_v50 = vadd.f32 %v3523_v4, %v3522_v47  ;;  %v1252_v59 = vpop.f32.mrf.mxu0  ;;  %v3348_v56 = vpop.f32.mrf.mxu2 }
 0x1fe   : > { %3471 = vst.msk [vmem:[%s5964_s25 + $0x34] sm:$0xf] %vm3457_vm10, %v3438_v36  ;;  %v3628_v10 = vsel %vm1131_vm8, %v3584_v16, 0.0  ;;  %v1311_v37 = vadd.f32 %v5910_v14, %v1252_v59  ;;  %v2300_v46 = vpop.f32.mrf.mxu1 }
 0x1ff   : > { %v3629_v49 = vadd.f32 %v3628_v10, %v3627_v22  ;;  %v2337_v26 = vpop.f32.mrf.mxu3  ;;  %v1321_v10 = vadd.f32 %v5910_v14, %v6051_v11 }
 0x200   : > { %v2359_v21 = vadd.f32 %v2300_v46, %v1311_v37  ;;  %v6194_v54 = vadd.f32 %v2337_v26, %v1326_v5  ;;  %v1322_v26 = vadd.f32 %v5910_v14, %v6071_v15 }
 0x202   : > { %v3407_v48 = vadd.f32 %v3348_v56, %v2359_v21  ;;  %v2370_v11 = vadd.f32 %v6151_v33, %v1322_v26 }
 0x204   : > { %v3439_v40 = vpack.c.bf16 %v3407_v48, %v3407_v48  ;;  %v3525_v62 = vsel %vm1131_vm8, %v3407_v48, 0.0  ;;  %v3585_v25 = vmul.f32 %v3407_v48, %v3407_v48 }
 0x205   : > { %v1254_v51 = vpop.f32.mrf.mxu0  ;;  %v3526_v38 = vadd.f32 %v3525_v62, %v3524_v50  ;;  %v3350_v7 = vpop.f32.mrf.mxu2 }
 0x206   : > { %v1312_v9 = vadd.f32 %v5910_v14, %v1254_v51  ;;  %3472 = vst.msk [vmem:[%s5964_s25 + $0x38] sm:$0xf] %vm3457_vm10, %v3439_v40  ;;  %v3630_v12 = vsel %vm1131_vm8, %v3585_v25, 0.0  ;;  %v2302_v6 = vpop.f32.mrf.mxu1 }
 0x207   : > { %v3631_v43 = vadd.f32 %v3630_v12, %v3629_v49  ;;  %v2340_v45 = vpop.f32.mrf.mxu3  ;;  %v2369_v49 = vadd.f32 %v6139_v29, %v1321_v10 }
 0x208   : > { %v2360_v18 = vadd.f32 %v2302_v6, %v1312_v9  ;;  %v6203_v32 = vadd.f32 %v2340_v45, %v1327_v1 }
 0x20a   : > { %v3408_v31 = vadd.f32 %v3350_v7, %v2360_v18 }
 0x20c   : > { %v3440_v42 = vpack.c.bf16 %v3408_v31, %v3408_v31  ;;  %v3527_v24 = vsel %vm1131_vm8, %v3408_v31, 0.0  ;;  %v3586_v0 = vmul.f32 %v3408_v31, %v3408_v31 }
 0x20d   : > { %v3528_v53 = vadd.f32 %v3527_v24, %v3526_v38  ;;  %v1257_v41 = vpop.f32.mrf.mxu0  ;;  %v3353_v19 = vpop.f32.mrf.mxu2 }
 0x20e   : > { %3473 = vst.msk [vmem:[%s5964_s25 + $0x3c] sm:$0xf] %vm3457_vm10, %v3440_v42  ;;  %v3632_v2 = vsel %vm1131_vm8, %v3586_v0, 0.0  ;;  %v1313_v57 = vadd.f32 %v5910_v14, %v1257_v41  ;;  %v2305_v13 = vpop.f32.mrf.mxu1 }
 0x20f   : > { %v3633_v3 = vadd.f32 %v3632_v2, %v3631_v43  ;;  %v2342_v58 = vpop.f32.mrf.mxu3 }
 0x210   : > { %v2361_v63 = vadd.f32 %v2305_v13, %v1313_v57  ;;  %v6212_v20 = vadd.f32 %v2342_v58, %v1328_v35 }
 0x212   : > { %v3409_v47 = vadd.f32 %v3353_v19, %v2361_v63 }
 0x214   : > { %v3441_v8 = vpack.c.bf16 %v3409_v47, %v3409_v47  ;;  %v3529_v28 = vsel %vm1131_vm8, %v3409_v47, 0.0  ;;  %v3587_v39 = vmul.f32 %v3409_v47, %v3409_v47 }
 0x215   : > { %v3530_v55 = vadd.f32 %v3529_v28, %v3528_v53  ;;  %v1259_v52 = vpop.f32.mrf.mxu0  ;;  %v3355_v44 = vpop.f32.mrf.mxu2 }
 0x216   : > { %3474 = vst.msk [vmem:[%s5964_s25 + $0x40] sm:$0xf] %vm3457_vm10, %v3441_v8  ;;  %v3634_v22 = vsel %vm1131_vm8, %v3587_v39, 0.0  ;;  %v1314_v30 = vadd.f32 %v5910_v14, %v1259_v52  ;;  %v2307_v17 = vpop.f32.mrf.mxu1 }
 0x217   : > { %v3635_v34 = vadd.f32 %v3634_v22, %v3633_v3 }
 0x218   : > { %v2362_v27 = vadd.f32 %v2307_v17, %v1314_v30 }
 0x21a   : > { %v3410_v36 = vadd.f32 %v3355_v44, %v2362_v27 }
 0x21c   : > { %v3442_v4 = vpack.c.bf16 %v3410_v36, %v3410_v36  ;;  %v3531_v16 = vsel %vm1131_vm8, %v3410_v36, 0.0  ;;  %v3588_v50 = vmul.f32 %v3410_v36, %v3410_v36 }
 0x21d   : > { %v6220_v59 = vadd.f32 %v3531_v16, %v3530_v55  ;;  %v3358_v51 = vpop.f32.mrf.mxu2 }
 0x21e   : > { %3475 = vst.msk [vmem:[%s5964_s25 + $0x44] sm:$0xf] %vm3457_vm10, %v3442_v4  ;;  %v3636_v37 = vsel %vm1131_vm8, %v3588_v50, 0.0 }
 0x21f   : > { %v6227_v56 = vadd.f32 %v3636_v37, %v3635_v34 }
 0x221   : > { %v3373_v46 = vpop.f32.mrf.mxu3 }
 0x222   : > { %v6230_v5 = vadd.f32 %v3373_v46, %v2369_v49 }
 0x224   : > { %v3449_v21 = vpack.c.bf16 %v6230_v5, %v6230_v5 }
 0x225   : > { %v3360_v1 = vpop.f32.mrf.mxu2 }
 0x226   : > { %3482 = vst.msk [vmem:[%s5964_s25 + $0x60] sm:$0xf] %vm3457_vm10, %v3449_v21 }
 0x228   : > { %v1262_v48 = vpop.f32.mrf.mxu0 }
 0x229   : > { %v3375_v40 = vpop.f32.mrf.mxu3  ;;  %v1315_v29 = vadd.f32 %v5910_v14, %v1262_v48 }
 0x22a   : > { %v6239_v62 = vadd.f32 %v3375_v40, %v2370_v11 }
 0x22c   : > { %v3450_v25 = vpack.c.bf16 %v6239_v62, %v6239_v62 }
 0x22e   : > { %3483 = vst.msk [vmem:[%s5964_s25 + $0x64] sm:$0xf] %vm3457_vm10, %v3450_v25 }
 0x22f   : > { %v2310_v38 = vpop.f32.mrf.mxu1 }
 0x230   : > { %v2363_v15 = vadd.f32 %v2310_v38, %v1315_v29  ;;  %v1264_v9 = vpop.f32.mrf.mxu0 }
 0x231   : > { %v1316_v33 = vadd.f32 %v5910_v14, %v1264_v9 }
 0x232   : > { %v3411_v12 = vadd.f32 %v3358_v51, %v2363_v15 }
 0x234   : > { %v3443_v7 = vpack.c.bf16 %v3411_v12, %v3411_v12  ;;  %v3589_v22 = vmul.f32 %v3411_v12, %v3411_v12  ;;  %v3533_v4 = vsel %vm1131_vm8, %v3411_v12, 0.0 }
 0x235   : > { %v3534_v37 = vadd.f32 %v3533_v4, %v6220_v59 }
 0x236   : > { %3476 = vst.msk [vmem:[%s5964_s25 + $0x48] sm:$0xf] %vm3457_vm10, %v3443_v7  ;;  %v3638_v50 = vsel %vm1131_vm8, %v3589_v22, 0.0 }
 0x237   : > { %v2312_v43 = vpop.f32.mrf.mxu1  ;;  %v3639_v26 = vadd.f32 %v3638_v50, %v6227_v56 }
 0x238   : > { %v2364_v6 = vadd.f32 %v2312_v43, %v1316_v33 }
 0x239   : > { %v3378_v18 = vpop.f32.mrf.mxu3 }
 0x23a   : > { %v3412_v45 = vadd.f32 %v3360_v1, %v2364_v6  ;;  %v6250_v31 = vadd.f32 %v3378_v18, %v6168_v61 }
 0x23c   : > { %v3444_v42 = vpack.c.bf16 %v3412_v45, %v3412_v45  ;;  %v3451_v24 = vpack.c.bf16 %v6250_v31, %v6250_v31  ;;  %v3590_v17 = vmul.f32 %v3412_v45, %v3412_v45  ;;  %v3597_v22 = vmul.f32 %v6250_v31, %v6250_v31 }
 0x23d   : > { %v3363_v57 = vpop.f32.mrf.mxu2 }
 0x23e   : > { %3477 = vst.msk [vmem:[%s5964_s25 + $0x4c] sm:$0xf] %vm3457_vm10, %v3444_v42  ;;  %v3640_v49 = vsel %vm1131_vm8, %v3590_v17, 0.0 }
 0x23f   : > { %3484 = vst.msk [vmem:[%s5964_s25 + $0x68] sm:$0xf] %vm3457_vm10, %v3451_v24  ;;  %v3641_v38 = vadd.f32 %v3640_v49, %v3639_v26  ;;  %v4500_v24 = vmov 0.0  }
 0x240   : > { %3495 = vst.msk [vmem:[%s6305_s27] sm:$0x1] %vm3494_vm11, %v4500_v24 }
 0x241   : > { %v1267_v0 = vpop.f32.mrf.mxu0  ;;  %v3380_v53 = vpop.f32.mrf.mxu3  ;;  %3496 = vst.msk [vmem:[%s6311_s29] sm:$0x1] %vm3494_vm11, %v4500_v24 }
 0x242   : > { %v1317_v41 = vadd.f32 %v5910_v14, %v1267_v0  ;;  %v6260_v2 = vadd.f32 %v3380_v53, %v6176_v23 }
 0x244   : > { %v3452_v61 = vpack.c.bf16 %v6260_v2, %v6260_v2 }
 0x245   : > { %v2315_v3 = vpop.f32.mrf.mxu1  ;;  %v3365_v23 = vpop.f32.mrf.mxu2 }
 0x246   : > { %v2365_v19 = vadd.f32 %v2315_v3, %v1317_v41  ;;  %3485 = vst.msk [vmem:[%s5964_s25 + $0x6c] sm:$0xf] %vm3457_vm10, %v3452_v61 }
 0x248   : > { %v3413_v13 = vadd.f32 %v3363_v57, %v2365_v19 }
 0x249   : > { %v1269_v35 = vpop.f32.mrf.mxu0 }
 0x24a   : > { %v3445_v63 = vpack.c.bf16 %v3413_v13, %v3413_v13  ;;  %v1318_v58 = vadd.f32 %v5910_v14, %v1269_v35  ;;  %v4385_v14 = vld [vmem:[%s6431_s2] ss:$0 sm:$0xff]  ;;  %v3591_v46 = vmul.f32 %v3413_v13, %v3413_v13  ;;  %v3537_v11 = vsel %vm1131_vm8, %v3413_v13, 0.0 }
 0x24b   : > { %v3595_v13 = vmul.f32 %v6230_v5, %v6230_v5 }
 0x24c   : > { %3478 = vst.msk [vmem:[%s5964_s25 + $0x50] sm:$0xf] %vm3457_vm10, %v3445_v63  ;;  %v3642_v9 = vsel %vm1131_vm8, %v3591_v46, 0.0 }
 0x24d   : > { %v2317_v47 = vpop.f32.mrf.mxu1 }
 0x24e   : > { %v2366_v8 = vadd.f32 %v2317_v47, %v1318_v58  ;;  %v3545_v58 = vsel %vm1131_vm8, %v6230_v5, 0.0 }
 0x250   : > { %v3414_v28 = vadd.f32 %v3365_v23, %v2366_v8  ;;  %v3596_v23 = vmul.f32 %v6239_v62, %v6239_v62 }
 0x252   : > { %v3446_v39 = vpack.c.bf16 %v3414_v28, %v3414_v28  ;;  %v3592_v25 = vmul.f32 %v3414_v28, %v3414_v28  ;;  %v3539_v59 = vsel %vm1131_vm8, %v3414_v28, 0.0  ;;  %v3652_v17 = vsel %vm1131_vm8, %v3596_v23, 0.0 }
 0x254   : > { %3479 = vst.msk [vmem:[%s5964_s25 + $0x54] sm:$0xf] %vm3457_vm10, %v3446_v39  ;;  %v3644_v1 = vsel %vm1131_vm8, %v3592_v25, 0.0 }
 0x258   : > { %v3368_v27 = vpop.f32.mrf.mxu2 }
 0x25a   : > { %v1272_v55 = vpop.f32.mrf.mxu0 }
 0x25b   : > { %v1319_v34 = vadd.f32 %v4385_v14, %v1272_v55  ;;  %v3547_v55 = vsel %vm1131_vm8, %v6239_v62, 0.0  ;;  %v3551_v62 = vsel %vm1131_vm8, %v6260_v2, 0.0 }
 0x25f   : > { %v3383_v52 = vpop.f32.mrf.mxu3 }
 0x260   : > { %v6272_v30 = vadd.f32 %v3383_v52, %v6185_v60  ;;  %v3535_v60 = vsel %vm1131_vm8, %v3412_v45, 0.0  ;;  %v3370_v18 = vpop.f32.mrf.mxu2  ;;  %v3643_v45 = vadd.f32 %v3642_v9, %v3641_v38 }
 0x261   : > { %v3536_v29 = vadd.f32 %v3535_v60, %v3534_v37 }
 0x262   : > { %v3453_v44 = vpack.c.bf16 %v6272_v30, %v6272_v30  ;;  %v2320_v36 = vpop.f32.mrf.mxu1  ;;  %v1274_v21 = vpop.f32.mrf.mxu0  ;;  %v3645_v41 = vadd.f32 %v3644_v1, %v3643_v45  ;;  %v3599_v50 = vmul.f32 %v6272_v30, %v6272_v30 }
 0x263   : > { %v2367_v16 = vadd.f32 %v2320_v36, %v1319_v34  ;;  %v1320_v15 = vadd.f32 %v4385_v14, %v1274_v21  ;;  %v3538_v56 = vadd.f32 %v3537_v11, %v3536_v29  ;;  %v3549_v14 = vsel %vm1131_vm8, %v6250_v31, 0.0 }
 0x264   : > { %3486 = vst.msk [vmem:[%s5964_s25 + $0x70] sm:$0xf] %vm3457_vm10, %v3453_v44 }
 0x265   : > { %v3415_v10 = vadd.f32 %v3368_v27, %v2367_v16  ;;  %v3540_v6 = vadd.f32 %v3539_v59, %v3538_v56  ;;  %v3598_v27 = vmul.f32 %v6260_v2, %v6260_v2  ;;  %v3654_v16 = vsel %vm1131_vm8, %v3597_v22, 0.0 }
 0x267   : > { %v3385_v48 = vpop.f32.mrf.mxu3  ;;  %v3447_v40 = vpack.c.bf16 %v3415_v10, %v3415_v10  ;;  %v3593_v7 = vmul.f32 %v3415_v10, %v3415_v10  ;;  %v3656_v49 = vsel %vm1131_vm8, %v3598_v27, 0.0 }
 0x268   : > { %v6292_v51 = vadd.f32 %v3385_v48, %v6194_v54  ;;  %v3541_v54 = vsel %vm1131_vm8, %v3415_v10, 0.0  ;;  %v3553_v10 = vsel %vm1131_vm8, %v6272_v30, 0.0  ;;  %v3658_v48 = vsel %vm1131_vm8, %v3599_v50, 0.0 }
 0x269   : > { %3480 = vst.msk [vmem:[%s5964_s25 + $0x58] sm:$0xf] %vm3457_vm10, %v3447_v40  ;;  %v3542_v0 = vadd.f32 %v3541_v54, %v3540_v6  ;;  %v3646_v53 = vsel %vm1131_vm8, %v3593_v7, 0.0 }
 0x26a   : > { %v3454_v12 = vpack.c.bf16 %v6292_v51, %v6292_v51  ;;  %v2322_v33 = vpop.f32.mrf.mxu1  ;;  %v3647_v47 = vadd.f32 %v3646_v53, %v3645_v41  ;;  %v3600_v2 = vmul.f32 %v6292_v51, %v6292_v51  ;;  %v3555_v26 = vsel %vm1131_vm8, %v6292_v51, 0.0  ;;  %v3497_v53 = vld [vmem:[%s6305_s27] sm:$0x1] }
 0x26b   : > { %v2368_v43 = vadd.f32 %v2322_v33, %v1320_v15 }
 0x26c   : > { %3487 = vst.msk [vmem:[%s5964_s25 + $0x74] sm:$0xf] %vm3457_vm10, %v3454_v12  ;;  %v3660_v25 = vsel %vm1131_vm8, %v3600_v2, 0.0 }
 0x26d   : > { %v3416_v42 = vadd.f32 %v3370_v18, %v2368_v43 }
 0x26f   : > { %v3388_v61 = vpop.f32.mrf.mxu3  ;;  %v3448_v57 = vpack.c.bf16 %v3416_v42, %v3416_v42  ;;  %v3543_v3 = vsel %vm1131_vm8, %v3416_v42, 0.0  ;;  %v3594_v19 = vmul.f32 %v3416_v42, %v3416_v42 }
 0x270   : > { %v3423_v35 = vadd.f32 %v3388_v61, %v6203_v32  ;;  %v3544_v63 = vadd.f32 %v3543_v3, %v3542_v0  ;;  %v3650_v32 = vsel %vm1131_vm8, %v3595_v13, 0.0  ;;  %v3570_v3 = vld [vmem:[%s6311_s29] sm:$0x1] }
 0x271   : > { %3481 = vst.msk [vmem:[%s5964_s25 + $0x5c] sm:$0xf] %vm3457_vm10, %v3448_v57  ;;  %v3648_v8 = vsel %vm1131_vm8, %v3594_v19, 0.0 }
 0x272   : > { %v3455_v28 = vpack.c.bf16 %v3423_v35, %v3423_v35  ;;  %v3546_v39 = vadd.f32 %v3545_v58, %v3544_v63  ;;  %v3649_v52 = vadd.f32 %v3648_v8, %v3647_v47  ;;  %v3601_v40 = vmul.f32 %v3423_v35, %v3423_v35 }
 0x273   : > { %v3557_v30 = vsel %vm1131_vm8, %v3423_v35, 0.0 }
 0x274   : > { %3488 = vst.msk [vmem:[%s5964_s25 + $0x78] sm:$0xf] %vm3457_vm10, %v3455_v28  ;;  %v3548_v5 = vadd.f32 %v3547_v55, %v3546_v39  ;;  %v3651_v34 = vadd.f32 %v3650_v32, %v3649_v52  ;;  %v3662_v51 = vsel %vm1131_vm8, %v3601_v40, 0.0 }
 0x276   : > { %v3550_v44 = vadd.f32 %v3549_v14, %v3548_v5  ;;  %v3653_v36 = vadd.f32 %v3652_v17, %v3651_v34 }
 0x277   : > { %v3390_v4 = vpop.f32.mrf.mxu3 }
 0x278   : > { %v3424_v31 = vadd.f32 %v3390_v4, %v6212_v20  ;;  %v3552_v60 = vadd.f32 %v3551_v62, %v3550_v44  ;;  %v3655_v37 = vadd.f32 %v3654_v16, %v3653_v36 }
 0x27a   : > { %v3456_v46 = vpack.c.bf16 %v3424_v31, %v3424_v31  ;;  %v3554_v21 = vadd.f32 %v3553_v10, %v3552_v60  ;;  %v3657_v11 = vadd.f32 %v3656_v49, %v3655_v37  ;;  %v3602_v59 = vmul.f32 %v3424_v31, %v3424_v31 }
 0x27b   : > { %v3559_v15 = vsel %vm1131_vm8, %v3424_v31, 0.0 }
 0x27c   : > { %3489 = vst.msk [vmem:[%s5964_s25 + $0x7c] sm:$0xf] %vm3457_vm10, %v3456_v46  ;;  %v3556_v20 = vadd.f32 %v3555_v26, %v3554_v21  ;;  %v3659_v29 = vadd.f32 %v3658_v48, %v3657_v11  ;;  %v3664_v33 = vsel %vm1131_vm8, %v3602_v59, 0.0  ;;  %s6370_s25 = sshll.u32 %s3713_s16, 4  ;;  %s3718_s25 = int_to_ptr.hbm [resolvable:$true] %s6370_s25 }
 0x27e   : > { %v3558_v38 = vadd.f32 %v3557_v30, %v3556_v20  ;;  %v3661_v56 = vadd.f32 %v3660_v25, %v3659_v29 }
 0x280   : > { %v3560_v9 = vadd.f32 %v3559_v15, %v3558_v38  ;;  %v3663_v12 = vadd.f32 %v3662_v51, %v3661_v56 }
 0x282   : > { %v3561_v7 = vrot.slane %v3560_v9, 4  ;;  %v3665_v54 = vadd.f32 %v3664_v33, %v3663_v12 }
 0x284   : > { %v3562_v43 = vadd.f32 %v3561_v7, %v3560_v9  ;;  %v3666_v6 = vrot.slane %v3665_v54, 4 }
 0x286   : > { %v3563_v1 = vrot.slane %v3562_v43, 2  ;;  %v3667_v18 = vadd.f32 %v3666_v6, %v3665_v54 }
 0x288   : > { %v3564_v45 = vadd.f32 %v3563_v1, %v3562_v43  ;;  %v3668_v42 = vrot.slane %v3667_v18, 2 }
 0x28a   : > { %v3565_v24 = vrot.slane %v3564_v45, 1  ;;  %v3669_v0 = vadd.f32 %v3668_v42, %v3667_v18 }
 0x28c   : > { %v3566_v41 = vadd.f32 %v3565_v24, %v3564_v45  ;;  %v3670_v61 = vrot.slane %v3669_v0, 1 }
 0x28e   : > { %v3567_v57 = vadd.f32 %v3566_v41, %v3497_v53  ;;  %v3671_v19 = vadd.f32 %v3670_v61, %v3669_v0 }
 0x290   : > { %3569 = vst.msk [vmem:[%s6305_s27] sm:$0x1] %vm3494_vm11, %v3567_v57 }
 0x291   : > { %4413 = shalt.err (!%p4410_p5)
}
 0x292   : > { %4321 = dma.vmem_to_hbm [thread:$0]  (%p4571_p4), %s3703_s17, 16, %s3705_s7, %s3684_s21   ;;  %v3672_v13 = vadd.f32 %v3671_v19, %v3570_v3 }
 0x293   : > { %s3688_s27 = scalar_lea.sflag [#allocation5], %s6289_s13  ;;  %s4428_s16 = sshra.s32 %s3718_s25, 4  ;;  %s4429_s16 = int_to_ptr.hbm [resolvable:$true] %s4428_s16 }
 0x294   : > { %3673 = vst.msk [vmem:[%s6311_s29] sm:$0x1] %vm3494_vm11, %v3672_v13  ;;  %s4430_s8 = scalar_lea.hbm %s4429_s16, 1  ;;  %s4434_s9 = scalar_lea.hbm %s6434_s5, 2 }
 0x295   : > { %p4431_p6 = scmp.ne.s32.totalorder %s4429_s16, %s4430_s8  ;;  %p4435_p10 = scmp.lt.s32.totalorder %s4429_s16, %s6434_s5 }
 0x296   : > { %p4436_p11 = scmp.lt.s32.totalorder %s4434_s9, %s4430_s8 }
 0x297   : > { %p4432_p7 = pnand %p4431_p6, %p4571_p4 }
 0x298   : > { %p4437_p12 = por %p4436_p11, %p4435_p10 }
 0x299   : > { %p4433_p9 = pneg %p4432_p7 }
 0x29b   : > { %p4438_p13 = pnand %p4437_p12, %p4433_p9 }
 0x29d   : > { %4441 = shalt.err (!%p4438_p13)
}
 0x29e   : > { %4322 = dma.vmem_to_hbm [thread:$0]  (%p4571_p4), %s6375_s24, 16, %s3718_s25, %s3688_s27  }
 0x29f PF: > { %p4332_p0 = scmp.ge.s32.totalorder %s4496_s23, 2  ;;  %s3741_s13 = sand.u32 1, %s4476_s18  }
 0x2a0   : > { %s3742_s29 = scalar_lea.sflag [#allocation3], %s3741_s13 }
 0x2a1   : > { %p4326_p1 = pnand %p4332_p0, %p4578_p8 }
 0x2a3   : > { %p4327_p2 = pneg %p4326_p1 }
 0x2a5   : > { %4467 = dma.done.wait (%p4327_p2), %s3742_s29, 16  }
 0x2a6   : > { %4469 = vsyncadd (%p4327_p2), %s3742_s29, 4294967280  ;;  %s3751_s17 = scalar_lea.sflag [#allocation5], %s3741_s13 }
 0x2a7   : > { %4471 = dma.done.wait (%p4327_p2), %s3751_s17, 16  }
 0x2a8   : > { %4473 = vsyncadd (%p4327_p2), %s3751_s17, 4294967280  ;;  %s22_s23 = sadd.s32 1, %s4496_s23   ;;  %s6441_s18 = smov %s4480_s19 }
 0x2a9   : > { %p19_p3 = scmp.ge.s32.totalorder %s22_s23, 4   ;;  %s6442_s19 = smov %s4484_s20 }
 0x2aa   : > { %s6443_s20 = smov %s4584_s6  ;;  %s6444_s21 = smov %s4492_s22 }
 0x2ab   : > { %s6445_s22 = smov %s6447_s26  ;;  %21 = sbr.rel (!%p19_p3) target bundleno = 6 (0x6), region = 105 }
 0x2b0   :  { %3756 = vsyncpa [#allocation3], 1 }
 0x2b1   :  { %3758 = vsyncpa [#allocation3 + $0x1], 1 }
 0x2b2   :  { %3759 = vsyncpa [#allocation5], 1 }
 0x2b3   :  { %3761 = vsyncpa [#allocation5 + $0x1], 1 }

</bundles_post_ra>
